<compile_context>
chip_gen: v7x
topology: tpu7x:2x2x1
jax: 0.10.0
libtpu: 0.0.40
codegen_flags: <defaults>
</compile_context>

<pallas_src>
import functools
import math

import jax
import jax.numpy as jnp
from jax import lax
from jax.experimental import pallas as pl
from jax.experimental.pallas import tpu as pltpu

# Scoped-VMEM cap: above the 16/32 MiB defaults on v5e/v6e, with headroom under
# v7x's 64 MiB physical VMEM per TensorCore.
_VMEM_LIMIT = 48 * 1024 * 1024


# ----------------------------------------------------------------------------
# Tile-size helpers: aligned tiles when possible, full dims for tiny shapes
# ----------------------------------------------------------------------------
def _pick_tile(n, caps):
    for t in caps:
        if n % t == 0:
            return t
    return n                       # ragged / tiny: full dim is always legal


def _row_tile(m, cap=256):
    return _pick_tile(m, (cap, 128, 64, 32, 16, 8))


def _col_tile(n, cap=256):
    return _pick_tile(n, (cap, 128))


def _seq_tile(s, cap=128):
    return _pick_tile(s, (cap, 64, 32, 16, 8))


# ----------------------------------------------------------------------------
# Fused (LayerNorm?) -> bf16 matmul -> bias -> (ReLU?) -> (+residual?) kernel
# ----------------------------------------------------------------------------
def _fused_matmul_kernel(*refs, do_ln, relu, has_residual, eps):
    idx = 0
    x_ref = refs[idx]; idx += 1
    if do_ln:
        g_ref = refs[idx]; b_ln_ref = refs[idx + 1]; idx += 2
    w_ref = refs[idx]; b_ref = refs[idx + 1]; idx += 2
    if has_residual:
        r_ref = refs[idx]; idx += 1
    o_ref = refs[idx]

    x = x_ref[...]
    if do_ln:
        xf = x.astype(jnp.float32)
        mean = jnp.mean(xf, axis=-1, keepdims=True)
        var = jnp.mean(jnp.square(xf - mean), axis=-1, keepdims=True)
        xf = (xf - mean) * lax.rsqrt(var + eps)
        xf = xf * g_ref[...].astype(jnp.float32) + b_ln_ref[...].astype(jnp.float32)
        xm = xf.astype(jnp.bfloat16)
    else:
        xm = x.astype(jnp.bfloat16)

    # bf16 x bf16 MXU matmul with f32 accumulation.
    y = jnp.dot(xm, w_ref[...].astype(jnp.bfloat16),
                preferred_element_type=jnp.float32)
    y = y + b_ref[...].astype(jnp.float32)
    if relu:
        y = jnp.maximum(y, 0.0)
    if has_residual:
        y = y + r_ref[...].astype(jnp.float32)
    o_ref[...] = y.astype(o_ref.dtype)


def fused_matmul(x2d, w, b, *, gamma=None, beta=None, relu=False,
                 residual=None, eps=1e-5, out_dtype=jnp.float32):
    """(LN(x) if gamma else x) @ w + b, optional ReLU, optional +residual.

    x2d: (M, K), w: (K, N) [bf16], b: (N,), gamma/beta: (K,), residual: (M, N).
    Tiled over (M, N); K stays resident so LayerNorm can be fused.
    """
    m, kdim = x2d.shape
    n = w.shape[1]
    tm = _row_tile(m)
    tn = _col_tile(n)
    do_ln = gamma is not None
    has_res = residual is not None

    args = [x2d]
    in_specs = [pl.BlockSpec((tm, kdim), lambda i, j: (i, 0))]
    if do_ln:
        args += [gamma.reshape(1, kdim), beta.reshape(1, kdim)]
        in_specs += [pl.BlockSpec((1, kdim), lambda i, j: (0, 0)),
                     pl.BlockSpec((1, kdim), lambda i, j: (0, 0))]
    args += [w, b.reshape(1, n)]
    in_specs += [pl.BlockSpec((kdim, tn), lambda i, j: (0, j)),
                 pl.BlockSpec((1, tn), lambda i, j: (0, j))]
    if has_res:
        args.append(residual)
        in_specs.append(pl.BlockSpec((tm, tn), lambda i, j: (i, j)))

    kernel = functools.partial(_fused_matmul_kernel, do_ln=do_ln, relu=relu,
                               has_residual=has_res, eps=float(eps))

    bytes_io = int(x2d.size * x2d.dtype.itemsize
                   + w.size * w.dtype.itemsize * (m // tm)
                   + m * n * jnp.dtype(out_dtype).itemsize
                   + (residual.size * residual.dtype.itemsize if has_res else 0))
    cost = pl.CostEstimate(flops=2 * m * kdim * n,
                           transcendentals=m if do_ln else 0,
                           bytes_accessed=bytes_io)

    return pl.pallas_call(
        kernel,
        out_shape=jax.ShapeDtypeStruct((m, n), out_dtype),
        grid=(m // tm, n // tn),
        in_specs=in_specs,
        out_specs=pl.BlockSpec((tm, tn), lambda i, j: (i, j)),
        compiler_params=pltpu.CompilerParams(
            dimension_semantics=("parallel", "parallel"),
            vmem_limit_bytes=_VMEM_LIMIT),
        cost_estimate=cost,
    )(*args)


# ----------------------------------------------------------------------------
# Flash-style grouped-query attention.
#   q slab  : (B*Sq, q_off + Hq*Dh)   -- Q columns start at q_off
#   kv slab : (B*Sk, >= 2*Hkv*Dh)     -- K at cols [0, Hkv*Dh), V next
#   out     : (B*Sq, Hq*Dh)           bf16
# Grid (B, q-blocks, kv-blocks); running m/l/acc scratch; deferred softmax
# normalization; per-head outputs written directly to accumulator slices.
# ----------------------------------------------------------------------------
def _gqa_flash_kernel(q_ref, kv_ref, o_ref, m_ref, l_ref, acc_ref, *,
                      hq, hkv, dh, q_off, sq_t, sk_t, nk,
                      inv_scale, is_causal):
    qi = pl.program_id(1)
    ki = pl.program_id(2)
    g = hq // hkv
    v_off = hkv * dh

    @pl.when(ki == 0)
    def _init():
        m_ref[...] = jnp.full(m_ref.shape, -jnp.inf, m_ref.dtype)
        l_ref[...] = jnp.zeros(l_ref.shape, l_ref.dtype)
        acc_ref[...] = jnp.zeros(acc_ref.shape, acc_ref.dtype)

    def _compute():
        q_all = q_ref[...]                           # (sq_t, Wq)  bf16
        kv_all = kv_ref[...]                         # (sk_t, Wkv) bf16
        if is_causal:
            row = qi * sq_t + lax.broadcasted_iota(jnp.int32, (sq_t, sk_t), 0)
            col = ki * sk_t + lax.broadcasted_iota(jnp.int32, (sq_t, sk_t), 1)
            keep = col <= row
        for h in range(hkv):                         # static unroll over KV heads
            k_h = kv_all[:, h * dh:(h + 1) * dh]                 # (sk_t, dh)
            v_h = kv_all[:, v_off + h * dh: v_off + (h + 1) * dh]
            for j in range(g):                       # query heads in this group
                hi = h * g + j
                qh = q_all[:, q_off + hi * dh: q_off + (hi + 1) * dh]
                s = lax.dot_general(qh, k_h, (((1,), (1,)), ((), ())),
                                    preferred_element_type=jnp.float32)
                s = s * inv_scale                    # f32 scores (sq_t, sk_t)
                if is_causal:
                    s = jnp.where(keep, s, -1e30)
                m_prev = m_ref[hi]                                   # (sq_t, 1)
                m_cur = jnp.maximum(m_prev, jnp.max(s, axis=-1, keepdims=True))
                alpha = jnp.exp(m_prev - m_cur)
                p = jnp.exp(s - m_cur)               # un-normalized probabilities
                l_ref[hi] = alpha * l_ref[hi] + jnp.sum(p, axis=-1, keepdims=True)
                pv = jnp.dot(p.astype(kv_all.dtype), v_h,
                             preferred_element_type=jnp.float32)     # (sq_t, dh)
                sl = slice(hi * dh, (hi + 1) * dh)
                acc_ref[:, sl] = alpha * acc_ref[:, sl] + pv
                m_ref[hi] = m_cur

    if is_causal:
        # Skip kv blocks that are entirely above the causal diagonal.
        @pl.when(ki * sk_t <= (qi + 1) * sq_t - 1)
        def _masked_compute():
            _compute()
    else:
        _compute()

    @pl.when(ki == nk - 1)
    def _finalize():
        # Deferred, exact normalization on the small (sq_t, dh) accumulators,
        # then one lane-dense store of the whole output block.
        for hi in range(hq):
            sl = slice(hi * dh, (hi + 1) * dh)
            acc_ref[:, sl] = acc_ref[:, sl] * (1.0 / l_ref[hi])
        o_ref[...] = acc_ref[...].astype(o_ref.dtype)


def gqa_attention(q, kv, *, batch, sq, sk, hq, hkv, dh, q_col_offset,
                  is_causal, out_dtype=jnp.bfloat16):
    dq = hq * dh
    dkv2 = 2 * hkv * dh
    wq_cols = q.shape[1]
    wkv_cols = kv.shape[1]
    sq_t = _seq_tile(sq)
    sk_t = _seq_tile(sk)
    nq = sq // sq_t
    nk = sk // sk_t

    # Narrow the streamed K/V window when it is lane-aligned or already the
    # full slab; otherwise fall back to the full slab width (always legal).
    kv_block_w = dkv2 if (dkv2 == wkv_cols or dkv2 % 128 == 0) else wkv_cols

    kernel = functools.partial(
        _gqa_flash_kernel, hq=hq, hkv=hkv, dh=dh, q_off=q_col_offset,
        sq_t=sq_t, sk_t=sk_t, nk=nk,
        inv_scale=1.0 / math.sqrt(dh), is_causal=bool(is_causal))

    cost = pl.CostEstimate(
        flops=4 * batch * hq * sq * sk * dh,
        transcendentals=batch * hq * sq * sk,
        bytes_accessed=int(q.size * q.dtype.itemsize
                           + kv.size * kv.dtype.itemsize * nq
                           + batch * sq * dq * jnp.dtype(out_dtype).itemsize))

    return pl.pallas_call(
        kernel,
        out_shape=jax.ShapeDtypeStruct((batch * sq, dq), out_dtype),
        grid=(batch, nq, nk),
        in_specs=[
            pl.BlockSpec((sq_t, wq_cols), lambda b, qi, ki: (b * nq + qi, 0)),
            pl.BlockSpec((sk_t, kv_block_w), lambda b, qi, ki: (b * nk + ki, 0)),
        ],
        out_specs=pl.BlockSpec((sq_t, dq), lambda b, qi, ki: (b * nq + qi, 0)),
        scratch_shapes=[
            pltpu.VMEM((hq, sq_t, 1), jnp.float32),   # running row max (per head)
            pltpu.VMEM((hq, sq_t, 1), jnp.float32),   # running row sum (per head)
            pltpu.VMEM((sq_t, dq), jnp.float32),      # output accumulator
        ],
        compiler_params=pltpu.CompilerParams(
            dimension_semantics=("parallel", "parallel", "arbitrary"),
            vmem_limit_bytes=_VMEM_LIMIT),
        cost_estimate=cost,
    )(q, kv)


# ----------------------------------------------------------------------------
# Decoder-layer forward (orchestration only; hot paths are the kernels above)
# ----------------------------------------------------------------------------
def decoder_layer(tgt, memory, params, *, nhead, kv_heads,
                  tgt_is_causal=False, memory_is_causal=False, eps=1e-5):
    b, sq, d = tgt.shape
    _, sm, _ = memory.shape
    dh = d // nhead
    kv_dim = dh * kv_heads

    x = tgt.reshape(b * sq, d).astype(jnp.float32)      # residual stream in f32
    mem = memory.reshape(b * sm, d)

    sa = params["self_attn"]
    ca = params["cross_attn"]

    # --- self-attention block: x + Wo( GQA( LN1(x) ) )  (layer_norm=False) ---
    # Fused LN1 -> packed [K|V|Q] projection: one x pass, one LN, wide N tile.
    qkv = fused_matmul(x, sa["w_kvq"], sa["b_kvq"],
                       gamma=params["norm1_w"], beta=params["norm1_b"],
                       eps=eps, out_dtype=jnp.bfloat16)
    attn = gqa_attention(qkv, qkv, batch=b, sq=sq, sk=sq, hq=nhead,
                         hkv=kv_heads, dh=dh, q_col_offset=2 * kv_dim,
                         is_causal=tgt_is_causal)
    x = fused_matmul(attn, sa["wo"], sa["bo"], residual=x,
                     out_dtype=jnp.float32)              # dropout = identity

    # --- cross-attention block: x + Wo( postLN( GQA( LN2(x), mem, mem ) ) ) --
    q = fused_matmul(x, ca["wq"], ca["bq"],
                     gamma=params["norm2_w"], beta=params["norm2_b"],
                     eps=eps, out_dtype=jnp.bfloat16)
    kv = fused_matmul(mem, ca["w_kv"], ca["b_kv"],
                      out_dtype=jnp.bfloat16)            # memory is NOT normed
    attn = gqa_attention(q, kv, batch=b, sq=sq, sk=sm, hq=nhead,
                         hkv=kv_heads, dh=dh, q_col_offset=0,
                         is_causal=memory_is_causal)
    x = fused_matmul(attn, ca["wo"], ca["bo"],
                     gamma=ca["norm_w"], beta=ca["norm_b"],
                     eps=eps, residual=x, out_dtype=jnp.float32)

    # --- feed-forward block: x + W2( LN4( relu( W1( LN3(x) ) ) ) ) ---
    h = fused_matmul(x, params["w1"], params["b1"],
                     gamma=params["norm3_w"], beta=params["norm3_b"],
                     eps=eps, relu=True, out_dtype=jnp.bfloat16)
    x = fused_matmul(h, params["w2"], params["b2"],
                     gamma=params["norm4_w"], beta=params["norm4_b"],
                     eps=eps, residual=x, out_dtype=jnp.float32)
    return x.reshape(b, sq, d)


# ----------------------------------------------------------------------------
# Deterministic parameter init (xavier_normal weights, zero biases, LN = 1/0).
# Weight concatenations are hoisted here (not per-forward) and stored in bf16.
# ----------------------------------------------------------------------------
def xavier_normal(key, fan_in, fan_out, gain=1.0):
    std = gain * math.sqrt(2.0 / (fan_in + fan_out))
    # stored as (in, out) so kernels compute x @ W (torch stores (out, in))
    return std * jax.random.normal(key, (fan_in, fan_out), dtype=jnp.float32)


def make_params(key, d_model, nhead, kv_heads, dim_ff, gamma_init=1.0):
    kv_dim = d_model // nhead * kv_heads
    keys = jax.random.split(key, 10)
    zeros = lambda n: jnp.zeros((n,), jnp.float32)
    ones = lambda n: jnp.ones((n,), jnp.float32)
    bf16 = lambda w: w.astype(jnp.bfloat16)

    sa_wq = xavier_normal(keys[0], d_model, d_model)
    sa_wk = xavier_normal(keys[1], d_model, kv_dim)
    sa_wv = xavier_normal(keys[2], d_model, kv_dim, gain=gamma_init)
    self_attn = dict(
        # packed [K | V | Q] projection weight / bias
        w_kvq=bf16(jnp.concatenate([sa_wk, sa_wv, sa_wq], axis=1)),
        b_kvq=zeros(2 * kv_dim + d_model),
        wo=bf16(xavier_normal(keys[3], d_model, d_model, gain=gamma_init)),
        bo=zeros(d_model),
    )
    ca_wk = xavier_normal(keys[5], d_model, kv_dim)
    ca_wv = xavier_normal(keys[6], d_model, kv_dim, gain=gamma_init)
    cross_attn = dict(
        wq=bf16(xavier_normal(keys[4], d_model, d_model)), bq=zeros(d_model),
        w_kv=bf16(jnp.concatenate([ca_wk, ca_wv], axis=1)),
        b_kv=zeros(2 * kv_dim),
        wo=bf16(xavier_normal(keys[7], d_model, d_model, gain=gamma_init)),
        bo=zeros(d_model),
        norm_w=ones(d_model), norm_b=zeros(d_model),     # post-attention LN
    )
    return dict(
        self_attn=self_attn,
        cross_attn=cross_attn,
        norm1_w=ones(d_model), norm1_b=zeros(d_model),
        norm2_w=ones(d_model), norm2_b=zeros(d_model),
        norm3_w=ones(d_model), norm3_b=zeros(d_model),
        norm4_w=ones(dim_ff), norm4_b=zeros(dim_ff),
        w1=bf16(xavier_normal(keys[8], d_model, dim_ff, gain=gamma_init)),
        b1=zeros(dim_ff),
        w2=bf16(xavier_normal(keys[9], dim_ff, d_model, gain=gamma_init)),
        b2=zeros(d_model),
    )


# ----------------------------------------------------------------------------
if __name__ == "__main__":
    # small shapes consistent with the module
    B, S_TGT, S_MEM = 2, 8, 8
    D_MODEL, NHEAD, KV_HEADS, DIM_FF = 32, 4, 2, 64

    root = jax.random.PRNGKey(0)
    k_tgt, k_mem, k_par = jax.random.split(root, 3)
    tgt = jax.random.normal(k_tgt, (B, S_TGT, D_MODEL), dtype=jnp.float32)
    memory = jax.random.normal(k_mem, (B, S_MEM, D_MODEL), dtype=jnp.float32)
    params = make_params(k_par, D_MODEL, NHEAD, KV_HEADS, DIM_FF)

    fwd = jax.jit(
        functools.partial(
            decoder_layer,
            nhead=NHEAD,
            kv_heads=KV_HEADS,
            tgt_is_causal=True,
            memory_is_causal=False,
        )
    )
    out = fwd(tgt, memory, params)
    out = jax.block_until_ready(out)
    assert out.shape == (B, S_TGT, D_MODEL) and out.dtype == jnp.float32
    assert bool(jnp.all(jnp.isfinite(out)))
    print("KERNEL_OK")
</pallas_src>

<mosaic_0001>
module attributes {stable_mosaic.version = 11 : i64} {
  func.func @_fused_matmul_kernel(%arg0: i32, %arg1: i32, %arg2: memref<16x32xbf16, #tpu.memory_space<vmem>>, %arg3: memref<32x32xbf16, #tpu.memory_space<vmem>>, %arg4: memref<1x32xf32, #tpu.memory_space<vmem>>, %arg5: memref<16x32xf32, #tpu.memory_space<vmem>>, %arg6: memref<16x32xf32, #tpu.memory_space<vmem>>) attributes {dimension_semantics = [#tpu.dimension_semantics<parallel>, #tpu.dimension_semantics<parallel>], iteration_bounds = array<i64: 1, 1>, scalar_prefetch = 0 : i64, scratch_operands = 0 : i64, tpu.core_type = #tpu.core_type<tc>, window_params = [{transform_indices = @transform_0, window_bounds = array<i64: 16, 32>}, {transform_indices = @transform_1, window_bounds = array<i64: 32, 32>}, {transform_indices = @transform_2, window_bounds = array<i64: 1, 32>}, {transform_indices = @transform_3, window_bounds = array<i64: 16, 32>}, {transform_indices = @transform_4, window_bounds = array<i64: 16, 32>}]} {
    %c0 = arith.constant 0 : index
    %c0_0 = arith.constant 0 : index
    %0 = vector.load %arg2[%c0, %c0_0] : memref<16x32xbf16, #tpu.memory_space<vmem>>, vector<16x32xbf16>
    %c0_1 = arith.constant 0 : index
    %c0_2 = arith.constant 0 : index
    %1 = vector.load %arg3[%c0_1, %c0_2] : memref<32x32xbf16, #tpu.memory_space<vmem>>, vector<32x32xbf16>
    %cst = arith.constant dense<0.000000e+00> : vector<16x32xf32>
    %2 = tpu.matmul %0, %1, %cst {dimension_numbers = #tpu.dot_dimension_numbers<[1], [0], [0], [1], [0, 0, 1, 1], [], []>} : vector<16x32xbf16>, vector<32x32xbf16>, vector<16x32xf32> -> vector<16x32xf32>
    %c0_3 = arith.constant 0 : index
    %c0_4 = arith.constant 0 : index
    %3 = vector.load %arg4[%c0_3, %c0_4] : memref<1x32xf32, #tpu.memory_space<vmem>>, vector<1x32xf32>
    %4 = vector.broadcast %3 : vector<1x32xf32> to vector<16x32xf32>
    %5 = arith.addf %2, %4 : vector<16x32xf32>
    %c0_5 = arith.constant 0 : index
    %c0_6 = arith.constant 0 : index
    %6 = vector.load %arg5[%c0_5, %c0_6] : memref<16x32xf32, #tpu.memory_space<vmem>>, vector<16x32xf32>
    %7 = arith.addf %5, %6 : vector<16x32xf32>
    %c0_7 = arith.constant 0 : index
    %c0_8 = arith.constant 0 : index
    %8 = vector.load %arg6[%c0_7, %c0_8] : memref<16x32xf32, #tpu.memory_space<vmem>>, vector<16x32xf32>
    tpu.vector_store %arg6[%c0_7, %c0_8], %7 {strides = array<i32>} : memref<16x32xf32, #tpu.memory_space<vmem>>, vector<16x32xf32>,
    return
  }
  func.func @transform_0(%arg0: i32, %arg1: i32) -> (i32, i32) {
    %c0_i32 = arith.constant 0 : i32
    %c0_i32_0 = arith.constant 0 : i32
    return %arg0, %c0_i32 : i32, i32
  }
  func.func @transform_1(%arg0: i32, %arg1: i32) -> (i32, i32) {
    %c0_i32 = arith.constant 0 : i32
    %c0_i32_0 = arith.constant 0 : i32
    return %c0_i32, %arg1 : i32, i32
  }
  func.func @transform_2(%arg0: i32, %arg1: i32) -> (i32, i32) {
    %c0_i32 = arith.constant 0 : i32
    %c0_i32_0 = arith.constant 0 : i32
    return %c0_i32, %arg1 : i32, i32
  }
  func.func @transform_3(%arg0: i32, %arg1: i32) -> (i32, i32) {
    %c0_i32 = arith.constant 0 : i32
    return %arg0, %arg1 : i32, i32
  }
  func.func @transform_4(%arg0: i32, %arg1: i32) -> (i32, i32) {
    %c0_i32 = arith.constant 0 : i32
    return %arg0, %arg1 : i32, i32
  }
}

module attributes {stable_mosaic.version = 11 : i64} {
  func.func @_gqa_flash_kernel(%arg0: i32, %arg1: i32, %arg2: i32, %arg3: memref<8x64xbf16, #tpu.memory_space<vmem>>, %arg4: memref<8x64xbf16, #tpu.memory_space<vmem>>, %arg5: memref<8x32xbf16, #tpu.memory_space<vmem>>, %arg6: memref<4x8x1xf32, #tpu.memory_space<vmem>>, %arg7: memref<4x8x1xf32, #tpu.memory_space<vmem>>, %arg8: memref<8x32xf32, #tpu.memory_space<vmem>>) attributes {dimension_semantics = [#tpu.dimension_semantics<parallel>, #tpu.dimension_semantics<parallel>, #tpu.dimension_semantics<arbitrary>], iteration_bounds = array<i64: 2, 1, 1>, scalar_prefetch = 0 : i64, scratch_operands = 3 : i64, tpu.core_type = #tpu.core_type<tc>, window_params = [{transform_indices = @transform_0, window_bounds = array<i64: 8, 64>}, {transform_indices = @transform_1, window_bounds = array<i64: 8, 64>}, {transform_indices = @transform_2, window_bounds = array<i64: 8, 32>}]} {
    %c0_i32 = arith.constant 0 : i32
    %0 = arith.cmpi eq, %arg2, %c0_i32 : i32
    %1 = arith.extui %0 : i1 to i32
    %c0_i32_0 = arith.constant 0 : i32
    %2 = arith.cmpi ne, %1, %c0_i32_0 : i32
    scf.if %2 {
      %cst = arith.constant 0xFF800000 : f32
      %13 = vector.broadcast %cst : f32 to vector<4x8x1xf32>
      %c0 = arith.constant 0 : index
      %c0_6 = arith.constant 0 : index
      %c0_7 = arith.constant 0 : index
      %14 = vector.load %arg6[%c0, %c0_6, %c0_7] : memref<4x8x1xf32, #tpu.memory_space<vmem>>, vector<4x8x1xf32>
      tpu.vector_store %arg6[%c0, %c0_6, %c0_7], %13 {strides = array<i32>} : memref<4x8x1xf32, #tpu.memory_space<vmem>>, vector<4x8x1xf32>,
      %cst_8 = arith.constant 0.000000e+00 : f32
      %15 = vector.broadcast %cst_8 : f32 to vector<4x8x1xf32>
      %c0_9 = arith.constant 0 : index
      %c0_10 = arith.constant 0 : index
      %c0_11 = arith.constant 0 : index
      %16 = vector.load %arg7[%c0_9, %c0_10, %c0_11] : memref<4x8x1xf32, #tpu.memory_space<vmem>>, vector<4x8x1xf32>
      tpu.vector_store %arg7[%c0_9, %c0_10, %c0_11], %15 {strides = array<i32>} : memref<4x8x1xf32, #tpu.memory_space<vmem>>, vector<4x8x1xf32>,
      %cst_12 = arith.constant 0.000000e+00 : f32
      %17 = vector.broadcast %cst_12 : f32 to vector<8x32xf32>
      %c0_13 = arith.constant 0 : index
      %c0_14 = arith.constant 0 : index
      %18 = vector.load %arg8[%c0_13, %c0_14] : memref<8x32xf32, #tpu.memory_space<vmem>>, vector<8x32xf32>
      tpu.vector_store %arg8[%c0_13, %c0_14], %17 {strides = array<i32>} : memref<8x32xf32, #tpu.memory_space<vmem>>, vector<8x32xf32>,
    } else {
    }
    %c8_i32 = arith.constant 8 : i32
    %3 = arith.muli %arg2, %c8_i32 : i32
    %c1_i32 = arith.constant 1 : i32
    %4 = arith.addi %arg1, %c1_i32 : i32
    %c8_i32_1 = arith.constant 8 : i32
    %5 = arith.muli %4, %c8_i32_1 : i32
    %c1_i32_2 = arith.constant 1 : i32
    %6 = arith.subi %5, %c1_i32_2 : i32
    %7 = arith.cmpi sle, %3, %6 : i32
    %8 = arith.extui %7 : i1 to i32
    %c0_i32_3 = arith.constant 0 : i32
    %9 = arith.cmpi ne, %8, %c0_i32_3 : i32
    scf.if %9 {
      %c0 = arith.constant 0 : index
      %c0_6 = arith.constant 0 : index
      %13 = vector.load %arg3[%c0, %c0_6] : memref<8x64xbf16, #tpu.memory_space<vmem>>, vector<8x64xbf16>
      %c0_7 = arith.constant 0 : index
      %c0_8 = arith.constant 0 : index
      %14 = vector.load %arg4[%c0_7, %c0_8] : memref<8x64xbf16, #tpu.memory_space<vmem>>, vector<8x64xbf16>
      %c8_i32_9 = arith.constant 8 : i32
      %15 = arith.muli %arg1, %c8_i32_9 : i32
      %16 = tpu.iota {dimensions = array<i32: 0>} : vector<8x8xi32>
      %17 = vector.broadcast %15 : i32 to vector<8x8xi32>
      %18 = arith.addi %17, %16 : vector<8x8xi32>
      %c8_i32_10 = arith.constant 8 : i32
      %19 = arith.muli %arg2, %c8_i32_10 : i32
      %20 = tpu.iota {dimensions = array<i32: 1>} : vector<8x8xi32>
      %21 = vector.broadcast %19 : i32 to vector<8x8xi32>
      %22 = arith.addi %21, %20 : vector<8x8xi32>
      %23 = arith.cmpi sle, %22, %18 : vector<8x8xi32>
      %24 = vector.extract_strided_slice %14 {offsets = [0, 0], sizes = [8, 8], strides = [1, 1]} : vector<8x64xbf16> to vector<8x8xbf16>
      %25 = vector.extract_strided_slice %14 {offsets = [0, 16], sizes = [8, 8], strides = [1, 1]} : vector<8x64xbf16> to vector<8x8xbf16>
      %26 = vector.extract_strided_slice %13 {offsets = [0, 32], sizes = [8, 8], strides = [1, 1]} : vector<8x64xbf16> to vector<8x8xbf16>
      %cst = arith.constant dense<0.000000e+00> : vector<8x8xf32>
      %27 = tpu.matmul %26, %24, %cst {dimension_numbers = #tpu.dot_dimension_numbers<[1], [1], [0], [0], [0, 0, 1, 0], [], []>} : vector<8x8xbf16>, vector<8x8xbf16>, vector<8x8xf32> -> vector<8x8xf32>
      %cst_11 = arith.constant 0.353553385 : f32
      %28 = vector.broadcast %cst_11 : f32 to vector<8x8xf32>
      %29 = arith.mulf %27, %28 : vector<8x8xf32>
      %cst_12 = arith.constant -1.000000e+30 : f32
      %30 = vector.broadcast %cst_12 : f32 to vector<8x8xf32>
      %31 = arith.select %23, %29, %30 : vector<8x8xi1>, vector<8x8xf32>
      %c0_13 = arith.constant 0 : index
      %c0_14 = arith.constant 0 : index
      %c0_15 = arith.constant 0 : index
      %32 = vector.load %arg6[%c0_13, %c0_14, %c0_15] : memref<4x8x1xf32, #tpu.memory_space<vmem>>, vector<1x8x1xf32>
      %33 = vector.shape_cast %32 : vector<1x8x1xf32> to vector<8x1xf32>
      %cst_16 = arith.constant dense<0xFF800000> : vector<8xf32>
      %34 = vector.multi_reduction <maximumf>, %31, %cst_16 [1] : vector<8x8xf32> to vector<8xf32>
      %35 = vector.shape_cast %34 : vector<8xf32> to vector<8x1xf32>
      %36 = arith.maximumf %33, %35 : vector<8x1xf32>
      %37 = arith.subf %33, %36 : vector<8x1xf32>
      %38 = math.exp %37 : vector<8x1xf32>
      %39 = vector.broadcast %36 : vector<8x1xf32> to vector<8x8xf32>
      %40 = arith.subf %31, %39 : vector<8x8xf32>
      %41 = math.exp %40 : vector<8x8xf32>
      %c0_17 = arith.constant 0 : index
      %c0_18 = arith.constant 0 : index
      %c0_19 = arith.constant 0 : index
      %42 = vector.load %arg7[%c0_17, %c0_18, %c0_19] : memref<4x8x1xf32, #tpu.memory_space<vmem>>, vector<1x8x1xf32>
      %43 = vector.shape_cast %42 : vector<1x8x1xf32> to vector<8x1xf32>
      %44 = arith.mulf %38, %43 : vector<8x1xf32>
      %cst_20 = arith.constant dense<0.000000e+00> : vector<8xf32>
      %45 = vector.multi_reduction <add>, %41, %cst_20 [1] : vector<8x8xf32> to vector<8xf32>
      %46 = vector.shape_cast %45 : vector<8xf32> to vector<8x1xf32>
      %47 = arith.addf %44, %46 : vector<8x1xf32>
      %c0_21 = arith.constant 0 : index
      %c0_22 = arith.constant 0 : index
      %c0_23 = arith.constant 0 : index
      %48 = vector.load %arg7[%c0_21, %c0_22, %c0_23] : memref<4x8x1xf32, #tpu.memory_space<vmem>>, vector<1x8x1xf32>
      %49 = vector.shape_cast %48 : vector<1x8x1xf32> to vector<8x1xf32>
      %50 = vector.shape_cast %47 : vector<8x1xf32> to vector<1x8x1xf32>
      tpu.vector_store %arg7[%c0_21, %c0_22, %c0_23], %50 {strides = array<i32>} : memref<4x8x1xf32, #tpu.memory_space<vmem>>, vector<1x8x1xf32>,
      %51 = arith.truncf %41 : vector<8x8xf32> to vector<8x8xbf16>
      %cst_24 = arith.constant dense<0.000000e+00> : vector<8x8xf32>
      %52 = tpu.matmul %51, %25, %cst_24 {dimension_numbers = #tpu.dot_dimension_numbers<[1], [0], [0], [1], [0, 0, 1, 1], [], []>} : vector<8x8xbf16>, vector<8x8xbf16>, vector<8x8xf32> -> vector<8x8xf32>
      %c0_25 = arith.constant 0 : index
      %c0_26 = arith.constant 0 : index
      %53 = vector.load %arg8[%c0_25, %c0_26] : memref<8x32xf32, #tpu.memory_space<vmem>>, vector<8x8xf32>
      %54 = vector.broadcast %38 : vector<8x1xf32> to vector<8x8xf32>
      %55 = arith.mulf %54, %53 : vector<8x8xf32>
      %56 = arith.addf %55, %52 : vector<8x8xf32>
      %c0_27 = arith.constant 0 : index
      %c0_28 = arith.constant 0 : index
      %57 = vector.load %arg8[%c0_27, %c0_28] : memref<8x32xf32, #tpu.memory_space<vmem>>, vector<8x8xf32>
      tpu.vector_store %arg8[%c0_27, %c0_28], %56 {strides = array<i32>} : memref<8x32xf32, #tpu.memory_space<vmem>>, vector<8x8xf32>,
      %c0_29 = arith.constant 0 : index
      %c0_30 = arith.constant 0 : index
      %c0_31 = arith.constant 0 : index
      %58 = vector.load %arg6[%c0_29, %c0_30, %c0_31] : memref<4x8x1xf32, #tpu.memory_space<vmem>>, vector<1x8x1xf32>
      %59 = vector.shape_cast %58 : vector<1x8x1xf32> to vector<8x1xf32>
      %60 = vector.shape_cast %36 : vector<8x1xf32> to vector<1x8x1xf32>
      tpu.vector_store %arg6[%c0_29, %c0_30, %c0_31], %60 {strides = array<i32>} : memref<4x8x1xf32, #tpu.memory_space<vmem>>, vector<1x8x1xf32>,
      %61 = vector.extract_strided_slice %13 {offsets = [0, 40], sizes = [8, 8], strides = [1, 1]} : vector<8x64xbf16> to vector<8x8xbf16>
      %cst_32 = arith.constant dense<0.000000e+00> : vector<8x8xf32>
      %62 = tpu.matmul %61, %24, %cst_32 {dimension_numbers = #tpu.dot_dimension_numbers<[1], [1], [0], [0], [0, 0, 1, 0], [], []>} : vector<8x8xbf16>, vector<8x8xbf16>, vector<8x8xf32> -> vector<8x8xf32>
      %cst_33 = arith.constant 0.353553385 : f32
      %63 = vector.broadcast %cst_33 : f32 to vector<8x8xf32>
      %64 = arith.mulf %62, %63 : vector<8x8xf32>
      %cst_34 = arith.constant -1.000000e+30 : f32
      %65 = vector.broadcast %cst_34 : f32 to vector<8x8xf32>
      %66 = arith.select %23, %64, %65 : vector<8x8xi1>, vector<8x8xf32>
      %c1 = arith.constant 1 : index
      %c0_35 = arith.constant 0 : index
      %c0_36 = arith.constant 0 : index
      %67 = vector.load %arg6[%c1, %c0_35, %c0_36] : memref<4x8x1xf32, #tpu.memory_space<vmem>>, vector<1x8x1xf32>
      %68 = vector.shape_cast %67 : vector<1x8x1xf32> to vector<8x1xf32>
      %cst_37 = arith.constant dense<0xFF800000> : vector<8xf32>
      %69 = vector.multi_reduction <maximumf>, %66, %cst_37 [1] : vector<8x8xf32> to vector<8xf32>
      %70 = vector.shape_cast %69 : vector<8xf32> to vector<8x1xf32>
      %71 = arith.maximumf %68, %70 : vector<8x1xf32>
      %72 = arith.subf %68, %71 : vector<8x1xf32>
      %73 = math.exp %72 : vector<8x1xf32>
      %74 = vector.broadcast %71 : vector<8x1xf32> to vector<8x8xf32>
      %75 = arith.subf %66, %74 : vector<8x8xf32>
      %76 = math.exp %75 : vector<8x8xf32>
      %c1_38 = arith.constant 1 : index
      %c0_39 = arith.constant 0 : index
      %c0_40 = arith.constant 0 : index
      %77 = vector.load %arg7[%c1_38, %c0_39, %c0_40] : memref<4x8x1xf32, #tpu.memory_space<vmem>>, vector<1x8x1xf32>
      %78 = vector.shape_cast %77 : vector<1x8x1xf32> to vector<8x1xf32>
      %79 = arith.mulf %73, %78 : vector<8x1xf32>
      %cst_41 = arith.constant dense<0.000000e+00> : vector<8xf32>
      %80 = vector.multi_reduction <add>, %76, %cst_41 [1] : vector<8x8xf32> to vector<8xf32>
      %81 = vector.shape_cast %80 : vector<8xf32> to vector<8x1xf32>
      %82 = arith.addf %79, %81 : vector<8x1xf32>
      %c1_42 = arith.constant 1 : index
      %c0_43 = arith.constant 0 : index
      %c0_44 = arith.constant 0 : index
      %83 = vector.load %arg7[%c1_42, %c0_43, %c0_44] : memref<4x8x1xf32, #tpu.memory_space<vmem>>, vector<1x8x1xf32>
      %84 = vector.shape_cast %83 : vector<1x8x1xf32> to vector<8x1xf32>
      %85 = vector.shape_cast %82 : vector<8x1xf32> to vector<1x8x1xf32>
      tpu.vector_store %arg7[%c1_42, %c0_43, %c0_44], %85 {strides = array<i32>} : memref<4x8x1xf32, #tpu.memory_space<vmem>>, vector<1x8x1xf32>,
      %86 = arith.truncf %76 : vector<8x8xf32> to vector<8x8xbf16>
      %cst_45 = arith.constant dense<0.000000e+00> : vector<8x8xf32>
      %87 = tpu.matmul %86, %25, %cst_45 {dimension_numbers = #tpu.dot_dimension_numbers<[1], [0], [0], [1], [0, 0, 1, 1], [], []>} : vector<8x8xbf16>, vector<8x8xbf16>, vector<8x8xf32> -> vector<8x8xf32>
      %c0_46 = arith.constant 0 : index
      %c8 = arith.constant 8 : index
      %88 = vector.load %arg8[%c0_46, %c8] : memref<8x32xf32, #tpu.memory_space<vmem>>, vector<8x8xf32>
      %89 = vector.broadcast %73 : vector<8x1xf32> to vector<8x8xf32>
      %90 = arith.mulf %89, %88 : vector<8x8xf32>
      %91 = arith.addf %90, %87 : vector<8x8xf32>
      %c0_47 = arith.constant 0 : index
      %c8_48 = arith.constant 8 : index
      %92 = vector.load %arg8[%c0_47, %c8_48] : memref<8x32xf32, #tpu.memory_space<vmem>>, vector<8x8xf32>
      tpu.vector_store %arg8[%c0_47, %c8_48], %91 {strides = array<i32>} : memref<8x32xf32, #tpu.memory_space<vmem>>, vector<8x8xf32>,
      %c1_49 = arith.constant 1 : index
      %c0_50 = arith.constant 0 : index
      %c0_51 = arith.constant 0 : index
      %93 = vector.load %arg6[%c1_49, %c0_50, %c0_51] : memref<4x8x1xf32, #tpu.memory_space<vmem>>, vector<1x8x1xf32>
      %94 = vector.shape_cast %93 : vector<1x8x1xf32> to vector<8x1xf32>
      %95 = vector.shape_cast %71 : vector<8x1xf32> to vector<1x8x1xf32>
      tpu.vector_store %arg6[%c1_49, %c0_50, %c0_51], %95 {strides = array<i32>} : memref<4x8x1xf32, #tpu.memory_space<vmem>>, vector<1x8x1xf32>,
      %96 = vector.extract_strided_slice %14 {offsets = [0, 8], sizes = [8, 8], strides = [1, 1]} : vector<8x64xbf16> to vector<8x8xbf16>
      %97 = vector.extract_strided_slice %14 {offsets = [0, 24], sizes = [8, 8], strides = [1, 1]} : vector<8x64xbf16> to vector<8x8xbf16>
      %98 = vector.extract_strided_slice %13 {offsets = [0, 48], sizes = [8, 8], strides = [1, 1]} : vector<8x64xbf16> to vector<8x8xbf16>
      %cst_52 = arith.constant dense<0.000000e+00> : vector<8x8xf32>
      %99 = tpu.matmul %98, %96, %cst_52 {dimension_numbers = #tpu.dot_dimension_numbers<[1], [1], [0], [0], [0, 0, 1, 0], [], []>} : vector<8x8xbf16>, vector<8x8xbf16>, vector<8x8xf32> -> vector<8x8xf32>
      %cst_53 = arith.constant 0.353553385 : f32
      %100 = vector.broadcast %cst_53 : f32 to vector<8x8xf32>
      %101 = arith.mulf %99, %100 : vector<8x8xf32>
      %cst_54 = arith.constant -1.000000e+30 : f32
      %102 = vector.broadcast %cst_54 : f32 to vector<8x8xf32>
      %103 = arith.select %23, %101, %102 : vector<8x8xi1>, vector<8x8xf32>
      %c2 = arith.constant 2 : index
      %c0_55 = arith.constant 0 : index
      %c0_56 = arith.constant 0 : index
      %104 = vector.load %arg6[%c2, %c0_55, %c0_56] : memref<4x8x1xf32, #tpu.memory_space<vmem>>, vector<1x8x1xf32>
      %105 = vector.shape_cast %104 : vector<1x8x1xf32> to vector<8x1xf32>
      %cst_57 = arith.constant dense<0xFF800000> : vector<8xf32>
      %106 = vector.multi_reduction <maximumf>, %103, %cst_57 [1] : vector<8x8xf32> to vector<8xf32>
      %107 = vector.shape_cast %106 : vector<8xf32> to vector<8x1xf32>
      %108 = arith.maximumf %105, %107 : vector<8x1xf32>
      %109 = arith.subf %105, %108 : vector<8x1xf32>
      %110 = math.exp %109 : vector<8x1xf32>
      %111 = vector.broadcast %108 : vector<8x1xf32> to vector<8x8xf32>
      %112 = arith.subf %103, %111 : vector<8x8xf32>
      %113 = math.exp %112 : vector<8x8xf32>
      %c2_58 = arith.constant 2 : index
      %c0_59 = arith.constant 0 : index
      %c0_60 = arith.constant 0 : index
      %114 = vector.load %arg7[%c2_58, %c0_59, %c0_60] : memref<4x8x1xf32, #tpu.memory_space<vmem>>, vector<1x8x1xf32>
      %115 = vector.shape_cast %114 : vector<1x8x1xf32> to vector<8x1xf32>
      %116 = arith.mulf %110, %115 : vector<8x1xf32>
      %cst_61 = arith.constant dense<0.000000e+00> : vector<8xf32>
      %117 = vector.multi_reduction <add>, %113, %cst_61 [1] : vector<8x8xf32> to vector<8xf32>
      %118 = vector.shape_cast %117 : vector<8xf32> to vector<8x1xf32>
      %119 = arith.addf %116, %118 : vector<8x1xf32>
      %c2_62 = arith.constant 2 : index
      %c0_63 = arith.constant 0 : index
      %c0_64 = arith.constant 0 : index
      %120 = vector.load %arg7[%c2_62, %c0_63, %c0_64] : memref<4x8x1xf32, #tpu.memory_space<vmem>>, vector<1x8x1xf32>
      %121 = vector.shape_cast %120 : vector<1x8x1xf32> to vector<8x1xf32>
      %122 = vector.shape_cast %119 : vector<8x1xf32> to vector<1x8x1xf32>
      tpu.vector_store %arg7[%c2_62, %c0_63, %c0_64], %122 {strides = array<i32>} : memref<4x8x1xf32, #tpu.memory_space<vmem>>, vector<1x8x1xf32>,
      %123 = arith.truncf %113 : vector<8x8xf32> to vector<8x8xbf16>
      %cst_65 = arith.constant dense<0.000000e+00> : vector<8x8xf32>
      %124 = tpu.matmul %123, %97, %cst_65 {dimension_numbers = #tpu.dot_dimension_numbers<[1], [0], [0], [1], [0, 0, 1, 1], [], []>} : vector<8x8xbf16>, vector<8x8xbf16>, vector<8x8xf32> -> vector<8x8xf32>
      %c0_66 = arith.constant 0 : index
      %c16 = arith.constant 16 : index
      %125 = vector.load %arg8[%c0_66, %c16] : memref<8x32xf32, #tpu.memory_space<vmem>>, vector<8x8xf32>
      %126 = vector.broadcast %110 : vector<8x1xf32> to vector<8x8xf32>
      %127 = arith.mulf %126, %125 : vector<8x8xf32>
      %128 = arith.addf %127, %124 : vector<8x8xf32>
      %c0_67 = arith.constant 0 : index
      %c16_68 = arith.constant 16 : index
      %129 = vector.load %arg8[%c0_67, %c16_68] : memref<8x32xf32, #tpu.memory_space<vmem>>, vector<8x8xf32>
      tpu.vector_store %arg8[%c0_67, %c16_68], %128 {strides = array<i32>} : memref<8x32xf32, #tpu.memory_space<vmem>>, vector<8x8xf32>,
      %c2_69 = arith.constant 2 : index
      %c0_70 = arith.constant 0 : index
      %c0_71 = arith.constant 0 : index
      %130 = vector.load %arg6[%c2_69, %c0_70, %c0_71] : memref<4x8x1xf32, #tpu.memory_space<vmem>>, vector<1x8x1xf32>
      %131 = vector.shape_cast %130 : vector<1x8x1xf32> to vector<8x1xf32>
      %132 = vector.shape_cast %108 : vector<8x1xf32> to vector<1x8x1xf32>
      tpu.vector_store %arg6[%c2_69, %c0_70, %c0_71], %132 {strides = array<i32>} : memref<4x8x1xf32, #tpu.memory_space<vmem>>, vector<1x8x1xf32>,
      %133 = vector.extract_strided_slice %13 {offsets = [0, 56], sizes = [8, 8], strides = [1, 1]} : vector<8x64xbf16> to vector<8x8xbf16>
      %cst_72 = arith.constant dense<0.000000e+00> : vector<8x8xf32>
      %134 = tpu.matmul %133, %96, %cst_72 {dimension_numbers = #tpu.dot_dimension_numbers<[1], [1], [0], [0], [0, 0, 1, 0], [], []>} : vector<8x8xbf16>, vector<8x8xbf16>, vector<8x8xf32> -> vector<8x8xf32>
      %cst_73 = arith.constant 0.353553385 : f32
      %135 = vector.broadcast %cst_73 : f32 to vector<8x8xf32>
      %136 = arith.mulf %134, %135 : vector<8x8xf32>
      %cst_74 = arith.constant -1.000000e+30 : f32
      %137 = vector.broadcast %cst_74 : f32 to vector<8x8xf32>
      %138 = arith.select %23, %136, %137 : vector<8x8xi1>, vector<8x8xf32>
      %c3 = arith.constant 3 : index
      %c0_75 = arith.constant 0 : index
      %c0_76 = arith.constant 0 : index
      %139 = vector.load %arg6[%c3, %c0_75, %c0_76] : memref<4x8x1xf32, #tpu.memory_space<vmem>>, vector<1x8x1xf32>
      %140 = vector.shape_cast %139 : vector<1x8x1xf32> to vector<8x1xf32>
      %cst_77 = arith.constant dense<0xFF800000> : vector<8xf32>
      %141 = vector.multi_reduction <maximumf>, %138, %cst_77 [1] : vector<8x8xf32> to vector<8xf32>
      %142 = vector.shape_cast %141 : vector<8xf32> to vector<8x1xf32>
      %143 = arith.maximumf %140, %142 : vector<8x1xf32>
      %144 = arith.subf %140, %143 : vector<8x1xf32>
      %145 = math.exp %144 : vector<8x1xf32>
      %146 = vector.broadcast %143 : vector<8x1xf32> to vector<8x8xf32>
      %147 = arith.subf %138, %146 : vector<8x8xf32>
      %148 = math.exp %147 : vector<8x8xf32>
      %c3_78 = arith.constant 3 : index
      %c0_79 = arith.constant 0 : index
      %c0_80 = arith.constant 0 : index
      %149 = vector.load %arg7[%c3_78, %c0_79, %c0_80] : memref<4x8x1xf32, #tpu.memory_space<vmem>>, vector<1x8x1xf32>
      %150 = vector.shape_cast %149 : vector<1x8x1xf32> to vector<8x1xf32>
      %151 = arith.mulf %145, %150 : vector<8x1xf32>
      %cst_81 = arith.constant dense<0.000000e+00> : vector<8xf32>
      %152 = vector.multi_reduction <add>, %148, %cst_81 [1] : vector<8x8xf32> to vector<8xf32>
      %153 = vector.shape_cast %152 : vector<8xf32> to vector<8x1xf32>
      %154 = arith.addf %151, %153 : vector<8x1xf32>
      %c3_82 = arith.constant 3 : index
      %c0_83 = arith.constant 0 : index
      %c0_84 = arith.constant 0 : index
      %155 = vector.load %arg7[%c3_82, %c0_83, %c0_84] : memref<4x8x1xf32, #tpu.memory_space<vmem>>, vector<1x8x1xf32>
      %156 = vector.shape_cast %155 : vector<1x8x1xf32> to vector<8x1xf32>
      %157 = vector.shape_cast %154 : vector<8x1xf32> to vector<1x8x1xf32>
      tpu.vector_store %arg7[%c3_82, %c0_83, %c0_84], %157 {strides = array<i32>} : memref<4x8x1xf32, #tpu.memory_space<vmem>>, vector<1x8x1xf32>,
      %158 = arith.truncf %148 : vector<8x8xf32> to vector<8x8xbf16>
      %cst_85 = arith.constant dense<0.000000e+00> : vector<8x8xf32>
      %159 = tpu.matmul %158, %97, %cst_85 {dimension_numbers = #tpu.dot_dimension_numbers<[1], [0], [0], [1], [0, 0, 1, 1], [], []>} : vector<8x8xbf16>, vector<8x8xbf16>, vector<8x8xf32> -> vector<8x8xf32>
      %c0_86 = arith.constant 0 : index
      %c24 = arith.constant 24 : index
      %160 = vector.load %arg8[%c0_86, %c24] : memref<8x32xf32, #tpu.memory_space<vmem>>, vector<8x8xf32>
      %161 = vector.broadcast %145 : vector<8x1xf32> to vector<8x8xf32>
      %162 = arith.mulf %161, %160 : vector<8x8xf32>
      %163 = arith.addf %162, %159 : vector<8x8xf32>
      %c0_87 = arith.constant 0 : index
      %c24_88 = arith.constant 24 : index
      %164 = vector.load %arg8[%c0_87, %c24_88] : memref<8x32xf32, #tpu.memory_space<vmem>>, vector<8x8xf32>
      tpu.vector_store %arg8[%c0_87, %c24_88], %163 {strides = array<i32>} : memref<8x32xf32, #tpu.memory_space<vmem>>, vector<8x8xf32>,
      %c3_89 = arith.constant 3 : index
      %c0_90 = arith.constant 0 : index
      %c0_91 = arith.constant 0 : index
      %165 = vector.load %arg6[%c3_89, %c0_90, %c0_91] : memref<4x8x1xf32, #tpu.memory_space<vmem>>, vector<1x8x1xf32>
      %166 = vector.shape_cast %165 : vector<1x8x1xf32> to vector<8x1xf32>
      %167 = vector.shape_cast %143 : vector<8x1xf32> to vector<1x8x1xf32>
      tpu.vector_store %arg6[%c3_89, %c0_90, %c0_91], %167 {strides = array<i32>} : memref<4x8x1xf32, #tpu.memory_space<vmem>>, vector<1x8x1xf32>,
    } else {
    }
    %c0_i32_4 = arith.constant 0 : i32
    %10 = arith.cmpi eq, %arg2, %c0_i32_4 : i32
    %11 = arith.extui %10 : i1 to i32
    %c0_i32_5 = arith.constant 0 : i32
    %12 = arith.cmpi ne, %11, %c0_i32_5 : i32
    scf.if %12 {
      %c0 = arith.constant 0 : index
      %c0_6 = arith.constant 0 : index
      %13 = vector.load %arg8[%c0, %c0_6] : memref<8x32xf32, #tpu.memory_space<vmem>>, vector<8x8xf32>
      %c0_7 = arith.constant 0 : index
      %c0_8 = arith.constant 0 : index
      %c0_9 = arith.constant 0 : index
      %14 = vector.load %arg7[%c0_7, %c0_8, %c0_9] : memref<4x8x1xf32, #tpu.memory_space<vmem>>, vector<1x8x1xf32>
      %15 = vector.shape_cast %14 : vector<1x8x1xf32> to vector<8x1xf32>
      %cst = arith.constant 1.000000e+00 : f32
      %16 = vector.broadcast %cst : f32 to vector<8x1xf32>
      %17 = arith.divf %16, %15 : vector<8x1xf32>
      %18 = vector.broadcast %17 : vector<8x1xf32> to vector<8x8xf32>
      %19 = arith.mulf %13, %18 : vector<8x8xf32>
      %c0_10 = arith.constant 0 : index
      %c0_11 = arith.constant 0 : index
      %20 = vector.load %arg8[%c0_10, %c0_11] : memref<8x32xf32, #tpu.memory_space<vmem>>, vector<8x8xf32>
      tpu.vector_store %arg8[%c0_10, %c0_11], %19 {strides = array<i32>} : memref<8x32xf32, #tpu.memory_space<vmem>>, vector<8x8xf32>,
      %c0_12 = arith.constant 0 : index
      %c8 = arith.constant 8 : index
      %21 = vector.load %arg8[%c0_12, %c8] : memref<8x32xf32, #tpu.memory_space<vmem>>, vector<8x8xf32>
      %c1 = arith.constant 1 : index
      %c0_13 = arith.constant 0 : index
      %c0_14 = arith.constant 0 : index
      %22 = vector.load %arg7[%c1, %c0_13, %c0_14] : memref<4x8x1xf32, #tpu.memory_space<vmem>>, vector<1x8x1xf32>
      %23 = vector.shape_cast %22 : vector<1x8x1xf32> to vector<8x1xf32>
      %cst_15 = arith.constant 1.000000e+00 : f32
      %24 = vector.broadcast %cst_15 : f32 to vector<8x1xf32>
      %25 = arith.divf %24, %23 : vector<8x1xf32>
      %26 = vector.broadcast %25 : vector<8x1xf32> to vector<8x8xf32>
      %27 = arith.mulf %21, %26 : vector<8x8xf32>
      %c0_16 = arith.constant 0 : index
      %c8_17 = arith.constant 8 : index
      %28 = vector.load %arg8[%c0_16, %c8_17] : memref<8x32xf32, #tpu.memory_space<vmem>>, vector<8x8xf32>
      tpu.vector_store %arg8[%c0_16, %c8_17], %27 {strides = array<i32>} : memref<8x32xf32, #tpu.memory_space<vmem>>, vector<8x8xf32>,
      %c0_18 = arith.constant 0 : index
      %c16 = arith.constant 16 : index
      %29 = vector.load %arg8[%c0_18, %c16] : memref<8x32xf32, #tpu.memory_space<vmem>>, vector<8x8xf32>
      %c2 = arith.constant 2 : index
      %c0_19 = arith.constant 0 : index
      %c0_20 = arith.constant 0 : index
      %30 = vector.load %arg7[%c2, %c0_19, %c0_20] : memref<4x8x1xf32, #tpu.memory_space<vmem>>, vector<1x8x1xf32>
      %31 = vector.shape_cast %30 : vector<1x8x1xf32> to vector<8x1xf32>
      %cst_21 = arith.constant 1.000000e+00 : f32
      %32 = vector.broadcast %cst_21 : f32 to vector<8x1xf32>
      %33 = arith.divf %32, %31 : vector<8x1xf32>
      %34 = vector.broadcast %33 : vector<8x1xf32> to vector<8x8xf32>
      %35 = arith.mulf %29, %34 : vector<8x8xf32>
      %c0_22 = arith.constant 0 : index
      %c16_23 = arith.constant 16 : index
      %36 = vector.load %arg8[%c0_22, %c16_23] : memref<8x32xf32, #tpu.memory_space<vmem>>, vector<8x8xf32>
      tpu.vector_store %arg8[%c0_22, %c16_23], %35 {strides = array<i32>} : memref<8x32xf32, #tpu.memory_space<vmem>>, vector<8x8xf32>,
      %c0_24 = arith.constant 0 : index
      %c24 = arith.constant 24 : index
      %37 = vector.load %arg8[%c0_24, %c24] : memref<8x32xf32, #tpu.memory_space<vmem>>, vector<8x8xf32>
      %c3 = arith.constant 3 : index
      %c0_25 = arith.constant 0 : index
      %c0_26 = arith.constant 0 : index
      %38 = vector.load %arg7[%c3, %c0_25, %c0_26] : memref<4x8x1xf32, #tpu.memory_space<vmem>>, vector<1x8x1xf32>
      %39 = vector.shape_cast %38 : vector<1x8x1xf32> to vector<8x1xf32>
      %cst_27 = arith.constant 1.000000e+00 : f32
      %40 = vector.broadcast %cst_27 : f32 to vector<8x1xf32>
      %41 = arith.divf %40, %39 : vector<8x1xf32>
      %42 = vector.broadcast %41 : vector<8x1xf32> to vector<8x8xf32>
      %43 = arith.mulf %37, %42 : vector<8x8xf32>
      %c0_28 = arith.constant 0 : index
      %c24_29 = arith.constant 24 : index
      %44 = vector.load %arg8[%c0_28, %c24_29] : memref<8x32xf32, #tpu.memory_space<vmem>>, vector<8x8xf32>
      tpu.vector_store %arg8[%c0_28, %c24_29], %43 {strides = array<i32>} : memref<8x32xf32, #tpu.memory_space<vmem>>, vector<8x8xf32>,
      %c0_30 = arith.constant 0 : index
      %c0_31 = arith.constant 0 : index
      %45 = vector.load %arg8[%c0_30, %c0_31] : memref<8x32xf32, #tpu.memory_space<vmem>>, vector<8x32xf32>
      %46 = arith.truncf %45 : vector<8x32xf32> to vector<8x32xbf16>
      %c0_32 = arith.constant 0 : index
      %c0_33 = arith.constant 0 : index
      %47 = vector.load %arg5[%c0_32, %c0_33] : memref<8x32xbf16, #tpu.memory_space<vmem>>, vector<8x32xbf16>
      tpu.vector_store %arg5[%c0_32, %c0_33], %46 {strides = array<i32>} : memref<8x32xbf16, #tpu.memory_space<vmem>>, vector<8x32xbf16>,
    } else {
    }
    return
  }
  func.func @transform_0(%arg0: i32, %arg1: i32, %arg2: i32) -> (i32, i32) {
    %c1_i32 = arith.constant 1 : i32
    %0 = arith.muli %arg0, %c1_i32 : i32
    %1 = arith.addi %0, %arg1 : i32
    %c0_i32 = arith.constant 0 : i32
    %c0_i32_0 = arith.constant 0 : i32
    return %1, %c0_i32 : i32, i32
  }
  func.func @transform_1(%arg0: i32, %arg1: i32, %arg2: i32) -> (i32, i32) {
    %c1_i32 = arith.constant 1 : i32
    %0 = arith.muli %arg0, %c1_i32 : i32
    %1 = arith.addi %0, %arg2 : i32
    %c0_i32 = arith.constant 0 : i32
    %c0_i32_0 = arith.constant 0 : i32
    return %1, %c0_i32 : i32, i32
  }
  func.func @transform_2(%arg0: i32, %arg1: i32, %arg2: i32) -> (i32, i32) {
    %c1_i32 = arith.constant 1 : i32
    %0 = arith.muli %arg0, %c1_i32 : i32
    %1 = arith.addi %0, %arg1 : i32
    %c0_i32 = arith.constant 0 : i32
    %c0_i32_0 = arith.constant 0 : i32
    return %1, %c0_i32 : i32, i32
  }
}

module attributes {stable_mosaic.version = 11 : i64} {
  func.func @_fused_matmul_kernel(%arg0: i32, %arg1: i32, %arg2: memref<16x32xf32, #tpu.memory_space<vmem>>, %arg3: memref<1x32xf32, #tpu.memory_space<vmem>>, %arg4: memref<1x32xf32, #tpu.memory_space<vmem>>, %arg5: memref<32x32xbf16, #tpu.memory_space<vmem>>, %arg6: memref<1x32xf32, #tpu.memory_space<vmem>>, %arg7: memref<16x32xbf16, #tpu.memory_space<vmem>>) attributes {dimension_semantics = [#tpu.dimension_semantics<parallel>, #tpu.dimension_semantics<parallel>], iteration_bounds = array<i64: 1, 1>, scalar_prefetch = 0 : i64, scratch_operands = 0 : i64, tpu.core_type = #tpu.core_type<tc>, window_params = [{transform_indices = @transform_0, window_bounds = array<i64: 16, 32>}, {pipeline_mode = #tpu.pipeline_mode<synchronous>, transform_indices = @transform_1, window_bounds = array<i64: 1, 32>}, {pipeline_mode = #tpu.pipeline_mode<synchronous>, transform_indices = @transform_2, window_bounds = array<i64: 1, 32>}, {transform_indices = @transform_3, window_bounds = array<i64: 32, 32>}, {transform_indices = @transform_4, window_bounds = array<i64: 1, 32>}, {transform_indices = @transform_5, window_bounds = array<i64: 16, 32>}]} {
    %c0 = arith.constant 0 : index
    %c0_0 = arith.constant 0 : index
    %0 = vector.load %arg2[%c0, %c0_0] : memref<16x32xf32, #tpu.memory_space<vmem>>, vector<16x32xf32>
    %cst = arith.constant dense<0.000000e+00> : vector<16xf32>
    %1 = vector.multi_reduction <add>, %0, %cst [1] : vector<16x32xf32> to vector<16xf32>
    %2 = vector.shape_cast %1 : vector<16xf32> to vector<16x1xf32>
    %cst_1 = arith.constant 3.200000e+01 : f32
    %3 = vector.broadcast %cst_1 : f32 to vector<16x1xf32>
    %4 = arith.divf %2, %3 : vector<16x1xf32>
    %5 = vector.broadcast %4 : vector<16x1xf32> to vector<16x32xf32>
    %6 = arith.subf %0, %5 : vector<16x32xf32>
    %7 = arith.mulf %6, %6 : vector<16x32xf32>
    %cst_2 = arith.constant dense<0.000000e+00> : vector<16xf32>
    %8 = vector.multi_reduction <add>, %7, %cst_2 [1] : vector<16x32xf32> to vector<16xf32>
    %9 = vector.shape_cast %8 : vector<16xf32> to vector<16x1xf32>
    %cst_3 = arith.constant 3.200000e+01 : f32
    %10 = vector.broadcast %cst_3 : f32 to vector<16x1xf32>
    %11 = arith.divf %9, %10 : vector<16x1xf32>
    %12 = vector.broadcast %4 : vector<16x1xf32> to vector<16x32xf32>
    %13 = arith.subf %0, %12 : vector<16x32xf32>
    %cst_4 = arith.constant 9.99999974E-6 : f32
    %14 = vector.broadcast %cst_4 : f32 to vector<16x1xf32>
    %15 = arith.addf %11, %14 : vector<16x1xf32>
    %16 = math.rsqrt %15 : vector<16x1xf32>
    %17 = vector.broadcast %16 : vector<16x1xf32> to vector<16x32xf32>
    %18 = arith.mulf %13, %17 : vector<16x32xf32>
    %c0_5 = arith.constant 0 : index
    %c0_6 = arith.constant 0 : index
    %19 = vector.load %arg3[%c0_5, %c0_6] : memref<1x32xf32, #tpu.memory_space<vmem>>, vector<1x32xf32>
    %20 = vector.broadcast %19 : vector<1x32xf32> to vector<16x32xf32>
    %21 = arith.mulf %18, %20 : vector<16x32xf32>
    %c0_7 = arith.constant 0 : index
    %c0_8 = arith.constant 0 : index
    %22 = vector.load %arg4[%c0_7, %c0_8] : memref<1x32xf32, #tpu.memory_space<vmem>>, vector<1x32xf32>
    %23 = vector.broadcast %22 : vector<1x32xf32> to vector<16x32xf32>
    %24 = arith.addf %21, %23 : vector<16x32xf32>
    %25 = arith.truncf %24 : vector<16x32xf32> to vector<16x32xbf16>
    %c0_9 = arith.constant 0 : index
    %c0_10 = arith.constant 0 : index
    %26 = vector.load %arg5[%c0_9, %c0_10] : memref<32x32xbf16, #tpu.memory_space<vmem>>, vector<32x32xbf16>
    %cst_11 = arith.constant dense<0.000000e+00> : vector<16x32xf32>
    %27 = tpu.matmul %25, %26, %cst_11 {dimension_numbers = #tpu.dot_dimension_numbers<[1], [0], [0], [1], [0, 0, 1, 1], [], []>} : vector<16x32xbf16>, vector<32x32xbf16>, vector<16x32xf32> -> vector<16x32xf32>
    %c0_12 = arith.constant 0 : index
    %c0_13 = arith.constant 0 : index
    %28 = vector.load %arg6[%c0_12, %c0_13] : memref<1x32xf32, #tpu.memory_space<vmem>>, vector<1x32xf32>
    %29 = vector.broadcast %28 : vector<1x32xf32> to vector<16x32xf32>
    %30 = arith.addf %27, %29 : vector<16x32xf32>
    %31 = arith.truncf %30 : vector<16x32xf32> to vector<16x32xbf16>
    %c0_14 = arith.constant 0 : index
    %c0_15 = arith.constant 0 : index
    %32 = vector.load %arg7[%c0_14, %c0_15] : memref<16x32xbf16, #tpu.memory_space<vmem>>, vector<16x32xbf16>
    tpu.vector_store %arg7[%c0_14, %c0_15], %31 {strides = array<i32>} : memref<16x32xbf16, #tpu.memory_space<vmem>>, vector<16x32xbf16>,
    return
  }
  func.func @transform_0(%arg0: i32, %arg1: i32) -> (i32, i32) {
    %c0_i32 = arith.constant 0 : i32
    %c0_i32_0 = arith.constant 0 : i32
    return %arg0, %c0_i32 : i32, i32
  }
  func.func @transform_1(%arg0: i32, %arg1: i32) -> (i32, i32) {
    %c0_i32 = arith.constant 0 : i32
    %c0_i32_0 = arith.constant 0 : i32
    %c0_i32_1 = arith.constant 0 : i32
    return %c0_i32, %c0_i32_0 : i32, i32
  }
  func.func @transform_2(%arg0: i32, %arg1: i32) -> (i32, i32) {
    %c0_i32 = arith.constant 0 : i32
    %c0_i32_0 = arith.constant 0 : i32
    %c0_i32_1 = arith.constant 0 : i32
    return %c0_i32, %c0_i32_0 : i32, i32
  }
  func.func @transform_3(%arg0: i32, %arg1: i32) -> (i32, i32) {
    %c0_i32 = arith.constant 0 : i32
    %c0_i32_0 = arith.constant 0 : i32
    return %c0_i32, %arg1 : i32, i32
  }
  func.func @transform_4(%arg0: i32, %arg1: i32) -> (i32, i32) {
    %c0_i32 = arith.constant 0 : i32
    %c0_i32_0 = arith.constant 0 : i32
    return %c0_i32, %arg1 : i32, i32
  }
  func.func @transform_5(%arg0: i32, %arg1: i32) -> (i32, i32) {
    %c0_i32 = arith.constant 0 : i32
    return %arg0, %arg1 : i32, i32
  }
}

module attributes {stable_mosaic.version = 11 : i64} {
  func.func @_fused_matmul_kernel(%arg0: i32, %arg1: i32, %arg2: memref<16x32xf32, #tpu.memory_space<vmem>>, %arg3: memref<1x32xf32, #tpu.memory_space<vmem>>, %arg4: memref<1x32xf32, #tpu.memory_space<vmem>>, %arg5: memref<32x64xbf16, #tpu.memory_space<vmem>>, %arg6: memref<1x64xf32, #tpu.memory_space<vmem>>, %arg7: memref<16x64xbf16, #tpu.memory_space<vmem>>) attributes {dimension_semantics = [#tpu.dimension_semantics<parallel>, #tpu.dimension_semantics<parallel>], iteration_bounds = array<i64: 1, 1>, scalar_prefetch = 0 : i64, scratch_operands = 0 : i64, tpu.core_type = #tpu.core_type<tc>, window_params = [{transform_indices = @transform_0, window_bounds = array<i64: 16, 32>}, {pipeline_mode = #tpu.pipeline_mode<synchronous>, transform_indices = @transform_1, window_bounds = array<i64: 1, 32>}, {pipeline_mode = #tpu.pipeline_mode<synchronous>, transform_indices = @transform_2, window_bounds = array<i64: 1, 32>}, {transform_indices = @transform_3, window_bounds = array<i64: 32, 64>}, {transform_indices = @transform_4, window_bounds = array<i64: 1, 64>}, {transform_indices = @transform_5, window_bounds = array<i64: 16, 64>}]} {
    %c0 = arith.constant 0 : index
    %c0_0 = arith.constant 0 : index
    %0 = vector.load %arg2[%c0, %c0_0] : memref<16x32xf32, #tpu.memory_space<vmem>>, vector<16x32xf32>
    %cst = arith.constant dense<0.000000e+00> : vector<16xf32>
    %1 = vector.multi_reduction <add>, %0, %cst [1] : vector<16x32xf32> to vector<16xf32>
    %2 = vector.shape_cast %1 : vector<16xf32> to vector<16x1xf32>
    %cst_1 = arith.constant 3.200000e+01 : f32
    %3 = vector.broadcast %cst_1 : f32 to vector<16x1xf32>
    %4 = arith.divf %2, %3 : vector<16x1xf32>
    %5 = vector.broadcast %4 : vector<16x1xf32> to vector<16x32xf32>
    %6 = arith.subf %0, %5 : vector<16x32xf32>
    %7 = arith.mulf %6, %6 : vector<16x32xf32>
    %cst_2 = arith.constant dense<0.000000e+00> : vector<16xf32>
    %8 = vector.multi_reduction <add>, %7, %cst_2 [1] : vector<16x32xf32> to vector<16xf32>
    %9 = vector.shape_cast %8 : vector<16xf32> to vector<16x1xf32>
    %cst_3 = arith.constant 3.200000e+01 : f32
    %10 = vector.broadcast %cst_3 : f32 to vector<16x1xf32>
    %11 = arith.divf %9, %10 : vector<16x1xf32>
    %12 = vector.broadcast %4 : vector<16x1xf32> to vector<16x32xf32>
    %13 = arith.subf %0, %12 : vector<16x32xf32>
    %cst_4 = arith.constant 9.99999974E-6 : f32
    %14 = vector.broadcast %cst_4 : f32 to vector<16x1xf32>
    %15 = arith.addf %11, %14 : vector<16x1xf32>
    %16 = math.rsqrt %15 : vector<16x1xf32>
    %17 = vector.broadcast %16 : vector<16x1xf32> to vector<16x32xf32>
    %18 = arith.mulf %13, %17 : vector<16x32xf32>
    %c0_5 = arith.constant 0 : index
    %c0_6 = arith.constant 0 : index
    %19 = vector.load %arg3[%c0_5, %c0_6] : memref<1x32xf32, #tpu.memory_space<vmem>>, vector<1x32xf32>
    %20 = vector.broadcast %19 : vector<1x32xf32> to vector<16x32xf32>
    %21 = arith.mulf %18, %20 : vector<16x32xf32>
    %c0_7 = arith.constant 0 : index
    %c0_8 = arith.constant 0 : index
    %22 = vector.load %arg4[%c0_7, %c0_8] : memref<1x32xf32, #tpu.memory_space<vmem>>, vector<1x32xf32>
    %23 = vector.broadcast %22 : vector<1x32xf32> to vector<16x32xf32>
    %24 = arith.addf %21, %23 : vector<16x32xf32>
    %25 = arith.truncf %24 : vector<16x32xf32> to vector<16x32xbf16>
    %c0_9 = arith.constant 0 : index
    %c0_10 = arith.constant 0 : index
    %26 = vector.load %arg5[%c0_9, %c0_10] : memref<32x64xbf16, #tpu.memory_space<vmem>>, vector<32x64xbf16>
    %cst_11 = arith.constant dense<0.000000e+00> : vector<16x64xf32>
    %27 = tpu.matmul %25, %26, %cst_11 {dimension_numbers = #tpu.dot_dimension_numbers<[1], [0], [0], [1], [0, 0, 1, 1], [], []>} : vector<16x32xbf16>, vector<32x64xbf16>, vector<16x64xf32> -> vector<16x64xf32>
    %c0_12 = arith.constant 0 : index
    %c0_13 = arith.constant 0 : index
    %28 = vector.load %arg6[%c0_12, %c0_13] : memref<1x64xf32, #tpu.memory_space<vmem>>, vector<1x64xf32>
    %29 = vector.broadcast %28 : vector<1x64xf32> to vector<16x64xf32>
    %30 = arith.addf %27, %29 : vector<16x64xf32>
    %31 = arith.truncf %30 : vector<16x64xf32> to vector<16x64xbf16>
    %c0_14 = arith.constant 0 : index
    %c0_15 = arith.constant 0 : index
    %32 = vector.load %arg7[%c0_14, %c0_15] : memref<16x64xbf16, #tpu.memory_space<vmem>>, vector<16x64xbf16>
    tpu.vector_store %arg7[%c0_14, %c0_15], %31 {strides = array<i32>} : memref<16x64xbf16, #tpu.memory_space<vmem>>, vector<16x64xbf16>,
    return
  }
  func.func @transform_0(%arg0: i32, %arg1: i32) -> (i32, i32) {
    %c0_i32 = arith.constant 0 : i32
    %c0_i32_0 = arith.constant 0 : i32
    return %arg0, %c0_i32 : i32, i32
  }
  func.func @transform_1(%arg0: i32, %arg1: i32) -> (i32, i32) {
    %c0_i32 = arith.constant 0 : i32
    %c0_i32_0 = arith.constant 0 : i32
    %c0_i32_1 = arith.constant 0 : i32
    return %c0_i32, %c0_i32_0 : i32, i32
  }
  func.func @transform_2(%arg0: i32, %arg1: i32) -> (i32, i32) {
    %c0_i32 = arith.constant 0 : i32
    %c0_i32_0 = arith.constant 0 : i32
    %c0_i32_1 = arith.constant 0 : i32
    return %c0_i32, %c0_i32_0 : i32, i32
  }
  func.func @transform_3(%arg0: i32, %arg1: i32) -> (i32, i32) {
    %c0_i32 = arith.constant 0 : i32
    %c0_i32_0 = arith.constant 0 : i32
    return %c0_i32, %arg1 : i32, i32
  }
  func.func @transform_4(%arg0: i32, %arg1: i32) -> (i32, i32) {
    %c0_i32 = arith.constant 0 : i32
    %c0_i32_0 = arith.constant 0 : i32
    return %c0_i32, %arg1 : i32, i32
  }
  func.func @transform_5(%arg0: i32, %arg1: i32) -> (i32, i32) {
    %c0_i32 = arith.constant 0 : i32
    return %arg0, %arg1 : i32, i32
  }
}

module attributes {stable_mosaic.version = 11 : i64} {
  func.func @_fused_matmul_kernel(%arg0: i32, %arg1: i32, %arg2: memref<16x32xbf16, #tpu.memory_space<vmem>>, %arg3: memref<1x32xf32, #tpu.memory_space<vmem>>, %arg4: memref<1x32xf32, #tpu.memory_space<vmem>>, %arg5: memref<32x32xbf16, #tpu.memory_space<vmem>>, %arg6: memref<1x32xf32, #tpu.memory_space<vmem>>, %arg7: memref<16x32xf32, #tpu.memory_space<vmem>>, %arg8: memref<16x32xf32, #tpu.memory_space<vmem>>) attributes {dimension_semantics = [#tpu.dimension_semantics<parallel>, #tpu.dimension_semantics<parallel>], iteration_bounds = array<i64: 1, 1>, scalar_prefetch = 0 : i64, scratch_operands = 0 : i64, tpu.core_type = #tpu.core_type<tc>, window_params = [{transform_indices = @transform_0, window_bounds = array<i64: 16, 32>}, {pipeline_mode = #tpu.pipeline_mode<synchronous>, transform_indices = @transform_1, window_bounds = array<i64: 1, 32>}, {pipeline_mode = #tpu.pipeline_mode<synchronous>, transform_indices = @transform_2, window_bounds = array<i64: 1, 32>}, {transform_indices = @transform_3, window_bounds = array<i64: 32, 32>}, {transform_indices = @transform_4, window_bounds = array<i64: 1, 32>}, {transform_indices = @transform_5, window_bounds = array<i64: 16, 32>}, {transform_indices = @transform_6, window_bounds = array<i64: 16, 32>}]} {
    %c0 = arith.constant 0 : index
    %c0_0 = arith.constant 0 : index
    %0 = vector.load %arg2[%c0, %c0_0] : memref<16x32xbf16, #tpu.memory_space<vmem>>, vector<16x32xbf16>
    %1 = arith.extf %0 : vector<16x32xbf16> to vector<16x32xf32>
    %cst = arith.constant dense<0.000000e+00> : vector<16xf32>
    %2 = vector.multi_reduction <add>, %1, %cst [1] : vector<16x32xf32> to vector<16xf32>
    %3 = vector.shape_cast %2 : vector<16xf32> to vector<16x1xf32>
    %cst_1 = arith.constant 3.200000e+01 : f32
    %4 = vector.broadcast %cst_1 : f32 to vector<16x1xf32>
    %5 = arith.divf %3, %4 : vector<16x1xf32>
    %6 = vector.broadcast %5 : vector<16x1xf32> to vector<16x32xf32>
    %7 = arith.subf %1, %6 : vector<16x32xf32>
    %8 = arith.mulf %7, %7 : vector<16x32xf32>
    %cst_2 = arith.constant dense<0.000000e+00> : vector<16xf32>
    %9 = vector.multi_reduction <add>, %8, %cst_2 [1] : vector<16x32xf32> to vector<16xf32>
    %10 = vector.shape_cast %9 : vector<16xf32> to vector<16x1xf32>
    %cst_3 = arith.constant 3.200000e+01 : f32
    %11 = vector.broadcast %cst_3 : f32 to vector<16x1xf32>
    %12 = arith.divf %10, %11 : vector<16x1xf32>
    %13 = vector.broadcast %5 : vector<16x1xf32> to vector<16x32xf32>
    %14 = arith.subf %1, %13 : vector<16x32xf32>
    %cst_4 = arith.constant 9.99999974E-6 : f32
    %15 = vector.broadcast %cst_4 : f32 to vector<16x1xf32>
    %16 = arith.addf %12, %15 : vector<16x1xf32>
    %17 = math.rsqrt %16 : vector<16x1xf32>
    %18 = vector.broadcast %17 : vector<16x1xf32> to vector<16x32xf32>
    %19 = arith.mulf %14, %18 : vector<16x32xf32>
    %c0_5 = arith.constant 0 : index
    %c0_6 = arith.constant 0 : index
    %20 = vector.load %arg3[%c0_5, %c0_6] : memref<1x32xf32, #tpu.memory_space<vmem>>, vector<1x32xf32>
    %21 = vector.broadcast %20 : vector<1x32xf32> to vector<16x32xf32>
    %22 = arith.mulf %19, %21 : vector<16x32xf32>
    %c0_7 = arith.constant 0 : index
    %c0_8 = arith.constant 0 : index
    %23 = vector.load %arg4[%c0_7, %c0_8] : memref<1x32xf32, #tpu.memory_space<vmem>>, vector<1x32xf32>
    %24 = vector.broadcast %23 : vector<1x32xf32> to vector<16x32xf32>
    %25 = arith.addf %22, %24 : vector<16x32xf32>
    %26 = arith.truncf %25 : vector<16x32xf32> to vector<16x32xbf16>
    %c0_9 = arith.constant 0 : index
    %c0_10 = arith.constant 0 : index
    %27 = vector.load %arg5[%c0_9, %c0_10] : memref<32x32xbf16, #tpu.memory_space<vmem>>, vector<32x32xbf16>
    %cst_11 = arith.constant dense<0.000000e+00> : vector<16x32xf32>
    %28 = tpu.matmul %26, %27, %cst_11 {dimension_numbers = #tpu.dot_dimension_numbers<[1], [0], [0], [1], [0, 0, 1, 1], [], []>} : vector<16x32xbf16>, vector<32x32xbf16>, vector<16x32xf32> -> vector<16x32xf32>
    %c0_12 = arith.constant 0 : index
    %c0_13 = arith.constant 0 : index
    %29 = vector.load %arg6[%c0_12, %c0_13] : memref<1x32xf32, #tpu.memory_space<vmem>>, vector<1x32xf32>
    %30 = vector.broadcast %29 : vector<1x32xf32> to vector<16x32xf32>
    %31 = arith.addf %28, %30 : vector<16x32xf32>
    %c0_14 = arith.constant 0 : index
    %c0_15 = arith.constant 0 : index
    %32 = vector.load %arg7[%c0_14, %c0_15] : memref<16x32xf32, #tpu.memory_space<vmem>>, vector<16x32xf32>
    %33 = arith.addf %31, %32 : vector<16x32xf32>
    %c0_16 = arith.constant 0 : index
    %c0_17 = arith.constant 0 : index
    %34 = vector.load %arg8[%c0_16, %c0_17] : memref<16x32xf32, #tpu.memory_space<vmem>>, vector<16x32xf32>
    tpu.vector_store %arg8[%c0_16, %c0_17], %33 {strides = array<i32>} : memref<16x32xf32, #tpu.memory_space<vmem>>, vector<16x32xf32>,
    return
  }
  func.func @transform_0(%arg0: i32, %arg1: i32) -> (i32, i32) {
    %c0_i32 = arith.constant 0 : i32
    %c0_i32_0 = arith.constant 0 : i32
    return %arg0, %c0_i32 : i32, i32
  }
  func.func @transform_1(%arg0: i32, %arg1: i32) -> (i32, i32) {
    %c0_i32 = arith.constant 0 : i32
    %c0_i32_0 = arith.constant 0 : i32
    %c0_i32_1 = arith.constant 0 : i32
    return %c0_i32, %c0_i32_0 : i32, i32
  }
  func.func @transform_2(%arg0: i32, %arg1: i32) -> (i32, i32) {
    %c0_i32 = arith.constant 0 : i32
    %c0_i32_0 = arith.constant 0 : i32
    %c0_i32_1 = arith.constant 0 : i32
    return %c0_i32, %c0_i32_0 : i32, i32
  }
  func.func @transform_3(%arg0: i32, %arg1: i32) -> (i32, i32) {
    %c0_i32 = arith.constant 0 : i32
    %c0_i32_0 = arith.constant 0 : i32
    return %c0_i32, %arg1 : i32, i32
  }
  func.func @transform_4(%arg0: i32, %arg1: i32) -> (i32, i32) {
    %c0_i32 = arith.constant 0 : i32
    %c0_i32_0 = arith.constant 0 : i32
    return %c0_i32, %arg1 : i32, i32
  }
  func.func @transform_5(%arg0: i32, %arg1: i32) -> (i32, i32) {
    %c0_i32 = arith.constant 0 : i32
    return %arg0, %arg1 : i32, i32
  }
  func.func @transform_6(%arg0: i32, %arg1: i32) -> (i32, i32) {
    %c0_i32 = arith.constant 0 : i32
    return %arg0, %arg1 : i32, i32
  }
}

module attributes {stable_mosaic.version = 11 : i64} {
  func.func @_fused_matmul_kernel(%arg0: i32, %arg1: i32, %arg2: memref<16x32xf32, #tpu.memory_space<vmem>>, %arg3: memref<32x32xbf16, #tpu.memory_space<vmem>>, %arg4: memref<1x32xf32, #tpu.memory_space<vmem>>, %arg5: memref<16x32xbf16, #tpu.memory_space<vmem>>) attributes {dimension_semantics = [#tpu.dimension_semantics<parallel>, #tpu.dimension_semantics<parallel>], iteration_bounds = array<i64: 1, 1>, scalar_prefetch = 0 : i64, scratch_operands = 0 : i64, tpu.core_type = #tpu.core_type<tc>, window_params = [{transform_indices = @transform_0, window_bounds = array<i64: 16, 32>}, {transform_indices = @transform_1, window_bounds = array<i64: 32, 32>}, {transform_indices = @transform_2, window_bounds = array<i64: 1, 32>}, {transform_indices = @transform_3, window_bounds = array<i64: 16, 32>}]} {
    %c0 = arith.constant 0 : index
    %c0_0 = arith.constant 0 : index
    %0 = vector.load %arg2[%c0, %c0_0] : memref<16x32xf32, #tpu.memory_space<vmem>>, vector<16x32xf32>
    %1 = arith.truncf %0 : vector<16x32xf32> to vector<16x32xbf16>
    %c0_1 = arith.constant 0 : index
    %c0_2 = arith.constant 0 : index
    %2 = vector.load %arg3[%c0_1, %c0_2] : memref<32x32xbf16, #tpu.memory_space<vmem>>, vector<32x32xbf16>
    %cst = arith.constant dense<0.000000e+00> : vector<16x32xf32>
    %3 = tpu.matmul %1, %2, %cst {dimension_numbers = #tpu.dot_dimension_numbers<[1], [0], [0], [1], [0, 0, 1, 1], [], []>} : vector<16x32xbf16>, vector<32x32xbf16>, vector<16x32xf32> -> vector<16x32xf32>
    %c0_3 = arith.constant 0 : index
    %c0_4 = arith.constant 0 : index
    %4 = vector.load %arg4[%c0_3, %c0_4] : memref<1x32xf32, #tpu.memory_space<vmem>>, vector<1x32xf32>
    %5 = vector.broadcast %4 : vector<1x32xf32> to vector<16x32xf32>
    %6 = arith.addf %3, %5 : vector<16x32xf32>
    %7 = arith.truncf %6 : vector<16x32xf32> to vector<16x32xbf16>
    %c0_5 = arith.constant 0 : index
    %c0_6 = arith.constant 0 : index
    %8 = vector.load %arg5[%c0_5, %c0_6] : memref<16x32xbf16, #tpu.memory_space<vmem>>, vector<16x32xbf16>
    tpu.vector_store %arg5[%c0_5, %c0_6], %7 {strides = array<i32>} : memref<16x32xbf16, #tpu.memory_space<vmem>>, vector<16x32xbf16>,
    return
  }
  func.func @transform_0(%arg0: i32, %arg1: i32) -> (i32, i32) {
    %c0_i32 = arith.constant 0 : i32
    %c0_i32_0 = arith.constant 0 : i32
    return %arg0, %c0_i32 : i32, i32
  }
  func.func @transform_1(%arg0: i32, %arg1: i32) -> (i32, i32) {
    %c0_i32 = arith.constant 0 : i32
    %c0_i32_0 = arith.constant 0 : i32
    return %c0_i32, %arg1 : i32, i32
  }
  func.func @transform_2(%arg0: i32, %arg1: i32) -> (i32, i32) {
    %c0_i32 = arith.constant 0 : i32
    %c0_i32_0 = arith.constant 0 : i32
    return %c0_i32, %arg1 : i32, i32
  }
  func.func @transform_3(%arg0: i32, %arg1: i32) -> (i32, i32) {
    %c0_i32 = arith.constant 0 : i32
    return %arg0, %arg1 : i32, i32
  }
}

module attributes {stable_mosaic.version = 11 : i64} {
  func.func @_gqa_flash_kernel(%arg0: i32, %arg1: i32, %arg2: i32, %arg3: memref<8x32xbf16, #tpu.memory_space<vmem>>, %arg4: memref<8x32xbf16, #tpu.memory_space<vmem>>, %arg5: memref<8x32xbf16, #tpu.memory_space<vmem>>, %arg6: memref<4x8x1xf32, #tpu.memory_space<vmem>>, %arg7: memref<4x8x1xf32, #tpu.memory_space<vmem>>, %arg8: memref<8x32xf32, #tpu.memory_space<vmem>>) attributes {dimension_semantics = [#tpu.dimension_semantics<parallel>, #tpu.dimension_semantics<parallel>, #tpu.dimension_semantics<arbitrary>], iteration_bounds = array<i64: 2, 1, 1>, scalar_prefetch = 0 : i64, scratch_operands = 3 : i64, tpu.core_type = #tpu.core_type<tc>, window_params = [{transform_indices = @transform_0, window_bounds = array<i64: 8, 32>}, {transform_indices = @transform_1, window_bounds = array<i64: 8, 32>}, {transform_indices = @transform_2, window_bounds = array<i64: 8, 32>}]} {
    %c0_i32 = arith.constant 0 : i32
    %0 = arith.cmpi eq, %arg2, %c0_i32 : i32
    %1 = arith.extui %0 : i1 to i32
    %c0_i32_0 = arith.constant 0 : i32
    %2 = arith.cmpi ne, %1, %c0_i32_0 : i32
    scf.if %2 {
      %cst_83 = arith.constant 0xFF800000 : f32
      %144 = vector.broadcast %cst_83 : f32 to vector<4x8x1xf32>
      %c0_84 = arith.constant 0 : index
      %c0_85 = arith.constant 0 : index
      %c0_86 = arith.constant 0 : index
      %145 = vector.load %arg6[%c0_84, %c0_85, %c0_86] : memref<4x8x1xf32, #tpu.memory_space<vmem>>, vector<4x8x1xf32>
      tpu.vector_store %arg6[%c0_84, %c0_85, %c0_86], %144 {strides = array<i32>} : memref<4x8x1xf32, #tpu.memory_space<vmem>>, vector<4x8x1xf32>,
      %cst_87 = arith.constant 0.000000e+00 : f32
      %146 = vector.broadcast %cst_87 : f32 to vector<4x8x1xf32>
      %c0_88 = arith.constant 0 : index
      %c0_89 = arith.constant 0 : index
      %c0_90 = arith.constant 0 : index
      %147 = vector.load %arg7[%c0_88, %c0_89, %c0_90] : memref<4x8x1xf32, #tpu.memory_space<vmem>>, vector<4x8x1xf32>
      tpu.vector_store %arg7[%c0_88, %c0_89, %c0_90], %146 {strides = array<i32>} : memref<4x8x1xf32, #tpu.memory_space<vmem>>, vector<4x8x1xf32>,
      %cst_91 = arith.constant 0.000000e+00 : f32
      %148 = vector.broadcast %cst_91 : f32 to vector<8x32xf32>
      %c0_92 = arith.constant 0 : index
      %c0_93 = arith.constant 0 : index
      %149 = vector.load %arg8[%c0_92, %c0_93] : memref<8x32xf32, #tpu.memory_space<vmem>>, vector<8x32xf32>
      tpu.vector_store %arg8[%c0_92, %c0_93], %148 {strides = array<i32>} : memref<8x32xf32, #tpu.memory_space<vmem>>, vector<8x32xf32>,
    } else {
    }
    %c0 = arith.constant 0 : index
    %c0_1 = arith.constant 0 : index
    %3 = vector.load %arg3[%c0, %c0_1] : memref<8x32xbf16, #tpu.memory_space<vmem>>, vector<8x32xbf16>
    %c0_2 = arith.constant 0 : index
    %c0_3 = arith.constant 0 : index
    %4 = vector.load %arg4[%c0_2, %c0_3] : memref<8x32xbf16, #tpu.memory_space<vmem>>, vector<8x32xbf16>
    %5 = vector.extract_strided_slice %4 {offsets = [0, 0], sizes = [8, 8], strides = [1, 1]} : vector<8x32xbf16> to vector<8x8xbf16>
    %6 = vector.extract_strided_slice %4 {offsets = [0, 16], sizes = [8, 8], strides = [1, 1]} : vector<8x32xbf16> to vector<8x8xbf16>
    %7 = vector.extract_strided_slice %3 {offsets = [0, 0], sizes = [8, 8], strides = [1, 1]} : vector<8x32xbf16> to vector<8x8xbf16>
    %cst = arith.constant dense<0.000000e+00> : vector<8x8xf32>
    %8 = tpu.matmul %7, %5, %cst {dimension_numbers = #tpu.dot_dimension_numbers<[1], [1], [0], [0], [0, 0, 1, 0], [], []>} : vector<8x8xbf16>, vector<8x8xbf16>, vector<8x8xf32> -> vector<8x8xf32>
    %cst_4 = arith.constant 0.353553385 : f32
    %9 = vector.broadcast %cst_4 : f32 to vector<8x8xf32>
    %10 = arith.mulf %8, %9 : vector<8x8xf32>
    %c0_5 = arith.constant 0 : index
    %c0_6 = arith.constant 0 : index
    %c0_7 = arith.constant 0 : index
    %11 = vector.load %arg6[%c0_5, %c0_6, %c0_7] : memref<4x8x1xf32, #tpu.memory_space<vmem>>, vector<1x8x1xf32>
    %12 = vector.shape_cast %11 : vector<1x8x1xf32> to vector<8x1xf32>
    %cst_8 = arith.constant dense<0xFF800000> : vector<8xf32>
    %13 = vector.multi_reduction <maximumf>, %10, %cst_8 [1] : vector<8x8xf32> to vector<8xf32>
    %14 = vector.shape_cast %13 : vector<8xf32> to vector<8x1xf32>
    %15 = arith.maximumf %12, %14 : vector<8x1xf32>
    %16 = arith.subf %12, %15 : vector<8x1xf32>
    %17 = math.exp %16 : vector<8x1xf32>
    %18 = vector.broadcast %15 : vector<8x1xf32> to vector<8x8xf32>
    %19 = arith.subf %10, %18 : vector<8x8xf32>
    %20 = math.exp %19 : vector<8x8xf32>
    %c0_9 = arith.constant 0 : index
    %c0_10 = arith.constant 0 : index
    %c0_11 = arith.constant 0 : index
    %21 = vector.load %arg7[%c0_9, %c0_10, %c0_11] : memref<4x8x1xf32, #tpu.memory_space<vmem>>, vector<1x8x1xf32>
    %22 = vector.shape_cast %21 : vector<1x8x1xf32> to vector<8x1xf32>
    %23 = arith.mulf %17, %22 : vector<8x1xf32>
    %cst_12 = arith.constant dense<0.000000e+00> : vector<8xf32>
    %24 = vector.multi_reduction <add>, %20, %cst_12 [1] : vector<8x8xf32> to vector<8xf32>
    %25 = vector.shape_cast %24 : vector<8xf32> to vector<8x1xf32>
    %26 = arith.addf %23, %25 : vector<8x1xf32>
    %c0_13 = arith.constant 0 : index
    %c0_14 = arith.constant 0 : index
    %c0_15 = arith.constant 0 : index
    %27 = vector.load %arg7[%c0_13, %c0_14, %c0_15] : memref<4x8x1xf32, #tpu.memory_space<vmem>>, vector<1x8x1xf32>
    %28 = vector.shape_cast %27 : vector<1x8x1xf32> to vector<8x1xf32>
    %29 = vector.shape_cast %26 : vector<8x1xf32> to vector<1x8x1xf32>
    tpu.vector_store %arg7[%c0_13, %c0_14, %c0_15], %29 {strides = array<i32>} : memref<4x8x1xf32, #tpu.memory_space<vmem>>, vector<1x8x1xf32>,
    %30 = arith.truncf %20 : vector<8x8xf32> to vector<8x8xbf16>
    %cst_16 = arith.constant dense<0.000000e+00> : vector<8x8xf32>
    %31 = tpu.matmul %30, %6, %cst_16 {dimension_numbers = #tpu.dot_dimension_numbers<[1], [0], [0], [1], [0, 0, 1, 1], [], []>} : vector<8x8xbf16>, vector<8x8xbf16>, vector<8x8xf32> -> vector<8x8xf32>
    %c0_17 = arith.constant 0 : index
    %c0_18 = arith.constant 0 : index
    %32 = vector.load %arg8[%c0_17, %c0_18] : memref<8x32xf32, #tpu.memory_space<vmem>>, vector<8x8xf32>
    %33 = vector.broadcast %17 : vector<8x1xf32> to vector<8x8xf32>
    %34 = arith.mulf %33, %32 : vector<8x8xf32>
    %35 = arith.addf %34, %31 : vector<8x8xf32>
    %c0_19 = arith.constant 0 : index
    %c0_20 = arith.constant 0 : index
    %36 = vector.load %arg8[%c0_19, %c0_20] : memref<8x32xf32, #tpu.memory_space<vmem>>, vector<8x8xf32>
    tpu.vector_store %arg8[%c0_19, %c0_20], %35 {strides = array<i32>} : memref<8x32xf32, #tpu.memory_space<vmem>>, vector<8x8xf32>,
    %c0_21 = arith.constant 0 : index
    %c0_22 = arith.constant 0 : index
    %c0_23 = arith.constant 0 : index
    %37 = vector.load %arg6[%c0_21, %c0_22, %c0_23] : memref<4x8x1xf32, #tpu.memory_space<vmem>>, vector<1x8x1xf32>
    %38 = vector.shape_cast %37 : vector<1x8x1xf32> to vector<8x1xf32>
    %39 = vector.shape_cast %15 : vector<8x1xf32> to vector<1x8x1xf32>
    tpu.vector_store %arg6[%c0_21, %c0_22, %c0_23], %39 {strides = array<i32>} : memref<4x8x1xf32, #tpu.memory_space<vmem>>, vector<1x8x1xf32>,
    %40 = vector.extract_strided_slice %3 {offsets = [0, 8], sizes = [8, 8], strides = [1, 1]} : vector<8x32xbf16> to vector<8x8xbf16>
    %cst_24 = arith.constant dense<0.000000e+00> : vector<8x8xf32>
    %41 = tpu.matmul %40, %5, %cst_24 {dimension_numbers = #tpu.dot_dimension_numbers<[1], [1], [0], [0], [0, 0, 1, 0], [], []>} : vector<8x8xbf16>, vector<8x8xbf16>, vector<8x8xf32> -> vector<8x8xf32>
    %cst_25 = arith.constant 0.353553385 : f32
    %42 = vector.broadcast %cst_25 : f32 to vector<8x8xf32>
    %43 = arith.mulf %41, %42 : vector<8x8xf32>
    %c1 = arith.constant 1 : index
    %c0_26 = arith.constant 0 : index
    %c0_27 = arith.constant 0 : index
    %44 = vector.load %arg6[%c1, %c0_26, %c0_27] : memref<4x8x1xf32, #tpu.memory_space<vmem>>, vector<1x8x1xf32>
    %45 = vector.shape_cast %44 : vector<1x8x1xf32> to vector<8x1xf32>
    %cst_28 = arith.constant dense<0xFF800000> : vector<8xf32>
    %46 = vector.multi_reduction <maximumf>, %43, %cst_28 [1] : vector<8x8xf32> to vector<8xf32>
    %47 = vector.shape_cast %46 : vector<8xf32> to vector<8x1xf32>
    %48 = arith.maximumf %45, %47 : vector<8x1xf32>
    %49 = arith.subf %45, %48 : vector<8x1xf32>
    %50 = math.exp %49 : vector<8x1xf32>
    %51 = vector.broadcast %48 : vector<8x1xf32> to vector<8x8xf32>
    %52 = arith.subf %43, %51 : vector<8x8xf32>
    %53 = math.exp %52 : vector<8x8xf32>
    %c1_29 = arith.constant 1 : index
    %c0_30 = arith.constant 0 : index
    %c0_31 = arith.constant 0 : index
    %54 = vector.load %arg7[%c1_29, %c0_30, %c0_31] : memref<4x8x1xf32, #tpu.memory_space<vmem>>, vector<1x8x1xf32>
    %55 = vector.shape_cast %54 : vector<1x8x1xf32> to vector<8x1xf32>
    %56 = arith.mulf %50, %55 : vector<8x1xf32>
    %cst_32 = arith.constant dense<0.000000e+00> : vector<8xf32>
    %57 = vector.multi_reduction <add>, %53, %cst_32 [1] : vector<8x8xf32> to vector<8xf32>
    %58 = vector.shape_cast %57 : vector<8xf32> to vector<8x1xf32>
    %59 = arith.addf %56, %58 : vector<8x1xf32>
    %c1_33 = arith.constant 1 : index
    %c0_34 = arith.constant 0 : index
    %c0_35 = arith.constant 0 : index
    %60 = vector.load %arg7[%c1_33, %c0_34, %c0_35] : memref<4x8x1xf32, #tpu.memory_space<vmem>>, vector<1x8x1xf32>
    %61 = vector.shape_cast %60 : vector<1x8x1xf32> to vector<8x1xf32>
    %62 = vector.shape_cast %59 : vector<8x1xf32> to vector<1x8x1xf32>
    tpu.vector_store %arg7[%c1_33, %c0_34, %c0_35], %62 {strides = array<i32>} : memref<4x8x1xf32, #tpu.memory_space<vmem>>, vector<1x8x1xf32>,
    %63 = arith.truncf %53 : vector<8x8xf32> to vector<8x8xbf16>
    %cst_36 = arith.constant dense<0.000000e+00> : vector<8x8xf32>
    %64 = tpu.matmul %63, %6, %cst_36 {dimension_numbers = #tpu.dot_dimension_numbers<[1], [0], [0], [1], [0, 0, 1, 1], [], []>} : vector<8x8xbf16>, vector<8x8xbf16>, vector<8x8xf32> -> vector<8x8xf32>
    %c0_37 = arith.constant 0 : index
    %c8 = arith.constant 8 : index
    %65 = vector.load %arg8[%c0_37, %c8] : memref<8x32xf32, #tpu.memory_space<vmem>>, vector<8x8xf32>
    %66 = vector.broadcast %50 : vector<8x1xf32> to vector<8x8xf32>
    %67 = arith.mulf %66, %65 : vector<8x8xf32>
    %68 = arith.addf %67, %64 : vector<8x8xf32>
    %c0_38 = arith.constant 0 : index
    %c8_39 = arith.constant 8 : index
    %69 = vector.load %arg8[%c0_38, %c8_39] : memref<8x32xf32, #tpu.memory_space<vmem>>, vector<8x8xf32>
    tpu.vector_store %arg8[%c0_38, %c8_39], %68 {strides = array<i32>} : memref<8x32xf32, #tpu.memory_space<vmem>>, vector<8x8xf32>,
    %c1_40 = arith.constant 1 : index
    %c0_41 = arith.constant 0 : index
    %c0_42 = arith.constant 0 : index
    %70 = vector.load %arg6[%c1_40, %c0_41, %c0_42] : memref<4x8x1xf32, #tpu.memory_space<vmem>>, vector<1x8x1xf32>
    %71 = vector.shape_cast %70 : vector<1x8x1xf32> to vector<8x1xf32>
    %72 = vector.shape_cast %48 : vector<8x1xf32> to vector<1x8x1xf32>
    tpu.vector_store %arg6[%c1_40, %c0_41, %c0_42], %72 {strides = array<i32>} : memref<4x8x1xf32, #tpu.memory_space<vmem>>, vector<1x8x1xf32>,
    %73 = vector.extract_strided_slice %4 {offsets = [0, 8], sizes = [8, 8], strides = [1, 1]} : vector<8x32xbf16> to vector<8x8xbf16>
    %74 = vector.extract_strided_slice %4 {offsets = [0, 24], sizes = [8, 8], strides = [1, 1]} : vector<8x32xbf16> to vector<8x8xbf16>
    %75 = vector.extract_strided_slice %3 {offsets = [0, 16], sizes = [8, 8], strides = [1, 1]} : vector<8x32xbf16> to vector<8x8xbf16>
    %cst_43 = arith.constant dense<0.000000e+00> : vector<8x8xf32>
    %76 = tpu.matmul %75, %73, %cst_43 {dimension_numbers = #tpu.dot_dimension_numbers<[1], [1], [0], [0], [0, 0, 1, 0], [], []>} : vector<8x8xbf16>, vector<8x8xbf16>, vector<8x8xf32> -> vector<8x8xf32>
    %cst_44 = arith.constant 0.353553385 : f32
    %77 = vector.broadcast %cst_44 : f32 to vector<8x8xf32>
    %78 = arith.mulf %76, %77 : vector<8x8xf32>
    %c2 = arith.constant 2 : index
    %c0_45 = arith.constant 0 : index
    %c0_46 = arith.constant 0 : index
    %79 = vector.load %arg6[%c2, %c0_45, %c0_46] : memref<4x8x1xf32, #tpu.memory_space<vmem>>, vector<1x8x1xf32>
    %80 = vector.shape_cast %79 : vector<1x8x1xf32> to vector<8x1xf32>
    %cst_47 = arith.constant dense<0xFF800000> : vector<8xf32>
    %81 = vector.multi_reduction <maximumf>, %78, %cst_47 [1] : vector<8x8xf32> to vector<8xf32>
    %82 = vector.shape_cast %81 : vector<8xf32> to vector<8x1xf32>
    %83 = arith.maximumf %80, %82 : vector<8x1xf32>
    %84 = arith.subf %80, %83 : vector<8x1xf32>
    %85 = math.exp %84 : vector<8x1xf32>
    %86 = vector.broadcast %83 : vector<8x1xf32> to vector<8x8xf32>
    %87 = arith.subf %78, %86 : vector<8x8xf32>
    %88 = math.exp %87 : vector<8x8xf32>
    %c2_48 = arith.constant 2 : index
    %c0_49 = arith.constant 0 : index
    %c0_50 = arith.constant 0 : index
    %89 = vector.load %arg7[%c2_48, %c0_49, %c0_50] : memref<4x8x1xf32, #tpu.memory_space<vmem>>, vector<1x8x1xf32>
    %90 = vector.shape_cast %89 : vector<1x8x1xf32> to vector<8x1xf32>
    %91 = arith.mulf %85, %90 : vector<8x1xf32>
    %cst_51 = arith.constant dense<0.000000e+00> : vector<8xf32>
    %92 = vector.multi_reduction <add>, %88, %cst_51 [1] : vector<8x8xf32> to vector<8xf32>
    %93 = vector.shape_cast %92 : vector<8xf32> to vector<8x1xf32>
    %94 = arith.addf %91, %93 : vector<8x1xf32>
    %c2_52 = arith.constant 2 : index
    %c0_53 = arith.constant 0 : index
    %c0_54 = arith.constant 0 : index
    %95 = vector.load %arg7[%c2_52, %c0_53, %c0_54] : memref<4x8x1xf32, #tpu.memory_space<vmem>>, vector<1x8x1xf32>
    %96 = vector.shape_cast %95 : vector<1x8x1xf32> to vector<8x1xf32>
    %97 = vector.shape_cast %94 : vector<8x1xf32> to vector<1x8x1xf32>
    tpu.vector_store %arg7[%c2_52, %c0_53, %c0_54], %97 {strides = array<i32>} : memref<4x8x1xf32, #tpu.memory_space<vmem>>, vector<1x8x1xf32>,
    %98 = arith.truncf %88 : vector<8x8xf32> to vector<8x8xbf16>
    %cst_55 = arith.constant dense<0.000000e+00> : vector<8x8xf32>
    %99 = tpu.matmul %98, %74, %cst_55 {dimension_numbers = #tpu.dot_dimension_numbers<[1], [0], [0], [1], [0, 0, 1, 1], [], []>} : vector<8x8xbf16>, vector<8x8xbf16>, vector<8x8xf32> -> vector<8x8xf32>
    %c0_56 = arith.constant 0 : index
    %c16 = arith.constant 16 : index
    %100 = vector.load %arg8[%c0_56, %c16] : memref<8x32xf32, #tpu.memory_space<vmem>>, vector<8x8xf32>
    %101 = vector.broadcast %85 : vector<8x1xf32> to vector<8x8xf32>
    %102 = arith.mulf %101, %100 : vector<8x8xf32>
    %103 = arith.addf %102, %99 : vector<8x8xf32>
    %c0_57 = arith.constant 0 : index
    %c16_58 = arith.constant 16 : index
    %104 = vector.load %arg8[%c0_57, %c16_58] : memref<8x32xf32, #tpu.memory_space<vmem>>, vector<8x8xf32>
    tpu.vector_store %arg8[%c0_57, %c16_58], %103 {strides = array<i32>} : memref<8x32xf32, #tpu.memory_space<vmem>>, vector<8x8xf32>,
    %c2_59 = arith.constant 2 : index
    %c0_60 = arith.constant 0 : index
    %c0_61 = arith.constant 0 : index
    %105 = vector.load %arg6[%c2_59, %c0_60, %c0_61] : memref<4x8x1xf32, #tpu.memory_space<vmem>>, vector<1x8x1xf32>
    %106 = vector.shape_cast %105 : vector<1x8x1xf32> to vector<8x1xf32>
    %107 = vector.shape_cast %83 : vector<8x1xf32> to vector<1x8x1xf32>
    tpu.vector_store %arg6[%c2_59, %c0_60, %c0_61], %107 {strides = array<i32>} : memref<4x8x1xf32, #tpu.memory_space<vmem>>, vector<1x8x1xf32>,
    %108 = vector.extract_strided_slice %3 {offsets = [0, 24], sizes = [8, 8], strides = [1, 1]} : vector<8x32xbf16> to vector<8x8xbf16>
    %cst_62 = arith.constant dense<0.000000e+00> : vector<8x8xf32>
    %109 = tpu.matmul %108, %73, %cst_62 {dimension_numbers = #tpu.dot_dimension_numbers<[1], [1], [0], [0], [0, 0, 1, 0], [], []>} : vector<8x8xbf16>, vector<8x8xbf16>, vector<8x8xf32> -> vector<8x8xf32>
    %cst_63 = arith.constant 0.353553385 : f32
    %110 = vector.broadcast %cst_63 : f32 to vector<8x8xf32>
    %111 = arith.mulf %109, %110 : vector<8x8xf32>
    %c3 = arith.constant 3 : index
    %c0_64 = arith.constant 0 : index
    %c0_65 = arith.constant 0 : index
    %112 = vector.load %arg6[%c3, %c0_64, %c0_65] : memref<4x8x1xf32, #tpu.memory_space<vmem>>, vector<1x8x1xf32>
    %113 = vector.shape_cast %112 : vector<1x8x1xf32> to vector<8x1xf32>
    %cst_66 = arith.constant dense<0xFF800000> : vector<8xf32>
    %114 = vector.multi_reduction <maximumf>, %111, %cst_66 [1] : vector<8x8xf32> to vector<8xf32>
    %115 = vector.shape_cast %114 : vector<8xf32> to vector<8x1xf32>
    %116 = arith.maximumf %113, %115 : vector<8x1xf32>
    %117 = arith.subf %113, %116 : vector<8x1xf32>
    %118 = math.exp %117 : vector<8x1xf32>
    %119 = vector.broadcast %116 : vector<8x1xf32> to vector<8x8xf32>
    %120 = arith.subf %111, %119 : vector<8x8xf32>
    %121 = math.exp %120 : vector<8x8xf32>
    %c3_67 = arith.constant 3 : index
    %c0_68 = arith.constant 0 : index
    %c0_69 = arith.constant 0 : index
    %122 = vector.load %arg7[%c3_67, %c0_68, %c0_69] : memref<4x8x1xf32, #tpu.memory_space<vmem>>, vector<1x8x1xf32>
    %123 = vector.shape_cast %122 : vector<1x8x1xf32> to vector<8x1xf32>
    %124 = arith.mulf %118, %123 : vector<8x1xf32>
    %cst_70 = arith.constant dense<0.000000e+00> : vector<8xf32>
    %125 = vector.multi_reduction <add>, %121, %cst_70 [1] : vector<8x8xf32> to vector<8xf32>
    %126 = vector.shape_cast %125 : vector<8xf32> to vector<8x1xf32>
    %127 = arith.addf %124, %126 : vector<8x1xf32>
    %c3_71 = arith.constant 3 : index
    %c0_72 = arith.constant 0 : index
    %c0_73 = arith.constant 0 : index
    %128 = vector.load %arg7[%c3_71, %c0_72, %c0_73] : memref<4x8x1xf32, #tpu.memory_space<vmem>>, vector<1x8x1xf32>
    %129 = vector.shape_cast %128 : vector<1x8x1xf32> to vector<8x1xf32>
    %130 = vector.shape_cast %127 : vector<8x1xf32> to vector<1x8x1xf32>
    tpu.vector_store %arg7[%c3_71, %c0_72, %c0_73], %130 {strides = array<i32>} : memref<4x8x1xf32, #tpu.memory_space<vmem>>, vector<1x8x1xf32>,
    %131 = arith.truncf %121 : vector<8x8xf32> to vector<8x8xbf16>
    %cst_74 = arith.constant dense<0.000000e+00> : vector<8x8xf32>
    %132 = tpu.matmul %131, %74, %cst_74 {dimension_numbers = #tpu.dot_dimension_numbers<[1], [0], [0], [1], [0, 0, 1, 1], [], []>} : vector<8x8xbf16>, vector<8x8xbf16>, vector<8x8xf32> -> vector<8x8xf32>
    %c0_75 = arith.constant 0 : index
    %c24 = arith.constant 24 : index
    %133 = vector.load %arg8[%c0_75, %c24] : memref<8x32xf32, #tpu.memory_space<vmem>>, vector<8x8xf32>
    %134 = vector.broadcast %118 : vector<8x1xf32> to vector<8x8xf32>
    %135 = arith.mulf %134, %133 : vector<8x8xf32>
    %136 = arith.addf %135, %132 : vector<8x8xf32>
    %c0_76 = arith.constant 0 : index
    %c24_77 = arith.constant 24 : index
    %137 = vector.load %arg8[%c0_76, %c24_77] : memref<8x32xf32, #tpu.memory_space<vmem>>, vector<8x8xf32>
    tpu.vector_store %arg8[%c0_76, %c24_77], %136 {strides = array<i32>} : memref<8x32xf32, #tpu.memory_space<vmem>>, vector<8x8xf32>,
    %c3_78 = arith.constant 3 : index
    %c0_79 = arith.constant 0 : index
    %c0_80 = arith.constant 0 : index
    %138 = vector.load %arg6[%c3_78, %c0_79, %c0_80] : memref<4x8x1xf32, #tpu.memory_space<vmem>>, vector<1x8x1xf32>
    %139 = vector.shape_cast %138 : vector<1x8x1xf32> to vector<8x1xf32>
    %140 = vector.shape_cast %116 : vector<8x1xf32> to vector<1x8x1xf32>
    tpu.vector_store %arg6[%c3_78, %c0_79, %c0_80], %140 {strides = array<i32>} : memref<4x8x1xf32, #tpu.memory_space<vmem>>, vector<1x8x1xf32>,
    %c0_i32_81 = arith.constant 0 : i32
    %141 = arith.cmpi eq, %arg2, %c0_i32_81 : i32
    %142 = arith.extui %141 : i1 to i32
    %c0_i32_82 = arith.constant 0 : i32
    %143 = arith.cmpi ne, %142, %c0_i32_82 : i32
    scf.if %143 {
      %c0_83 = arith.constant 0 : index
      %c0_84 = arith.constant 0 : index
      %144 = vector.load %arg8[%c0_83, %c0_84] : memref<8x32xf32, #tpu.memory_space<vmem>>, vector<8x8xf32>
      %c0_85 = arith.constant 0 : index
      %c0_86 = arith.constant 0 : index
      %c0_87 = arith.constant 0 : index
      %145 = vector.load %arg7[%c0_85, %c0_86, %c0_87] : memref<4x8x1xf32, #tpu.memory_space<vmem>>, vector<1x8x1xf32>
      %146 = vector.shape_cast %145 : vector<1x8x1xf32> to vector<8x1xf32>
      %cst_88 = arith.constant 1.000000e+00 : f32
      %147 = vector.broadcast %cst_88 : f32 to vector<8x1xf32>
      %148 = arith.divf %147, %146 : vector<8x1xf32>
      %149 = vector.broadcast %148 : vector<8x1xf32> to vector<8x8xf32>
      %150 = arith.mulf %144, %149 : vector<8x8xf32>
      %c0_89 = arith.constant 0 : index
      %c0_90 = arith.constant 0 : index
      %151 = vector.load %arg8[%c0_89, %c0_90] : memref<8x32xf32, #tpu.memory_space<vmem>>, vector<8x8xf32>
      tpu.vector_store %arg8[%c0_89, %c0_90], %150 {strides = array<i32>} : memref<8x32xf32, #tpu.memory_space<vmem>>, vector<8x8xf32>,
      %c0_91 = arith.constant 0 : index
      %c8_92 = arith.constant 8 : index
      %152 = vector.load %arg8[%c0_91, %c8_92] : memref<8x32xf32, #tpu.memory_space<vmem>>, vector<8x8xf32>
      %c1_93 = arith.constant 1 : index
      %c0_94 = arith.constant 0 : index
      %c0_95 = arith.constant 0 : index
      %153 = vector.load %arg7[%c1_93, %c0_94, %c0_95] : memref<4x8x1xf32, #tpu.memory_space<vmem>>, vector<1x8x1xf32>
      %154 = vector.shape_cast %153 : vector<1x8x1xf32> to vector<8x1xf32>
      %cst_96 = arith.constant 1.000000e+00 : f32
      %155 = vector.broadcast %cst_96 : f32 to vector<8x1xf32>
      %156 = arith.divf %155, %154 : vector<8x1xf32>
      %157 = vector.broadcast %156 : vector<8x1xf32> to vector<8x8xf32>
      %158 = arith.mulf %152, %157 : vector<8x8xf32>
      %c0_97 = arith.constant 0 : index
      %c8_98 = arith.constant 8 : index
      %159 = vector.load %arg8[%c0_97, %c8_98] : memref<8x32xf32, #tpu.memory_space<vmem>>, vector<8x8xf32>
      tpu.vector_store %arg8[%c0_97, %c8_98], %158 {strides = array<i32>} : memref<8x32xf32, #tpu.memory_space<vmem>>, vector<8x8xf32>,
      %c0_99 = arith.constant 0 : index
      %c16_100 = arith.constant 16 : index
      %160 = vector.load %arg8[%c0_99, %c16_100] : memref<8x32xf32, #tpu.memory_space<vmem>>, vector<8x8xf32>
      %c2_101 = arith.constant 2 : index
      %c0_102 = arith.constant 0 : index
      %c0_103 = arith.constant 0 : index
      %161 = vector.load %arg7[%c2_101, %c0_102, %c0_103] : memref<4x8x1xf32, #tpu.memory_space<vmem>>, vector<1x8x1xf32>
      %162 = vector.shape_cast %161 : vector<1x8x1xf32> to vector<8x1xf32>
      %cst_104 = arith.constant 1.000000e+00 : f32
      %163 = vector.broadcast %cst_104 : f32 to vector<8x1xf32>
      %164 = arith.divf %163, %162 : vector<8x1xf32>
      %165 = vector.broadcast %164 : vector<8x1xf32> to vector<8x8xf32>
      %166 = arith.mulf %160, %165 : vector<8x8xf32>
      %c0_105 = arith.constant 0 : index
      %c16_106 = arith.constant 16 : index
      %167 = vector.load %arg8[%c0_105, %c16_106] : memref<8x32xf32, #tpu.memory_space<vmem>>, vector<8x8xf32>
      tpu.vector_store %arg8[%c0_105, %c16_106], %166 {strides = array<i32>} : memref<8x32xf32, #tpu.memory_space<vmem>>, vector<8x8xf32>,
      %c0_107 = arith.constant 0 : index
      %c24_108 = arith.constant 24 : index
      %168 = vector.load %arg8[%c0_107, %c24_108] : memref<8x32xf32, #tpu.memory_space<vmem>>, vector<8x8xf32>
      %c3_109 = arith.constant 3 : index
      %c0_110 = arith.constant 0 : index
      %c0_111 = arith.constant 0 : index
      %169 = vector.load %arg7[%c3_109, %c0_110, %c0_111] : memref<4x8x1xf32, #tpu.memory_space<vmem>>, vector<1x8x1xf32>
      %170 = vector.shape_cast %169 : vector<1x8x1xf32> to vector<8x1xf32>
      %cst_112 = arith.constant 1.000000e+00 : f32
      %171 = vector.broadcast %cst_112 : f32 to vector<8x1xf32>
      %172 = arith.divf %171, %170 : vector<8x1xf32>
      %173 = vector.broadcast %172 : vector<8x1xf32> to vector<8x8xf32>
      %174 = arith.mulf %168, %173 : vector<8x8xf32>
      %c0_113 = arith.constant 0 : index
      %c24_114 = arith.constant 24 : index
      %175 = vector.load %arg8[%c0_113, %c24_114] : memref<8x32xf32, #tpu.memory_space<vmem>>, vector<8x8xf32>
      tpu.vector_store %arg8[%c0_113, %c24_114], %174 {strides = array<i32>} : memref<8x32xf32, #tpu.memory_space<vmem>>, vector<8x8xf32>,
      %c0_115 = arith.constant 0 : index
      %c0_116 = arith.constant 0 : index
      %176 = vector.load %arg8[%c0_115, %c0_116] : memref<8x32xf32, #tpu.memory_space<vmem>>, vector<8x32xf32>
      %177 = arith.truncf %176 : vector<8x32xf32> to vector<8x32xbf16>
      %c0_117 = arith.constant 0 : index
      %c0_118 = arith.constant 0 : index
      %178 = vector.load %arg5[%c0_117, %c0_118] : memref<8x32xbf16, #tpu.memory_space<vmem>>, vector<8x32xbf16>
      tpu.vector_store %arg5[%c0_117, %c0_118], %177 {strides = array<i32>} : memref<8x32xbf16, #tpu.memory_space<vmem>>, vector<8x32xbf16>,
    } else {
    }
    return
  }
  func.func @transform_0(%arg0: i32, %arg1: i32, %arg2: i32) -> (i32, i32) {
    %c1_i32 = arith.constant 1 : i32
    %0 = arith.muli %arg0, %c1_i32 : i32
    %1 = arith.addi %0, %arg1 : i32
    %c0_i32 = arith.constant 0 : i32
    %c0_i32_0 = arith.constant 0 : i32
    return %1, %c0_i32 : i32, i32
  }
  func.func @transform_1(%arg0: i32, %arg1: i32, %arg2: i32) -> (i32, i32) {
    %c1_i32 = arith.constant 1 : i32
    %0 = arith.muli %arg0, %c1_i32 : i32
    %1 = arith.addi %0, %arg2 : i32
    %c0_i32 = arith.constant 0 : i32
    %c0_i32_0 = arith.constant 0 : i32
    return %1, %c0_i32 : i32, i32
  }
  func.func @transform_2(%arg0: i32, %arg1: i32, %arg2: i32) -> (i32, i32) {
    %c1_i32 = arith.constant 1 : i32
    %0 = arith.muli %arg0, %c1_i32 : i32
    %1 = arith.addi %0, %arg1 : i32
    %c0_i32 = arith.constant 0 : i32
    %c0_i32_0 = arith.constant 0 : i32
    return %1, %c0_i32 : i32, i32
  }
}

module attributes {stable_mosaic.version = 11 : i64} {
  func.func @_fused_matmul_kernel(%arg0: i32, %arg1: i32, %arg2: memref<16x32xf32, #tpu.memory_space<vmem>>, %arg3: memref<1x32xf32, #tpu.memory_space<vmem>>, %arg4: memref<1x32xf32, #tpu.memory_space<vmem>>, %arg5: memref<32x64xbf16, #tpu.memory_space<vmem>>, %arg6: memref<1x64xf32, #tpu.memory_space<vmem>>, %arg7: memref<16x64xbf16, #tpu.memory_space<vmem>>) attributes {dimension_semantics = [#tpu.dimension_semantics<parallel>, #tpu.dimension_semantics<parallel>], iteration_bounds = array<i64: 1, 1>, scalar_prefetch = 0 : i64, scratch_operands = 0 : i64, tpu.core_type = #tpu.core_type<tc>, window_params = [{transform_indices = @transform_0, window_bounds = array<i64: 16, 32>}, {pipeline_mode = #tpu.pipeline_mode<synchronous>, transform_indices = @transform_1, window_bounds = array<i64: 1, 32>}, {pipeline_mode = #tpu.pipeline_mode<synchronous>, transform_indices = @transform_2, window_bounds = array<i64: 1, 32>}, {transform_indices = @transform_3, window_bounds = array<i64: 32, 64>}, {transform_indices = @transform_4, window_bounds = array<i64: 1, 64>}, {transform_indices = @transform_5, window_bounds = array<i64: 16, 64>}]} {
    %c0 = arith.constant 0 : index
    %c0_0 = arith.constant 0 : index
    %0 = vector.load %arg2[%c0, %c0_0] : memref<16x32xf32, #tpu.memory_space<vmem>>, vector<16x32xf32>
    %cst = arith.constant dense<0.000000e+00> : vector<16xf32>
    %1 = vector.multi_reduction <add>, %0, %cst [1] : vector<16x32xf32> to vector<16xf32>
    %2 = vector.shape_cast %1 : vector<16xf32> to vector<16x1xf32>
    %cst_1 = arith.constant 3.200000e+01 : f32
    %3 = vector.broadcast %cst_1 : f32 to vector<16x1xf32>
    %4 = arith.divf %2, %3 : vector<16x1xf32>
    %5 = vector.broadcast %4 : vector<16x1xf32> to vector<16x32xf32>
    %6 = arith.subf %0, %5 : vector<16x32xf32>
    %7 = arith.mulf %6, %6 : vector<16x32xf32>
    %cst_2 = arith.constant dense<0.000000e+00> : vector<16xf32>
    %8 = vector.multi_reduction <add>, %7, %cst_2 [1] : vector<16x32xf32> to vector<16xf32>
    %9 = vector.shape_cast %8 : vector<16xf32> to vector<16x1xf32>
    %cst_3 = arith.constant 3.200000e+01 : f32
    %10 = vector.broadcast %cst_3 : f32 to vector<16x1xf32>
    %11 = arith.divf %9, %10 : vector<16x1xf32>
    %12 = vector.broadcast %4 : vector<16x1xf32> to vector<16x32xf32>
    %13 = arith.subf %0, %12 : vector<16x32xf32>
    %cst_4 = arith.constant 9.99999974E-6 : f32
    %14 = vector.broadcast %cst_4 : f32 to vector<16x1xf32>
    %15 = arith.addf %11, %14 : vector<16x1xf32>
    %16 = math.rsqrt %15 : vector<16x1xf32>
    %17 = vector.broadcast %16 : vector<16x1xf32> to vector<16x32xf32>
    %18 = arith.mulf %13, %17 : vector<16x32xf32>
    %c0_5 = arith.constant 0 : index
    %c0_6 = arith.constant 0 : index
    %19 = vector.load %arg3[%c0_5, %c0_6] : memref<1x32xf32, #tpu.memory_space<vmem>>, vector<1x32xf32>
    %20 = vector.broadcast %19 : vector<1x32xf32> to vector<16x32xf32>
    %21 = arith.mulf %18, %20 : vector<16x32xf32>
    %c0_7 = arith.constant 0 : index
    %c0_8 = arith.constant 0 : index
    %22 = vector.load %arg4[%c0_7, %c0_8] : memref<1x32xf32, #tpu.memory_space<vmem>>, vector<1x32xf32>
    %23 = vector.broadcast %22 : vector<1x32xf32> to vector<16x32xf32>
    %24 = arith.addf %21, %23 : vector<16x32xf32>
    %25 = arith.truncf %24 : vector<16x32xf32> to vector<16x32xbf16>
    %c0_9 = arith.constant 0 : index
    %c0_10 = arith.constant 0 : index
    %26 = vector.load %arg5[%c0_9, %c0_10] : memref<32x64xbf16, #tpu.memory_space<vmem>>, vector<32x64xbf16>
    %cst_11 = arith.constant dense<0.000000e+00> : vector<16x64xf32>
    %27 = tpu.matmul %25, %26, %cst_11 {dimension_numbers = #tpu.dot_dimension_numbers<[1], [0], [0], [1], [0, 0, 1, 1], [], []>} : vector<16x32xbf16>, vector<32x64xbf16>, vector<16x64xf32> -> vector<16x64xf32>
    %c0_12 = arith.constant 0 : index
    %c0_13 = arith.constant 0 : index
    %28 = vector.load %arg6[%c0_12, %c0_13] : memref<1x64xf32, #tpu.memory_space<vmem>>, vector<1x64xf32>
    %29 = vector.broadcast %28 : vector<1x64xf32> to vector<16x64xf32>
    %30 = arith.addf %27, %29 : vector<16x64xf32>
    %cst_14 = arith.constant 0.000000e+00 : f32
    %31 = vector.broadcast %cst_14 : f32 to vector<16x64xf32>
    %32 = arith.maximumf %30, %31 : vector<16x64xf32>
    %33 = arith.truncf %32 : vector<16x64xf32> to vector<16x64xbf16>
    %c0_15 = arith.constant 0 : index
    %c0_16 = arith.constant 0 : index
    %34 = vector.load %arg7[%c0_15, %c0_16] : memref<16x64xbf16, #tpu.memory_space<vmem>>, vector<16x64xbf16>
    tpu.vector_store %arg7[%c0_15, %c0_16], %33 {strides = array<i32>} : memref<16x64xbf16, #tpu.memory_space<vmem>>, vector<16x64xbf16>,
    return
  }
  func.func @transform_0(%arg0: i32, %arg1: i32) -> (i32, i32) {
    %c0_i32 = arith.constant 0 : i32
    %c0_i32_0 = arith.constant 0 : i32
    return %arg0, %c0_i32 : i32, i32
  }
  func.func @transform_1(%arg0: i32, %arg1: i32) -> (i32, i32) {
    %c0_i32 = arith.constant 0 : i32
    %c0_i32_0 = arith.constant 0 : i32
    %c0_i32_1 = arith.constant 0 : i32
    return %c0_i32, %c0_i32_0 : i32, i32
  }
  func.func @transform_2(%arg0: i32, %arg1: i32) -> (i32, i32) {
    %c0_i32 = arith.constant 0 : i32
    %c0_i32_0 = arith.constant 0 : i32
    %c0_i32_1 = arith.constant 0 : i32
    return %c0_i32, %c0_i32_0 : i32, i32
  }
  func.func @transform_3(%arg0: i32, %arg1: i32) -> (i32, i32) {
    %c0_i32 = arith.constant 0 : i32
    %c0_i32_0 = arith.constant 0 : i32
    return %c0_i32, %arg1 : i32, i32
  }
  func.func @transform_4(%arg0: i32, %arg1: i32) -> (i32, i32) {
    %c0_i32 = arith.constant 0 : i32
    %c0_i32_0 = arith.constant 0 : i32
    return %c0_i32, %arg1 : i32, i32
  }
  func.func @transform_5(%arg0: i32, %arg1: i32) -> (i32, i32) {
    %c0_i32 = arith.constant 0 : i32
    return %arg0, %arg1 : i32, i32
  }
}

module attributes {stable_mosaic.version = 11 : i64} {
  func.func @_fused_matmul_kernel(%arg0: i32, %arg1: i32, %arg2: memref<16x64xbf16, #tpu.memory_space<vmem>>, %arg3: memref<1x64xf32, #tpu.memory_space<vmem>>, %arg4: memref<1x64xf32, #tpu.memory_space<vmem>>, %arg5: memref<64x32xbf16, #tpu.memory_space<vmem>>, %arg6: memref<1x32xf32, #tpu.memory_space<vmem>>, %arg7: memref<16x32xf32, #tpu.memory_space<vmem>>, %arg8: memref<16x32xf32, #tpu.memory_space<vmem>>) attributes {dimension_semantics = [#tpu.dimension_semantics<parallel>, #tpu.dimension_semantics<parallel>], iteration_bounds = array<i64: 1, 1>, scalar_prefetch = 0 : i64, scratch_operands = 0 : i64, tpu.core_type = #tpu.core_type<tc>, window_params = [{transform_indices = @transform_0, window_bounds = array<i64: 16, 64>}, {pipeline_mode = #tpu.pipeline_mode<synchronous>, transform_indices = @transform_1, window_bounds = array<i64: 1, 64>}, {pipeline_mode = #tpu.pipeline_mode<synchronous>, transform_indices = @transform_2, window_bounds = array<i64: 1, 64>}, {transform_indices = @transform_3, window_bounds = array<i64: 64, 32>}, {transform_indices = @transform_4, window_bounds = array<i64: 1, 32>}, {transform_indices = @transform_5, window_bounds = array<i64: 16, 32>}, {transform_indices = @transform_6, window_bounds = array<i64: 16, 32>}]} {
    %c0 = arith.constant 0 : index
    %c0_0 = arith.constant 0 : index
    %0 = vector.load %arg2[%c0, %c0_0] : memref<16x64xbf16, #tpu.memory_space<vmem>>, vector<16x64xbf16>
    %1 = arith.extf %0 : vector<16x64xbf16> to vector<16x64xf32>
    %cst = arith.constant dense<0.000000e+00> : vector<16xf32>
    %2 = vector.multi_reduction <add>, %1, %cst [1] : vector<16x64xf32> to vector<16xf32>
    %3 = vector.shape_cast %2 : vector<16xf32> to vector<16x1xf32>
    %cst_1 = arith.constant 6.400000e+01 : f32
    %4 = vector.broadcast %cst_1 : f32 to vector<16x1xf32>
    %5 = arith.divf %3, %4 : vector<16x1xf32>
    %6 = vector.broadcast %5 : vector<16x1xf32> to vector<16x64xf32>
    %7 = arith.subf %1, %6 : vector<16x64xf32>
    %8 = arith.mulf %7, %7 : vector<16x64xf32>
    %cst_2 = arith.constant dense<0.000000e+00> : vector<16xf32>
    %9 = vector.multi_reduction <add>, %8, %cst_2 [1] : vector<16x64xf32> to vector<16xf32>
    %10 = vector.shape_cast %9 : vector<16xf32> to vector<16x1xf32>
    %cst_3 = arith.constant 6.400000e+01 : f32
    %11 = vector.broadcast %cst_3 : f32 to vector<16x1xf32>
    %12 = arith.divf %10, %11 : vector<16x1xf32>
    %13 = vector.broadcast %5 : vector<16x1xf32> to vector<16x64xf32>
    %14 = arith.subf %1, %13 : vector<16x64xf32>
    %cst_4 = arith.constant 9.99999974E-6 : f32
    %15 = vector.broadcast %cst_4 : f32 to vector<16x1xf32>
    %16 = arith.addf %12, %15 : vector<16x1xf32>
    %17 = math.rsqrt %16 : vector<16x1xf32>
    %18 = vector.broadcast %17 : vector<16x1xf32> to vector<16x64xf32>
    %19 = arith.mulf %14, %18 : vector<16x64xf32>
    %c0_5 = arith.constant 0 : index
    %c0_6 = arith.constant 0 : index
    %20 = vector.load %arg3[%c0_5, %c0_6] : memref<1x64xf32, #tpu.memory_space<vmem>>, vector<1x64xf32>
    %21 = vector.broadcast %20 : vector<1x64xf32> to vector<16x64xf32>
    %22 = arith.mulf %19, %21 : vector<16x64xf32>
    %c0_7 = arith.constant 0 : index
    %c0_8 = arith.constant 0 : index
    %23 = vector.load %arg4[%c0_7, %c0_8] : memref<1x64xf32, #tpu.memory_space<vmem>>, vector<1x64xf32>
    %24 = vector.broadcast %23 : vector<1x64xf32> to vector<16x64xf32>
    %25 = arith.addf %22, %24 : vector<16x64xf32>
    %26 = arith.truncf %25 : vector<16x64xf32> to vector<16x64xbf16>
    %c0_9 = arith.constant 0 : index
    %c0_10 = arith.constant 0 : index
    %27 = vector.load %arg5[%c0_9, %c0_10] : memref<64x32xbf16, #tpu.memory_space<vmem>>, vector<64x32xbf16>
    %cst_11 = arith.constant dense<0.000000e+00> : vector<16x32xf32>
    %28 = tpu.matmul %26, %27, %cst_11 {dimension_numbers = #tpu.dot_dimension_numbers<[1], [0], [0], [1], [0, 0, 1, 1], [], []>} : vector<16x64xbf16>, vector<64x32xbf16>, vector<16x32xf32> -> vector<16x32xf32>
    %c0_12 = arith.constant 0 : index
    %c0_13 = arith.constant 0 : index
    %29 = vector.load %arg6[%c0_12, %c0_13] : memref<1x32xf32, #tpu.memory_space<vmem>>, vector<1x32xf32>
    %30 = vector.broadcast %29 : vector<1x32xf32> to vector<16x32xf32>
    %31 = arith.addf %28, %30 : vector<16x32xf32>
    %c0_14 = arith.constant 0 : index
    %c0_15 = arith.constant 0 : index
    %32 = vector.load %arg7[%c0_14, %c0_15] : memref<16x32xf32, #tpu.memory_space<vmem>>, vector<16x32xf32>
    %33 = arith.addf %31, %32 : vector<16x32xf32>
    %c0_16 = arith.constant 0 : index
    %c0_17 = arith.constant 0 : index
    %34 = vector.load %arg8[%c0_16, %c0_17] : memref<16x32xf32, #tpu.memory_space<vmem>>, vector<16x32xf32>
    tpu.vector_store %arg8[%c0_16, %c0_17], %33 {strides = array<i32>} : memref<16x32xf32, #tpu.memory_space<vmem>>, vector<16x32xf32>,
    return
  }
  func.func @transform_0(%arg0: i32, %arg1: i32) -> (i32, i32) {
    %c0_i32 = arith.constant 0 : i32
    %c0_i32_0 = arith.constant 0 : i32
    return %arg0, %c0_i32 : i32, i32
  }
  func.func @transform_1(%arg0: i32, %arg1: i32) -> (i32, i32) {
    %c0_i32 = arith.constant 0 : i32
    %c0_i32_0 = arith.constant 0 : i32
    %c0_i32_1 = arith.constant 0 : i32
    return %c0_i32, %c0_i32_0 : i32, i32
  }
  func.func @transform_2(%arg0: i32, %arg1: i32) -> (i32, i32) {
    %c0_i32 = arith.constant 0 : i32
    %c0_i32_0 = arith.constant 0 : i32
    %c0_i32_1 = arith.constant 0 : i32
    return %c0_i32, %c0_i32_0 : i32, i32
  }
  func.func @transform_3(%arg0: i32, %arg1: i32) -> (i32, i32) {
    %c0_i32 = arith.constant 0 : i32
    %c0_i32_0 = arith.constant 0 : i32
    return %c0_i32, %arg1 : i32, i32
  }
  func.func @transform_4(%arg0: i32, %arg1: i32) -> (i32, i32) {
    %c0_i32 = arith.constant 0 : i32
    %c0_i32_0 = arith.constant 0 : i32
    return %c0_i32, %arg1 : i32, i32
  }
  func.func @transform_5(%arg0: i32, %arg1: i32) -> (i32, i32) {
    %c0_i32 = arith.constant 0 : i32
    return %arg0, %arg1 : i32, i32
  }
  func.func @transform_6(%arg0: i32, %arg1: i32) -> (i32, i32) {
    %c0_i32 = arith.constant 0 : i32
    return %arg0, %arg1 : i32, i32
  }
}

</mosaic_0001>

<bundles_post_ra>
// kernel: decoder_layer.12
= control target key start
LH: loop header
LB: loop body
LE: loop exit
PB: predicated region body
PF: predicated region fallthrough
CT: control target
= control target key end

     0   :  { %vm23_vm0 = vcmask 261120   ;;  %v181_v15 = vmov 0.0   ;;  %vm182_vm1 = vmmov 0   ;;  %vm145_vm2 = vcmask 257024   ;;  %s245_s0 = inlined_call_operand.vmem [shape: f32[16,32], index: 0, kind: input, shape index: {}]   ;;  %s246_s3 = inlined_call_operand.vmem [shape: bf16[32,32], index: 3, kind: input, shape index: {}]   ;;  %s247_s1 = inlined_call_operand.vmem [shape: f32[1,32], index: 1, kind: input, shape index: {}]   ;;  %s248_s2 = inlined_call_operand.vmem [shape: f32[1,32], index: 2, kind: input, shape index: {}]   ;;  %s249_s4 = inlined_call_operand.vmem [shape: f32[1,32], index: 4, kind: input, shape index: {}]   ;;  %s250_s5 = inlined_call_operand.vmem [shape: bf16[16,32], index: 5, kind: output, shape index: {}]  }
   0x1   :  { %v21_v0 = vld [vmem:[%s245_s0] sm:$0xff]  ;;  %v22_v1 = vld [vmem:[%s245_s0 + $0x8] sm:$0xff]  ;;  %165 = vmatprep.subr.bf16.mxu0 %v181_v15  ;;  %169 = vmatprep.mubr.msk.bf16.mxu0 %vm182_vm1, %v181_v15 }
   0x2   :  { %v24_v2 = vsel %vm23_vm0, %v21_v0, 0.0  ;;  %v27_v3 = vsel %vm23_vm0, %v22_v1, 0.0  ;;  %v175_v14 = vld [vmem:[%s246_s3] sm:$0xff]   ;;  %v176_v16 = vld [vmem:[%s246_s3 + $0x8] sm:$0xff]  }
   0x3   :  { %25 = vadd.xlane.f32.xlu0 %v24_v2  ;;  %166 = vmatpush3.bf16.msra.mxu0 %v175_v14  ;;  %v152_v25 = vld [vmem:[%s247_s1] ss:$0 sm:$0xff] }
   0x4   :  { %167 = vmatprep.subr.bf16.mxu0 %v181_v15  ;;  %v153_v29 = vld [vmem:[%s248_s2] ss:$0 sm:$0xff] }
   0x5   :  { %v154_v34 = vld [vmem:[%s249_s4] ss:$0 sm:$0xff] }
   0x7   :  { %28 = vadd.xlane.f32.xlu0 %v27_v3  ;;  %168 = vmatpush3.bf16.msra.mxu0 %v176_v16 }
  0x90   :  { %v26_v4 = vpop.xlane.xlu0 %25 }
  0x91   :  { %v31_v5 = vmul.f32 0.03125, %v26_v4 }
  0x93   :  { %v33_v6 = vsub.f32 %v21_v0, %v31_v5 }
  0x94   :  { %v29_v7 = vpop.xlane.xlu0 %28 }
  0x95   :  { %v32_v8 = vmul.f32 0.03125, %v29_v7  ;;  %v35_v9 = vmul.f32 %v33_v6, %v33_v6 }
  0x97   :  { %v34_v10 = vsub.f32 %v22_v1, %v32_v8  ;;  %v37_v11 = vsel %vm23_vm0, %v35_v9, 0.0 }
  0x98   :  { %38 = vadd.xlane.f32.xlu1 %v37_v11 }
  0x99   :  { %v36_v12 = vmul.f32 %v34_v10, %v34_v10 }
  0x9b   :  { %v40_v13 = vsel %vm23_vm0, %v36_v12, 0.0 }
  0x9c   :  { %41 = vadd.xlane.f32.xlu1 %v40_v13 }
 0x125   :  { %v39_v17 = vpop.xlane.xlu1 %38 }
 0x126   :  { %v43_v18 = vmul.f32 0.03125, %v39_v17 }
 0x128   :  { %v45_v19 = vadd.f32 1e-05, %v43_v18 }
 0x129   :  { %v42_v20 = vpop.xlane.xlu1 %41 }
 0x12a   :  { %177 = vrsqrt.f32 %v45_v19  ;;  %v44_v21 = vmul.f32 0.03125, %v42_v20 }
 0x12c   :  { %v46_v22 = vadd.f32 1e-05, %v44_v21 }
 0x12e   :  { %179 = vrsqrt.f32 %v46_v22 }
 0x134   :  { %v178_v23 = vpop.eup %177 }
 0x135   :  { %v49_v24 = vmul.f32 %v178_v23, %v33_v6 }
 0x137   :  { %v58_v28 = vmul.f32 %v152_v25, %v49_v24 }
 0x138   :  { %v180_v26 = vpop.eup %179 }
 0x139   :  { %v50_v27 = vmul.f32 %v180_v26, %v34_v10  ;;  %v67_v31 = vadd.f32 %v153_v29, %v58_v28 }
 0x13b   :  { %v59_v30 = vmul.f32 %v152_v25, %v50_v27 }
 0x13d   :  { %v68_v32 = vadd.f32 %v153_v29, %v59_v30 }
 0x13f   :  { %v69_v33 = vpack.c.bf16 %v68_v32, %v67_v31 }
 0x141   :  { %170 = vmatmul.mubr.msk.bf16.vlgmr.msra.gmra.mrb[0].mxu0 %vm23_vm0, %v69_v33 }
 0x214   :  { %v130_v35 = vpop.f32.mrb[0].mxu0 }
 0x215   :  { %v131_v36 = vadd.f32 %v154_v34, %v130_v35  ;;  %v171_v37 = vpop.f32.mrb[1].mxu0 }
 0x216   :  { %v133_v38 = vpop.f32.mrb[2].mxu0 }
 0x217   :  { %v160_v39 = vpack.c.bf16 %v131_v36, %v131_v36  ;;  %v134_v40 = vadd.f32 %v154_v34, %v133_v38  ;;  %v172_v41 = vpop.f32.mrb[3].mxu0 }
 0x219   :  { %146 = vst.msk [vmem:[%s250_s5] sm:$0xf] %vm145_vm2, %v160_v39  ;;  %v161_v42 = vpack.c.bf16 %v134_v40, %v134_v40 }
 0x21b   :  { %147 = vst.msk [vmem:[%s250_s5 + $0x4] sm:$0xf] %vm145_vm2, %v161_v42 }

// kernel: decoder_layer.11
= control target key start
LH: loop header
LB: loop body
LE: loop exit
PB: predicated region body
PF: predicated region fallthrough
CT: control target
= control target key end

     0   :  { %v124_v0 = vmov 0.0   ;;  %vm125_vm0 = vmmov 0   ;;  %vm48_vm1 = vcmask 261120   ;;  %s178_s1 = inlined_call_operand.vmem [shape: bf16[32,32], index: 1, kind: input, shape index: {}]   ;;  %s179_s0 = inlined_call_operand.vmem [shape: bf16[16,32], index: 0, kind: input, shape index: {}]   ;;  %s180_s2 = inlined_call_operand.vmem [shape: f32[1,32], index: 2, kind: input, shape index: {}]   ;;  %s181_s3 = inlined_call_operand.vmem [shape: f32[16,32], index: 3, kind: input, shape index: {}]   ;;  %s182_s4 = inlined_call_operand.vmem [shape: f32[16,32], index: 4, kind: output, shape index: {}]  }
   0x1   :  { %111 = vmatprep.subr.bf16.mxu0 %v124_v0  ;;  %v121_v1 = vld [vmem:[%s178_s1] sm:$0xff]   ;;  %115 = vmatprep.mubr.msk.bf16.mxu0 %vm125_vm0, %v124_v0  ;;  %v122_v2 = vld [vmem:[%s178_s1 + $0x8] sm:$0xff]  }
   0x2   :  { %112 = vmatpush3.bf16.msra.mxu0 %v121_v1  ;;  %v123_v3 = vld [vmem:[%s179_s0] sm:$0xff]   ;;  %v94_v10 = vld [vmem:[%s181_s3 + $0x8] sm:$0xff] }
   0x3   :  { %113 = vmatprep.subr.bf16.mxu0 %v124_v0  ;;  %v103_v4 = vld [vmem:[%s180_s2] ss:$0 sm:$0xff] }
   0x4   :  { %v93_v6 = vld [vmem:[%s181_s3] sm:$0xff] }
   0x6   :  { %114 = vmatpush3.bf16.msra.mxu0 %v122_v2 }
   0x9   :  { %116 = vmatmul.mubr.msk.bf16.vlgmr.msra.gmra.mrb[0].mxu0 %vm48_vm1, %v123_v3 }
  0xdc   :  { %v86_v5 = vpop.f32.mrb[0].mxu0 }
  0xdd   :  { %v87_v7 = vadd.f32 %v103_v4, %v86_v5  ;;  %v117_v8 = vpop.f32.mrb[1].mxu0 }
  0xde   :  { %v89_v9 = vpop.f32.mrb[2].mxu0 }
  0xdf   :  { %v95_v11 = vadd.f32 %v93_v6, %v87_v7  ;;  %v90_v12 = vadd.f32 %v103_v4, %v89_v9  ;;  %v118_v13 = vpop.f32.mrb[3].mxu0 }
  0xe1   :  { %97 = vst.msk [vmem:[%s182_s4] sm:$0xff] %vm48_vm1, %v95_v11  ;;  %v96_v14 = vadd.f32 %v94_v10, %v90_v12 }
  0xe3   :  { %98 = vst.msk [vmem:[%s182_s4 + $0x8] sm:$0xff] %vm48_vm1, %v96_v14 }

// kernel: decoder_layer.9
= control target key start
LH: loop header
LB: loop body
LE: loop exit
PB: predicated region body
PF: predicated region fallthrough
CT: control target
= control target key end

     0   :  { %vm23_vm0 = vcmask 261120   ;;  %v181_v15 = vmov 0.0   ;;  %vm182_vm1 = vmmov 0   ;;  %vm145_vm2 = vcmask 519168   ;;  %s245_s0 = inlined_call_operand.vmem [shape: f32[16,32], index: 0, kind: input, shape index: {}]   ;;  %s246_s3 = inlined_call_operand.vmem [shape: bf16[32,64], index: 3, kind: input, shape index: {}]   ;;  %s247_s1 = inlined_call_operand.vmem [shape: f32[1,32], index: 1, kind: input, shape index: {}]   ;;  %s248_s2 = inlined_call_operand.vmem [shape: f32[1,32], index: 2, kind: input, shape index: {}]   ;;  %s249_s4 = inlined_call_operand.vmem [shape: f32[1,64], index: 4, kind: input, shape index: {}]   ;;  %s250_s5 = inlined_call_operand.vmem [shape: bf16[16,64], index: 5, kind: output, shape index: {}]  }
   0x1   :  { %v21_v0 = vld [vmem:[%s245_s0] sm:$0xff]  ;;  %v22_v1 = vld [vmem:[%s245_s0 + $0x8] sm:$0xff]  ;;  %165 = vmatprep.subr.bf16.mxu0 %v181_v15  ;;  %169 = vmatprep.mubr.msk.bf16.mxu0 %vm182_vm1, %v181_v15 }
   0x2   :  { %v24_v2 = vsel %vm23_vm0, %v21_v0, 0.0  ;;  %v27_v3 = vsel %vm23_vm0, %v22_v1, 0.0  ;;  %v175_v14 = vld [vmem:[%s246_s3] sm:$0xff]   ;;  %v176_v16 = vld [vmem:[%s246_s3 + $0x8] sm:$0xff]  }
   0x3   :  { %25 = vadd.xlane.f32.xlu0 %v24_v2  ;;  %166 = vmatpush3.bf16.msra.mxu0 %v175_v14  ;;  %v152_v25 = vld [vmem:[%s247_s1] ss:$0 sm:$0xff] }
   0x4   :  { %167 = vmatprep.subr.bf16.mxu0 %v181_v15  ;;  %v153_v29 = vld [vmem:[%s248_s2] ss:$0 sm:$0xff] }
   0x5   :  { %v154_v34 = vld [vmem:[%s249_s4] ss:$0 sm:$0xff] }
   0x7   :  { %28 = vadd.xlane.f32.xlu0 %v27_v3  ;;  %168 = vmatpush3.bf16.msra.mxu0 %v176_v16 }
  0x90   :  { %v26_v4 = vpop.xlane.xlu0 %25 }
  0x91   :  { %v31_v5 = vmul.f32 0.03125, %v26_v4 }
  0x93   :  { %v33_v6 = vsub.f32 %v21_v0, %v31_v5 }
  0x94   :  { %v29_v7 = vpop.xlane.xlu0 %28 }
  0x95   :  { %v32_v8 = vmul.f32 0.03125, %v29_v7  ;;  %v35_v9 = vmul.f32 %v33_v6, %v33_v6 }
  0x97   :  { %v34_v10 = vsub.f32 %v22_v1, %v32_v8  ;;  %v37_v11 = vsel %vm23_vm0, %v35_v9, 0.0 }
  0x98   :  { %38 = vadd.xlane.f32.xlu1 %v37_v11 }
  0x99   :  { %v36_v12 = vmul.f32 %v34_v10, %v34_v10 }
  0x9b   :  { %v40_v13 = vsel %vm23_vm0, %v36_v12, 0.0 }
  0x9c   :  { %41 = vadd.xlane.f32.xlu1 %v40_v13 }
 0x125   :  { %v39_v17 = vpop.xlane.xlu1 %38 }
 0x126   :  { %v43_v18 = vmul.f32 0.03125, %v39_v17 }
 0x128   :  { %v45_v19 = vadd.f32 1e-05, %v43_v18 }
 0x129   :  { %v42_v20 = vpop.xlane.xlu1 %41 }
 0x12a   :  { %177 = vrsqrt.f32 %v45_v19  ;;  %v44_v21 = vmul.f32 0.03125, %v42_v20 }
 0x12c   :  { %v46_v22 = vadd.f32 1e-05, %v44_v21 }
 0x12e   :  { %179 = vrsqrt.f32 %v46_v22 }
 0x134   :  { %v178_v23 = vpop.eup %177 }
 0x135   :  { %v49_v24 = vmul.f32 %v178_v23, %v33_v6 }
 0x137   :  { %v58_v28 = vmul.f32 %v152_v25, %v49_v24 }
 0x138   :  { %v180_v26 = vpop.eup %179 }
 0x139   :  { %v50_v27 = vmul.f32 %v180_v26, %v34_v10  ;;  %v67_v31 = vadd.f32 %v153_v29, %v58_v28 }
 0x13b   :  { %v59_v30 = vmul.f32 %v152_v25, %v50_v27 }
 0x13d   :  { %v68_v32 = vadd.f32 %v153_v29, %v59_v30 }
 0x13f   :  { %v69_v33 = vpack.c.bf16 %v68_v32, %v67_v31 }
 0x141   :  { %170 = vmatmul.mubr.msk.bf16.vlgmr.msra.gmra.mrb[0].mxu0 %vm23_vm0, %v69_v33 }
 0x214   :  { %v130_v35 = vpop.f32.mrb[0].mxu0 }
 0x215   :  { %v131_v36 = vadd.f32 %v154_v34, %v130_v35  ;;  %v171_v37 = vpop.f32.mrb[1].mxu0 }
 0x216   :  { %v133_v38 = vpop.f32.mrb[2].mxu0 }
 0x217   :  { %v160_v39 = vpack.c.bf16 %v131_v36, %v131_v36  ;;  %v134_v40 = vadd.f32 %v154_v34, %v133_v38  ;;  %v172_v41 = vpop.f32.mrb[3].mxu0 }
 0x219   :  { %146 = vst.msk [vmem:[%s250_s5] sm:$0xf] %vm145_vm2, %v160_v39  ;;  %v161_v42 = vpack.c.bf16 %v134_v40, %v134_v40 }
 0x21b   :  { %147 = vst.msk [vmem:[%s250_s5 + $0x4] sm:$0xf] %vm145_vm2, %v161_v42 }

// kernel: decoder_layer.10
= control target key start
LH: loop header
LB: loop body
LE: loop exit
PB: predicated region body
PF: predicated region fallthrough
CT: control target
= control target key end

     0   :  { %s1115_s9 = smov 0   ;;  %s1117_s10 = smov 0   ;;  %s1284_s0 = inlined_call_operand.vmem [shape: bf16[16,64], index: 0, kind: input, shape index: {}, may-alias: {0,1}]   ;;  %s1285_s1 = inlined_call_operand.vmem [shape: bf16[16,64], index: 1, kind: input, shape index: {}, may-alias: {0,1}]   ;;  %s1286_s2 = inlined_call_operand.vmem [shape: bf16[16,32], index: 2, kind: output, shape index: {}]  }
   0x1   :  { %s1119_s11 = smov 0  }
   0x2 LB: > { %s31_s12 = sadd.s32 1, %s1080_s10  ;;  %p916_p0 = scmp.ge.s32.totalorder %s1084_s11, 1  ;;  %s1084_s11 = sphi %s1119_s11, %s12_s11   ;;  %s1080_s10 = sphi %s1117_s10, %s1288_s10   ;;  %s1076_s9 = sphi %s1115_s9, %s1287_s9  }
   0x3   : > { %p33_p1 = scmp.ge.s32.totalorder %s31_s12, 2  ;;  %p149_p2 = scmp.lt.s32.totalorder %s1084_s11, 3 }
   0x5   : > { %s1290_s12 = smov (%p33_p1, %s31_s12), 0  ;;  %p150_p3 = pnand %p916_p0, %p149_p2 }
   0x6   : > { %p177_p4 = scmp.lt.s32.totalorder (!%p150_p3), %s1076_s9, 1  ;;  %v1086_v0 = vmov (!%p150_p3), 0.0   ;;  %vm1087_vm0 = vmmov (!%p150_p3), 0   ;;  %vm235_vm1 = vcmask (!%p150_p3), 64512   ;;  %s1088_s20 = smov (!%p150_p3), 96   ;;  %vm199_vm2 = vcmask (!%p150_p3), 7168  }
   0x7   : > { %153 = sbr.rel (%p150_p3) target bundleno = 1555 (0x613), region = 28  ;;  %948 = vmatprep.subr.bf16.mxu0 (!%p150_p3), %v1086_v0  ;;  %950 = vmatprep.mubr.msk.bf16.mxu0 (!%p150_p3), %vm1087_vm0, %v1086_v0  ;;  %v1089_v5 = vmov (!%p150_p3), -inf   ;;  %204 = vst.msk [vmem:[#allocation3] sm:$0xff] (!%p150_p3), %vm199_vm2, %v1086_v0  ;;  %205 = vst.msk [vmem:[#allocation3 + $0x8] sm:$0xff] (!%p150_p3), %vm199_vm2, %v1086_v0  ;;  %v221_v6 = vlaneseq (!%p150_p3)  ;;  %v1090_v16 = vmov (!%p150_p3), 0   ;;  %s1091_s21 = smov (!%p150_p3), 112  }
   0x8   : > { %954 = vmatprep.subr.bf16.mxu1 (!%p150_p3), %v1086_v0  ;;  %956 = vmatprep.mubr.msk.bf16.mxu1 (!%p150_p3), %vm1087_vm0, %v1086_v0  ;;  %200 = vst.msk [vmem:[#allocation2] sm:$0xff] (!%p150_p3), %vm199_vm2, %v1089_v5  ;;  %201 = vst.msk [vmem:[#allocation2 + $0x8] sm:$0xff] (!%p150_p3), %vm199_vm2, %v1089_v5  ;;  %s1092_s22 = smov (!%p150_p3), 88   ;;  %s1093_s23 = smov (!%p150_p3), 120   ;;  %vm317_vm4 = vcmask (!%p150_p3), 1043456   ;;  %vm208_vm5 = vcmask (!%p150_p3), 261120  }
   0x9   : > { %202 = vst.msk [vmem:[#allocation2 + $0x10] sm:$0xff] (!%p150_p3), %vm199_vm2, %v1089_v5  ;;  %203 = vst.msk [vmem:[#allocation2 + $0x18] sm:$0xff] (!%p150_p3), %vm199_vm2, %v1089_v5  ;;  %v1169_v7 = vshrl.u32 (!%p150_p3), %v221_v6, 7  ;;  %v1171_v8 = vand.u32 (!%p150_p3), 127, %v221_v6  ;;  %1034 = vset.pattern.permute.xlu1 (!%p150_p3), %v1090_v16  ;;  %1035 = vset.pattern.permute.xlu0 (!%p150_p3), %v1090_v16  ;;  %s1094_s24 = smov (!%p150_p3), 80   ;;  %s1095_s25 = smov (!%p150_p3), 72  }
   0xa   : > { %206 = vst.msk [vmem:[#allocation3 + $0x10] sm:$0xff] (!%p150_p3), %vm199_vm2, %v1086_v0  ;;  %207 = vst.msk [vmem:[#allocation3 + $0x18] sm:$0xff] (!%p150_p3), %vm199_vm2, %v1086_v0  ;;  %s1096_s26 = smov (!%p150_p3), 104   ;;  %s1097_s27 = smov (!%p150_p3), 8   ;;  %vm499_vm6 = vcmask (!%p150_p3), 130112   ;;  %vm640_vm7 = vcmask (!%p150_p3), 195712  }
   0xb   : > { %vm229_vm3 = vcmp.le.s32.totalorder (!%p150_p3), %v1171_v8, %v1169_v7  ;;  %209 = vst.msk [vmem:[#allocation4] sm:$0xff] (!%p150_p3), %vm208_vm5, %v1086_v0  ;;  %s1098_s28 = smov (!%p150_p3), 16   ;;  %s1099_s29 = smov (!%p150_p3), 24   ;;  %vm771_vm8 = vcmask (!%p150_p3), 261312   ;;  %vm830_vm9 = vcmask (!%p150_p3), 257024  }
   0xe   : > { %s1292_s9 = smov (!%p177_p4, %s1076_s9), 1 }
   0xf   : > { %s1139_s13 = sshll.u32 %s1292_s9, 2  ;;  %v1179_v17 = vld [vmem:[#allocation2] sm:$0xff]  ;;  %v419_v60 = vld [vmem:[#allocation2 + $0x8] sm:$0xff] }
  0x10   : > { %s180_s16 = scalar_lea.vmem %s1284_s0, %s1139_s13  ;;  %s186_s19 = scalar_lea.vmem %s1285_s1, %s1139_s13  ;;  %v1237_v6 = vld [vmem:[#allocation2 + $0x18] sm:$0xff] }
  0x11   : > { %v1036_v1 = vld [vmem:[%s180_s16] ss:$0 sps:$4 sm:$0xff]   ;;  %s192_s4 = scalar_lea.vmem %s1286_s2, %s1139_s13 }
  0x12   : > { %v219_v2 = vld [vmem:[%s186_s19] sm:$0xf]  ;;  %233 = vrot.lane.b32.xlu0 %v1036_v1, %s1088_s20 }
  0x13   : > { %v1150_v3 = vsel %vm235_vm1, %v219_v2, 0  ;;  %v1184_v20 = vcombine.low %v219_v2, %v219_v2  ;;  %v555_v2 = vld [vmem:[#allocation2 + $0x10] sm:$0xff] }
  0x14   : > { %949 = vmatpush3.bf16.xpose.msra.mxu0 %v1150_v3 }
  0x15   : > { %966 = vmatprep.subr.bf16.mxu0 %v1086_v0 }
  0x84   : > { %v234_v4 = vpop.permute.xlu0 %233 }
  0x85   : > { %951 = vmatmul.mubr.msk.bf16.vlgmr.msra.gmra.mrb[0].mxu0 %vm235_vm1, %v234_v4 }
  0x86   : > { %968 = vmatprep.mubr.msk.bf16.mxu0 %vm1087_vm0, %v1086_v0 }
 0x158   : > { %v276_v9 = vpop.f32.mrb[0].mxu0 }
 0x159   : > { %v282_v10 = vmul.f32 0.35355338, %v276_v9  ;;  %v952_v11 = vpop.f32.mrb[1].mxu0 }
 0x15a   : > { %v279_v12 = vpop.f32.mrb[2].mxu0 }
 0x15b   : > { %v953_v13 = vpop.f32.mrb[3].mxu0  ;;  %v283_v14 = vsel %vm229_vm3, %v282_v10, -1e+30 }
 0x15c   : > { %v285_v15 = vsel %vm235_vm1, %v283_v14, -inf  ;;  %v361_v13 = vld [vmem:[#allocation4] sm:$0xff] }
 0x15d   : > { %286 = vmax.xlane.f32.xlu0 %v285_v15 }
 0x1ea   : > { %v287_v18 = vpop.xlane.xlu0 %286 }
 0x1eb   : > { %v1182_v19 = vmax.f32 %v1179_v17, %v287_v18 }
 0x1ed   : > { %v289_v21 = vsub.f32 %v1179_v17, %v1182_v19  ;;  %370 = vst.msk [vmem:[#allocation2] sm:$0xff] %vm199_vm2, %v1182_v19  ;;  %294 = vperm.xlu1 %1034, %v1182_v19  }
 0x1ef   : > { %v290_v59 = vmul.f32 1.442695, %v289_v21 }
 0x1f1   : > { %312 = vrot.lane.b32.xlu1 %v1184_v20, %s1091_s21 }
 0x1f5   : > { %371 = vrot.lane.b32.xlu1 %v1036_v1, %s1092_s22 }
 0x1f9   : > { %504 = vrot.lane.b32.xlu1 %v1184_v20, %s1093_s23 }
 0x1fd   : > { %502 = vrot.lane.b32.xlu1 %v1036_v1, %s1094_s24 }
 0x201   : > { %643 = vrot.lane.b32.xlu1 %v1036_v1, %s1095_s25 }
 0x26c   : > { %v295_v22 = vpop.permute.xlu1 %294 }
 0x26d   : > { %v297_v23 = vsub.f32 %v283_v14, %v295_v22 }
 0x26f   : > { %v298_v24 = vmul.f32 1.442695, %v297_v23 }
 0x270   : > { %v313_v25 = vpop.permute.xlu1 %312 }
 0x271   : > { %1038 = vpow2.f32 %v298_v24  ;;  %v319_v26 = vsel %vm317_vm4, %v313_v25, 0 }
 0x272   : > { %955 = vmatpush3.bf16.msra.mxu1 %v319_v26  ;;  %967 = vmatpush3.bf16.msra.mxu0 %v319_v26  ;;  %1040 = vpow2.f32 %v290_v59 }
 0x273   : > { %960 = vmatprep.subr.bf16.mxu1 %v1086_v0  ;;  %978 = vmatprep.subr.bf16.mxu0 %v1086_v0 }
 0x274   : > { %v372_v28 = vpop.permute.xlu1 %371 }
 0x278   : > { %v505_v30 = vpop.permute.xlu1 %504 }
 0x279   : > { %v510_v31 = vsel %vm235_vm1, %v505_v30, 0 }
 0x27b   : > { %v1196_v27 = vpop.eup %1038 }
 0x27c   : > { %v308_v29 = vpack.c.bf16 %v1196_v27, %v1196_v27  ;;  %v503_v32 = vpop.permute.xlu1 %502  ;;  %v1233_v1 = vpop.eup %1040  ;;  %v302_v10 = vsel %vm235_vm1, %v1196_v27, 0.0 }
 0x27e   : > { %957 = vmatmul.mubr.msk.bf16.vlgmr.msra.gmra.mrb[0].mxu1 %vm235_vm1, %v308_v29 }
 0x27f   : > { %961 = vmatpush3.bf16.xpose.msra.mxu1 %v1150_v3  ;;  %962 = vmatprep.mubr.msk.bf16.mxu1 %vm1087_vm0, %v1086_v0 }
 0x280   : > { %972 = vmatprep.subr.bf16.mxu1 %v1086_v0  ;;  %v644_v33 = vpop.permute.xlu1 %643 }
 0x286   : > { %963 = vmatmul.mubr.msk.bf16.vlgmr.msra.gmra.mrb[4].mxu1 %vm235_vm1, %v372_v28 }
 0x287   : > { %973 = vmatpush3.bf16.xpose.msra.mxu1 %v510_v31  ;;  %974 = vmatprep.mubr.msk.bf16.mxu1 %vm1087_vm0, %v1086_v0 }
 0x288   : > { %984 = vmatprep.subr.bf16.mxu1 %v1086_v0 }
 0x28e   : > { %975 = vmatmul.mubr.msk.bf16.vlgmr.msra.gmra.mrb[8].mxu1 %vm235_vm1, %v503_v32 }
 0x28f   : > { %985 = vmatpush3.bf16.xpose.msra.mxu1 %v510_v31  ;;  %986 = vmatprep.mubr.msk.bf16.mxu1 %vm1087_vm0, %v1086_v0 }
 0x296   : > { %987 = vmatmul.mubr.msk.bf16.vlgmr.msra.gmra.mrb[12].mxu1 %vm235_vm1, %v644_v33 }
 0x351   : > { %v1214_v34 = vpop.f32.mrb[0].mxu1 }
 0x352   : > { %v958_v35 = vpop.f32.mrb[1].mxu1 }
 0x353   : > { %v358_v36 = vpop.f32.mrb[2].mxu1 }
 0x354   : > { %v959_v37 = vpop.f32.mrb[3].mxu1 }
 0x359   : > { %v410_v38 = vpop.f32.mrb[4].mxu1 }
 0x35a   : > { %v416_v39 = vmul.f32 0.35355338, %v410_v38  ;;  %v964_v40 = vpop.f32.mrb[5].mxu1 }
 0x35b   : > { %v413_v41 = vpop.f32.mrb[6].mxu1 }
 0x35c   : > { %v965_v42 = vpop.f32.mrb[7].mxu1  ;;  %v417_v43 = vsel %vm229_vm3, %v416_v39, -1e+30  ;;  %v300_v39 = vld [vmem:[#allocation3] sm:$0xff] }
 0x35d   : > { %v420_v44 = vsel %vm235_vm1, %v417_v43, -inf  ;;  %v301_v40 = vmul.f32 %v1233_v1, %v300_v39 }
 0x35e   : > { %421 = vmax.xlane.f32.xlu1 %v420_v44 }
 0x361   : > { %v546_v45 = vpop.f32.mrb[8].mxu1 }
 0x362   : > { %v552_v46 = vmul.f32 0.35355338, %v546_v45  ;;  %v976_v47 = vpop.f32.mrb[9].mxu1 }
 0x363   : > { %v549_v48 = vpop.f32.mrb[10].mxu1  ;;  %v572_v47 = vld [vmem:[#allocation3 + $0x10] sm:$0xff] }
 0x364   : > { %v977_v49 = vpop.f32.mrb[11].mxu1  ;;  %v553_v50 = vsel %vm229_vm3, %v552_v46, -1e+30 }
 0x365   : > { %v556_v51 = vsel %vm235_vm1, %v553_v50, -inf }
 0x366   : > { %557 = vmax.xlane.f32.xlu0 %v556_v51 }
 0x369   : > { %v682_v52 = vpop.f32.mrb[12].mxu1 }
 0x36a   : > { %v688_v53 = vmul.f32 0.35355338, %v682_v52  ;;  %v988_v54 = vpop.f32.mrb[13].mxu1  ;;  %v708_v52 = vld [vmem:[#allocation3 + $0x18] sm:$0xff] }
 0x36b   : > { %v685_v55 = vpop.f32.mrb[14].mxu1 }
 0x36c   : > { %v989_v56 = vpop.f32.mrb[15].mxu1  ;;  %v689_v57 = vsel %vm229_vm3, %v688_v53, -1e+30 }
 0x36d   : > { %v692_v58 = vsel %vm235_vm1, %v689_v57, -inf }
 0x36e   : > { %693 = vmax.xlane.f32.xlu0 %v692_v58 }
 0x3eb   : > { %v422_v61 = vpop.xlane.xlu1 %421 }
 0x3ec   : > { %v423_v62 = vmax.f32 %v419_v60, %v422_v61 }
 0x3ee   : > { %v424_v63 = vsub.f32 %v419_v60, %v423_v62  ;;  %501 = vst.msk [vmem:[#allocation2 + $0x8] sm:$0xff] %vm199_vm2, %v423_v62  ;;  %429 = vperm.xlu0 %1035, %v423_v62  }
 0x3f0   : > { %v425_v32 = vmul.f32 1.442695, %v424_v63 }
 0x3f2   : > { %364 = vperm.xlu0 %1035, %v1233_v1  }
 0x3f3   : > { %v558_v3 = vpop.xlane.xlu0 %557 }
 0x3f4   : > { %v559_v4 = vmax.f32 %v555_v2, %v558_v3 }
 0x3f6   : > { %v560_v5 = vsub.f32 %v555_v2, %v559_v4  ;;  %642 = vst.msk [vmem:[#allocation2 + $0x10] sm:$0xff] %vm199_vm2, %v559_v4  ;;  %565 = vperm.xlu1 %1034, %v559_v4  }
 0x3fb   : > { %v694_v7 = vpop.xlane.xlu0 %693 }
 0x3fc   : > { %v695_v8 = vmax.f32 %v1237_v6, %v694_v7 }
 0x3fe   : > { %v696_v9 = vsub.f32 %v1237_v6, %v695_v8  ;;  %773 = vst.msk [vmem:[#allocation2 + $0x18] sm:$0xff] %vm199_vm2, %v695_v8  ;;  %701 = vperm.xlu1 %1034, %v695_v8  }
 0x402   : > { %580 = vrot.lane.b32.xlu1 %v1184_v20, %s1096_s26 }
 0x426   : > { %303 = vadd.xlane.f32.xlu1 %v302_v10 }
 0x46d   : > { %v430_v11 = vpop.permute.xlu0 %429 }
 0x46e   : > { %v432_v12 = vsub.f32 %v417_v43, %v430_v11  ;;  %v697_v43 = vmul.f32 1.442695, %v696_v9 }
 0x470   : > { %v433_v14 = vmul.f32 1.442695, %v432_v12 }
 0x471   : > { %v365_v15 = vpop.permute.xlu0 %364 }
 0x472   : > { %1042 = vpow2.f32 %v433_v14  ;;  %v367_v16 = vmul.f32 %v365_v15, %v361_v13 }
 0x474   : > { %v368_v17 = vadd.f32 %v367_v16, %v1214_v34  ;;  %v561_v34 = vmul.f32 1.442695, %v560_v5 }
 0x475   : > { %v566_v18 = vpop.permute.xlu1 %565 }
 0x476   : > { %369 = vst.msk [vmem:[#allocation4] sm:$0xff] %vm235_vm1, %v368_v17  ;;  %v568_v19 = vsub.f32 %v553_v50, %v566_v18 }
 0x478   : > { %v569_v21 = vmul.f32 1.442695, %v568_v19 }
 0x47a   : > { %1044 = vpow2.f32 %v569_v21 }
 0x47c   : > { %v1043_v20 = vpop.eup %1042 }
 0x47d   : > { %v702_v22 = vpop.permute.xlu1 %701  ;;  %v438_v23 = vsel %vm235_vm1, %v1043_v20, 0.0  ;;  %v443_v24 = vpack.c.bf16 %v1043_v20, %v1043_v20  ;;  %v487_v14 = vld [vmem:[#allocation4] sm:$0xff] }
 0x47e   : > { %v704_v25 = vsub.f32 %v689_v57, %v702_v22  ;;  %439 = vadd.xlane.f32.xlu0 %v438_v23 }
 0x47f   : > { %969 = vmatmul.mubr.msk.bf16.vlgmr.msra.gmra.mrb[4].mxu0 %vm235_vm1, %v443_v24 }
 0x480   : > { %v705_v26 = vmul.f32 1.442695, %v704_v25  ;;  %980 = vmatprep.mubr.msk.bf16.mxu0 %vm1087_vm0, %v1086_v0 }
 0x481   : > { %v581_v27 = vpop.permute.xlu1 %580 }
 0x482   : > { %1046 = vpow2.f32 %v705_v26  ;;  %v586_v28 = vsel %vm317_vm4, %v581_v27, 0 }
 0x483   : > { %979 = vmatpush3.bf16.msra.mxu0 %v586_v28  ;;  %1048 = vpow2.f32 %v425_v32 }
 0x484   : > { %v1045_v29 = vpop.eup %1044  ;;  %990 = vmatprep.subr.bf16.mxu0 %v1086_v0  ;;  %1050 = vpow2.f32 %v561_v34 }
 0x485   : > { %v574_v30 = vsel %vm235_vm1, %v1045_v29, 0.0  ;;  %v579_v31 = vpack.c.bf16 %v1045_v29, %v1045_v29  ;;  %1052 = vpow2.f32 %v697_v43 }
 0x486   : > { %575 = vadd.xlane.f32.xlu1 %v574_v30 }
 0x487   : > { %981 = vmatmul.mubr.msk.bf16.vlgmr.msra.gmra.mrb[8].mxu0 %vm235_vm1, %v579_v31 }
 0x488   : > { %991 = vmatpush3.bf16.msra.mxu0 %v586_v28  ;;  %992 = vmatprep.mubr.msk.bf16.mxu0 %vm1087_vm0, %v1086_v0  ;;  %v436_v0 = vld [vmem:[#allocation3 + $0x8] sm:$0xff] }
 0x48c   : > { %v1047_v33 = vpop.eup %1046 }
 0x48d   : > { %v710_v35 = vsel %vm235_vm1, %v1047_v33, 0.0  ;;  %v715_v36 = vpack.c.bf16 %v1047_v33, %v1047_v33  ;;  %v1049_v37 = vpop.eup %1048 }
 0x48e   : > { %711 = vadd.xlane.f32.xlu0 %v710_v35  ;;  %v1051_v38 = vpop.eup %1050  ;;  %v437_v44 = vmul.f32 %v1049_v37, %v436_v0 }
 0x48f   : > { %993 = vmatmul.mubr.msk.bf16.vlgmr.msra.gmra.mrb[12].mxu0 %vm235_vm1, %v715_v36  ;;  %v573_v48 = vmul.f32 %v1051_v38, %v572_v47  ;;  %v1053_v51 = vpop.eup %1052 }
 0x490   : > { %v709_v53 = vmul.f32 %v1053_v51, %v708_v52 }
 0x497   : > { %490 = vperm.xlu1 %1034, %v1049_v37  }
 0x49b   : > { %631 = vperm.xlu1 %1034, %v1051_v38  }
 0x4b3   : > { %v304_v41 = vpop.xlane.xlu1 %303 }
 0x4b4   : > { %v305_v42 = vadd.f32 %v304_v41, %v301_v40 }
 0x4b6   : > { %307 = vst.msk [vmem:[#allocation3] sm:$0xff] %vm199_vm2, %v305_v42 }
 0x4bd   : > { %v778_v56 = vld [vmem:[#allocation3] sm:$0xff] }
 0x4be   : > { %1054 = vrcp.f32 %v778_v56 }
 0x4c8   : > { %v1055_v63 = vpop.eup %1054 }
 0x50b   : > { %v440_v45 = vpop.xlane.xlu0 %439 }
 0x50c   : > { %v441_v46 = vadd.f32 %v440_v45, %v437_v44 }
 0x50e   : > { %442 = vst.msk [vmem:[#allocation3 + $0x8] sm:$0xff] %vm199_vm2, %v441_v46 }
 0x513   : > { %v576_v49 = vpop.xlane.xlu1 %575 }
 0x514   : > { %v577_v50 = vadd.f32 %v576_v49, %v573_v48 }
 0x515   : > { %v791_v62 = vld [vmem:[#allocation3 + $0x8] sm:$0xff] }
 0x516   : > { %578 = vst.msk [vmem:[#allocation3 + $0x10] sm:$0xff] %vm199_vm2, %v577_v50 }
 0x517   : > { %v491_v13 = vpop.permute.xlu1 %490 }
 0x518   : > { %v493_v15 = vmul.f32 %v491_v13, %v487_v14 }
 0x51b   : > { %v712_v54 = vpop.xlane.xlu0 %711  ;;  %v632_v18 = vpop.permute.xlu1 %631 }
 0x51c   : > { %v713_v55 = vadd.f32 %v712_v54, %v709_v53 }
 0x51d   : > { %v804_v57 = vld [vmem:[#allocation3 + $0x10] sm:$0xff] }
 0x51e   : > { %714 = vst.msk [vmem:[#allocation3 + $0x18] sm:$0xff] %vm199_vm2, %v713_v55  ;;  %1056 = vrcp.f32 %v804_v57 }
 0x51f   : > { %1058 = vrcp.f32 %v791_v62 }
 0x525   : > { %v817_v5 = vld [vmem:[#allocation3 + $0x18] sm:$0xff] }
 0x526   : > { %1060 = vrcp.f32 %v817_v5 }
 0x528   : > { %v1057_v6 = vpop.eup %1056 }
 0x529   : > { %v1059_v11 = vpop.eup %1058 }
 0x530   : > { %v1061_v12 = vpop.eup %1060 }
 0x552   : > { %v481_v58 = vpop.f32.mrb[4].mxu0 }
 0x553   : > { %495 = vrot.lane.b32.xlu0 %v481_v58, %s1097_s27  ;;  %v970_v59 = vpop.f32.mrb[5].mxu0 }
 0x554   : > { %v484_v60 = vpop.f32.mrb[6].mxu0 }
 0x555   : > { %v971_v61 = vpop.f32.mrb[7].mxu0 }
 0x557   : > { %762 = vperm.xlu0 %1035, %v1053_v51  }
 0x55a   : > { %v622_v1 = vpop.f32.mrb[8].mxu0 }
 0x55b   : > { %783 = vperm.xlu0 %1035, %v1055_v63   ;;  %636 = vrot.lane.b32.xlu1 %v622_v1, %s1098_s28  ;;  %v982_v2 = vpop.f32.mrb[9].mxu0 }
 0x55c   : > { %v625_v3 = vpop.f32.mrb[10].mxu0 }
 0x55d   : > { %v983_v4 = vpop.f32.mrb[11].mxu0 }
 0x55f   : > { %809 = vperm.xlu0 %1035, %v1057_v6  }
 0x562   : > { %v753_v7 = vpop.f32.mrb[12].mxu0 }
 0x563   : > { %767 = vrot.lane.b32.xlu1 %v753_v7, %s1099_s29  ;;  %v994_v8 = vpop.f32.mrb[13].mxu0 }
 0x564   : > { %v756_v9 = vpop.f32.mrb[14].mxu0 }
 0x565   : > { %v995_v10 = vpop.f32.mrb[15].mxu0 }
 0x567   : > { %796 = vperm.xlu1 %1034, %v1059_v11  }
 0x56b   : > { %822 = vperm.xlu1 %1034, %v1061_v12  }
 0x5c5   : > { %v496_v16 = vpop.permute.xlu0 %495 }
 0x5c6   : > { %v498_v17 = vadd.f32 %v496_v16, %v493_v15 }
 0x5c8   : > { %500 = vst.msk [vmem:[#allocation4] sm:$0xff] %vm499_vm6, %v498_v17 }
 0x5cd   : > { %v637_v20 = vpop.permute.xlu1 %636 }
 0x5cf   : > { %v628_v19 = vld [vmem:[#allocation4] sm:$0xff] }
 0x5d0   : > { %v634_v21 = vmul.f32 %v632_v18, %v628_v19 }
 0x5d2   : > { %v639_v22 = vadd.f32 %v637_v20, %v634_v21 }
 0x5d4   : > { %641 = vst.msk [vmem:[#allocation4] sm:$0xff] %vm640_vm7, %v639_v22 }
 0x5d5   : > { %v768_v26 = vpop.permute.xlu1 %767 }
 0x5d6   : > { %v763_v23 = vpop.permute.xlu0 %762 }
 0x5da   : > { %v784_v28 = vpop.permute.xlu0 %783 }
 0x5db   : > { %v759_v24 = vld [vmem:[#allocation4] sm:$0xff] }
 0x5dc   : > { %v765_v25 = vmul.f32 %v763_v23, %v759_v24 }
 0x5de   : > { %v770_v27 = vadd.f32 %v768_v26, %v765_v25  ;;  %v810_v34 = vpop.permute.xlu0 %809 }
 0x5e0   : > { %772 = vst.msk [vmem:[#allocation4] sm:$0xff] %vm771_vm8, %v770_v27 }
 0x5e6   : > { %v797_v32 = vpop.permute.xlu1 %796 }
 0x5e7   : > { %v777_v29 = vld [vmem:[#allocation4] sm:$0xff] }
 0x5e8   : > { %v786_v30 = vmul.f32 %v784_v28, %v777_v29 }
 0x5ea   : > { %788 = vst.msk [vmem:[#allocation4] sm:$0xff] %vm235_vm1, %v786_v30  ;;  %v823_v38 = vpop.permute.xlu1 %822 }
 0x5f1   : > { %v789_v31 = vld [vmem:[#allocation4] sm:$0xff] }
 0x5f2   : > { %v799_v33 = vmul.f32 %v797_v32, %v789_v31 }
 0x5f4   : > { %801 = vst.msk [vmem:[#allocation4] sm:$0xff] %vm499_vm6, %v799_v33 }
 0x5fb   : > { %v802_v35 = vld [vmem:[#allocation4] sm:$0xff] }
 0x5fc   : > { %v812_v36 = vmul.f32 %v810_v34, %v802_v35 }
 0x5fe   : > { %814 = vst.msk [vmem:[#allocation4] sm:$0xff] %vm640_vm7, %v812_v36 }
 0x605   : > { %v815_v37 = vld [vmem:[#allocation4] sm:$0xff] }
 0x606   : > { %v825_v39 = vmul.f32 %v823_v38, %v815_v37 }
 0x608   : > { %827 = vst.msk [vmem:[#allocation4] sm:$0xff] %vm771_vm8, %v825_v39 }
 0x60f   : > { %v828_v40 = vld [vmem:[#allocation4] sm:$0xff] }
 0x610   : > { %v829_v41 = vpack.c.bf16 %v828_v40, %v828_v40 }
 0x612   : > { %831 = vst.msk [vmem:[%s192_s4] sm:$0xf] %vm830_vm9, %v829_v41 }
 0x613 PF: > { %s12_s11 = sadd.s32 1, %s1084_s11   ;;  %s1287_s9 = smov %s1080_s10 }
 0x614   : > { %p9_p5 = scmp.ge.s32.totalorder %s12_s11, 4   ;;  %s1288_s10 = smov %s1290_s12 }
 0x616   :  { %11 = sbr.rel (!%p9_p5) target bundleno = 2 (0x2), region = 82 }

// kernel: decoder_layer.13
= control target key start
LH: loop header
LB: loop body
LE: loop exit
PB: predicated region body
PF: predicated region fallthrough
CT: control target
= control target key end

     0   :  { %v124_v0 = vmov 0.0   ;;  %vm125_vm0 = vmmov 0   ;;  %vm41_vm1 = vcmask 261120   ;;  %vm94_vm2 = vcmask 257024   ;;  %s167_s1 = inlined_call_operand.vmem [shape: bf16[32,32], index: 1, kind: input, shape index: {}]   ;;  %s168_s0 = inlined_call_operand.vmem [shape: f32[16,32], index: 0, kind: input, shape index: {}]   ;;  %s169_s2 = inlined_call_operand.vmem [shape: f32[1,32], index: 2, kind: input, shape index: {}]   ;;  %s170_s3 = inlined_call_operand.vmem [shape: bf16[16,32], index: 3, kind: output, shape index: {}]  }
   0x1   :  { %112 = vmatprep.subr.bf16.mxu0 %v124_v0  ;;  %v122_v1 = vld [vmem:[%s167_s1] sm:$0xff]   ;;  %116 = vmatprep.mubr.msk.bf16.mxu0 %vm125_vm0, %v124_v0  ;;  %v123_v2 = vld [vmem:[%s167_s1 + $0x8] sm:$0xff]  }
   0x2   :  { %113 = vmatpush3.bf16.msra.mxu0 %v122_v1  ;;  %v15_v3 = vld [vmem:[%s168_s0] sm:$0xff]  ;;  %v16_v4 = vld [vmem:[%s168_s0 + $0x8] sm:$0xff] }
   0x3   :  { %114 = vmatprep.subr.bf16.mxu0 %v124_v0  ;;  %v17_v5 = vpack.c.bf16 %v16_v4, %v15_v3  ;;  %v101_v6 = vld [vmem:[%s169_s2] ss:$0 sm:$0xff] }
   0x6   :  { %115 = vmatpush3.bf16.msra.mxu0 %v123_v2 }
   0x9   :  { %117 = vmatmul.mubr.msk.bf16.vlgmr.msra.gmra.mrb[0].mxu0 %vm41_vm1, %v17_v5 }
  0xdc   :  { %v79_v7 = vpop.f32.mrb[0].mxu0 }
  0xdd   :  { %v80_v8 = vadd.f32 %v101_v6, %v79_v7  ;;  %v118_v9 = vpop.f32.mrb[1].mxu0 }
  0xde   :  { %v82_v10 = vpop.f32.mrb[2].mxu0 }
  0xdf   :  { %v107_v11 = vpack.c.bf16 %v80_v8, %v80_v8  ;;  %v83_v12 = vadd.f32 %v101_v6, %v82_v10  ;;  %v119_v13 = vpop.f32.mrb[3].mxu0 }
  0xe1   :  { %95 = vst.msk [vmem:[%s170_s3] sm:$0xf] %vm94_vm2, %v107_v11  ;;  %v108_v14 = vpack.c.bf16 %v83_v12, %v83_v12 }
  0xe3   :  { %96 = vst.msk [vmem:[%s170_s3 + $0x4] sm:$0xf] %vm94_vm2, %v108_v14 }

// kernel: decoder_layer.15
= control target key start
LH: loop header
LB: loop body
LE: loop exit
PB: predicated region body
PF: predicated region fallthrough
CT: control target
= control target key end

     0   :  { %vm28_vm0 = vcmask 261120   ;;  %v181_v16 = vmov 0.0   ;;  %vm182_vm1 = vmmov 0   ;;  %s255_s0 = inlined_call_operand.vmem [shape: bf16[16,32], index: 0, kind: input, shape index: {}]   ;;  %s256_s3 = inlined_call_operand.vmem [shape: bf16[32,32], index: 3, kind: input, shape index: {}]   ;;  %s257_s1 = inlined_call_operand.vmem [shape: f32[1,32], index: 1, kind: input, shape index: {}]   ;;  %s258_s2 = inlined_call_operand.vmem [shape: f32[1,32], index: 2, kind: input, shape index: {}]   ;;  %s259_s4 = inlined_call_operand.vmem [shape: f32[1,32], index: 4, kind: input, shape index: {}]   ;;  %s260_s5 = inlined_call_operand.vmem [shape: f32[16,32], index: 5, kind: input, shape index: {}]   ;;  %s261_s6 = inlined_call_operand.vmem [shape: f32[16,32], index: 6, kind: output, shape index: {}]  }
   0x1   :  { %v159_v0 = vld [vmem:[%s255_s0] sm:$0xff]   ;;  %165 = vmatprep.subr.bf16.mxu0 %v181_v16  ;;  %v176_v17 = vld [vmem:[%s256_s3 + $0x8] sm:$0xff]   ;;  %169 = vmatprep.mubr.msk.bf16.mxu0 %vm182_vm1, %v181_v16 }
   0x2   :  { %v160_v1 = vunpack.c.l.bf16 %v159_v0  ;;  %v161_v2 = vunpack.c.h.bf16 %v159_v0  ;;  %v175_v15 = vld [vmem:[%s256_s3] sm:$0xff]   ;;  %v143_v41 = vld [vmem:[%s260_s5 + $0x8] sm:$0xff] }
   0x3   :  { %166 = vmatpush3.bf16.msra.mxu0 %v175_v15  ;;  %v152_v26 = vld [vmem:[%s257_s1] ss:$0 sm:$0xff] }
   0x4   :  { %v29_v3 = vsel %vm28_vm0, %v160_v1, 0.0  ;;  %v32_v4 = vsel %vm28_vm0, %v161_v2, 0.0  ;;  %167 = vmatprep.subr.bf16.mxu0 %v181_v16  ;;  %v153_v30 = vld [vmem:[%s258_s2] ss:$0 sm:$0xff] }
   0x5   :  { %30 = vadd.xlane.f32.xlu0 %v29_v3  ;;  %v154_v35 = vld [vmem:[%s259_s4] ss:$0 sm:$0xff] }
   0x6   :  { %v142_v37 = vld [vmem:[%s260_s5] sm:$0xff] }
   0x7   :  { %168 = vmatpush3.bf16.msra.mxu0 %v176_v17 }
   0x9   :  { %33 = vadd.xlane.f32.xlu0 %v32_v4 }
  0x92   :  { %v31_v5 = vpop.xlane.xlu0 %30 }
  0x93   :  { %v36_v6 = vmul.f32 0.03125, %v31_v5 }
  0x95   :  { %v38_v7 = vsub.f32 %v160_v1, %v36_v6 }
  0x96   :  { %v34_v8 = vpop.xlane.xlu0 %33 }
  0x97   :  { %v37_v9 = vmul.f32 0.03125, %v34_v8  ;;  %v40_v10 = vmul.f32 %v38_v7, %v38_v7 }
  0x99   :  { %v39_v11 = vsub.f32 %v161_v2, %v37_v9  ;;  %v42_v12 = vsel %vm28_vm0, %v40_v10, 0.0 }
  0x9a   :  { %43 = vadd.xlane.f32.xlu1 %v42_v12 }
  0x9b   :  { %v41_v13 = vmul.f32 %v39_v11, %v39_v11 }
  0x9d   :  { %v45_v14 = vsel %vm28_vm0, %v41_v13, 0.0 }
  0x9e   :  { %46 = vadd.xlane.f32.xlu1 %v45_v14 }
 0x127   :  { %v44_v18 = vpop.xlane.xlu1 %43 }
 0x128   :  { %v48_v19 = vmul.f32 0.03125, %v44_v18 }
 0x12a   :  { %v50_v20 = vadd.f32 1e-05, %v48_v19 }
 0x12b   :  { %v47_v21 = vpop.xlane.xlu1 %46 }
 0x12c   :  { %177 = vrsqrt.f32 %v50_v20  ;;  %v49_v22 = vmul.f32 0.03125, %v47_v21 }
 0x12e   :  { %v51_v23 = vadd.f32 1e-05, %v49_v22 }
 0x130   :  { %179 = vrsqrt.f32 %v51_v23 }
 0x136   :  { %v178_v24 = vpop.eup %177 }
 0x137   :  { %v54_v25 = vmul.f32 %v178_v24, %v38_v7 }
 0x139   :  { %v63_v29 = vmul.f32 %v152_v26, %v54_v25 }
 0x13a   :  { %v180_v27 = vpop.eup %179 }
 0x13b   :  { %v55_v28 = vmul.f32 %v180_v27, %v39_v11  ;;  %v72_v32 = vadd.f32 %v153_v30, %v63_v29 }
 0x13d   :  { %v64_v31 = vmul.f32 %v152_v26, %v55_v28 }
 0x13f   :  { %v73_v33 = vadd.f32 %v153_v30, %v64_v31 }
 0x141   :  { %v74_v34 = vpack.c.bf16 %v73_v33, %v72_v32 }
 0x143   :  { %170 = vmatmul.mubr.msk.bf16.vlgmr.msra.gmra.mrb[0].mxu0 %vm28_vm0, %v74_v34 }
 0x216   :  { %v135_v36 = vpop.f32.mrb[0].mxu0 }
 0x217   :  { %v136_v38 = vadd.f32 %v154_v35, %v135_v36  ;;  %v171_v39 = vpop.f32.mrb[1].mxu0 }
 0x218   :  { %v138_v40 = vpop.f32.mrb[2].mxu0 }
 0x219   :  { %v144_v42 = vadd.f32 %v142_v37, %v136_v38  ;;  %v139_v43 = vadd.f32 %v154_v35, %v138_v40  ;;  %v172_v44 = vpop.f32.mrb[3].mxu0 }
 0x21b   :  { %146 = vst.msk [vmem:[%s261_s6] sm:$0xff] %vm28_vm0, %v144_v42  ;;  %v145_v45 = vadd.f32 %v143_v41, %v139_v43 }
 0x21d   :  { %147 = vst.msk [vmem:[%s261_s6 + $0x8] sm:$0xff] %vm28_vm0, %v145_v45 }

// kernel: decoder_layer.16
= control target key start
LH: loop header
LB: loop body
LE: loop exit
PB: predicated region body
PF: predicated region fallthrough
CT: control target
= control target key end

     0   :  { %vm23_vm0 = vcmask 261120   ;;  %v183_v15 = vmov 0.0   ;;  %vm184_vm1 = vmmov 0   ;;  %vm147_vm2 = vcmask 519168   ;;  %s247_s0 = inlined_call_operand.vmem [shape: f32[16,32], index: 0, kind: input, shape index: {}]   ;;  %s248_s3 = inlined_call_operand.vmem [shape: bf16[32,64], index: 3, kind: input, shape index: {}]   ;;  %s249_s1 = inlined_call_operand.vmem [shape: f32[1,32], index: 1, kind: input, shape index: {}]   ;;  %s250_s2 = inlined_call_operand.vmem [shape: f32[1,32], index: 2, kind: input, shape index: {}]   ;;  %s251_s4 = inlined_call_operand.vmem [shape: f32[1,64], index: 4, kind: input, shape index: {}]   ;;  %s252_s5 = inlined_call_operand.vmem [shape: bf16[16,64], index: 5, kind: output, shape index: {}]  }
   0x1   :  { %v21_v0 = vld [vmem:[%s247_s0] sm:$0xff]  ;;  %v22_v1 = vld [vmem:[%s247_s0 + $0x8] sm:$0xff]  ;;  %167 = vmatprep.subr.bf16.mxu0 %v183_v15  ;;  %171 = vmatprep.mubr.msk.bf16.mxu0 %vm184_vm1, %v183_v15 }
   0x2   :  { %v24_v2 = vsel %vm23_vm0, %v21_v0, 0.0  ;;  %v27_v3 = vsel %vm23_vm0, %v22_v1, 0.0  ;;  %v177_v14 = vld [vmem:[%s248_s3] sm:$0xff]   ;;  %v178_v16 = vld [vmem:[%s248_s3 + $0x8] sm:$0xff]  }
   0x3   :  { %25 = vadd.xlane.f32.xlu0 %v24_v2  ;;  %168 = vmatpush3.bf16.msra.mxu0 %v177_v14  ;;  %v154_v25 = vld [vmem:[%s249_s1] ss:$0 sm:$0xff] }
   0x4   :  { %169 = vmatprep.subr.bf16.mxu0 %v183_v15  ;;  %v155_v29 = vld [vmem:[%s250_s2] ss:$0 sm:$0xff] }
   0x5   :  { %v156_v34 = vld [vmem:[%s251_s4] ss:$0 sm:$0xff] }
   0x7   :  { %28 = vadd.xlane.f32.xlu0 %v27_v3  ;;  %170 = vmatpush3.bf16.msra.mxu0 %v178_v16 }
  0x90   :  { %v26_v4 = vpop.xlane.xlu0 %25 }
  0x91   :  { %v31_v5 = vmul.f32 0.03125, %v26_v4 }
  0x93   :  { %v33_v6 = vsub.f32 %v21_v0, %v31_v5 }
  0x94   :  { %v29_v7 = vpop.xlane.xlu0 %28 }
  0x95   :  { %v32_v8 = vmul.f32 0.03125, %v29_v7  ;;  %v35_v9 = vmul.f32 %v33_v6, %v33_v6 }
  0x97   :  { %v34_v10 = vsub.f32 %v22_v1, %v32_v8  ;;  %v37_v11 = vsel %vm23_vm0, %v35_v9, 0.0 }
  0x98   :  { %38 = vadd.xlane.f32.xlu1 %v37_v11 }
  0x99   :  { %v36_v12 = vmul.f32 %v34_v10, %v34_v10 }
  0x9b   :  { %v40_v13 = vsel %vm23_vm0, %v36_v12, 0.0 }
  0x9c   :  { %41 = vadd.xlane.f32.xlu1 %v40_v13 }
 0x125   :  { %v39_v17 = vpop.xlane.xlu1 %38 }
 0x126   :  { %v43_v18 = vmul.f32 0.03125, %v39_v17 }
 0x128   :  { %v45_v19 = vadd.f32 1e-05, %v43_v18 }
 0x129   :  { %v42_v20 = vpop.xlane.xlu1 %41 }
 0x12a   :  { %179 = vrsqrt.f32 %v45_v19  ;;  %v44_v21 = vmul.f32 0.03125, %v42_v20 }
 0x12c   :  { %v46_v22 = vadd.f32 1e-05, %v44_v21 }
 0x12e   :  { %181 = vrsqrt.f32 %v46_v22 }
 0x134   :  { %v180_v23 = vpop.eup %179 }
 0x135   :  { %v49_v24 = vmul.f32 %v180_v23, %v33_v6 }
 0x137   :  { %v58_v28 = vmul.f32 %v154_v25, %v49_v24 }
 0x138   :  { %v182_v26 = vpop.eup %181 }
 0x139   :  { %v50_v27 = vmul.f32 %v182_v26, %v34_v10  ;;  %v67_v31 = vadd.f32 %v155_v29, %v58_v28 }
 0x13b   :  { %v59_v30 = vmul.f32 %v154_v25, %v50_v27 }
 0x13d   :  { %v68_v32 = vadd.f32 %v155_v29, %v59_v30 }
 0x13f   :  { %v69_v33 = vpack.c.bf16 %v68_v32, %v67_v31 }
 0x141   :  { %172 = vmatmul.mubr.msk.bf16.vlgmr.msra.gmra.mrb[0].mxu0 %vm23_vm0, %v69_v33 }
 0x214   :  { %v130_v35 = vpop.f32.mrb[0].mxu0 }
 0x215   :  { %v131_v36 = vadd.f32 %v156_v34, %v130_v35  ;;  %v173_v37 = vpop.f32.mrb[1].mxu0 }
 0x216   :  { %v133_v38 = vpop.f32.mrb[2].mxu0 }
 0x217   :  { %v137_v39 = vmax.f32 %v131_v36, 0.0  ;;  %v134_v40 = vadd.f32 %v156_v34, %v133_v38  ;;  %v174_v41 = vpop.f32.mrb[3].mxu0 }
 0x219   :  { %v162_v42 = vpack.c.bf16 %v137_v39, %v137_v39  ;;  %v138_v43 = vmax.f32 %v134_v40, 0.0 }
 0x21b   :  { %148 = vst.msk [vmem:[%s252_s5] sm:$0xf] %vm147_vm2, %v162_v42  ;;  %v163_v44 = vpack.c.bf16 %v138_v43, %v138_v43 }
 0x21d   :  { %149 = vst.msk [vmem:[%s252_s5 + $0x4] sm:$0xf] %vm147_vm2, %v163_v44 }

// kernel: decoder_layer.14
= control target key start
LH: loop header
LB: loop body
LE: loop exit
PB: predicated region body
PF: predicated region fallthrough
CT: control target
= control target key end

     0   :  { %s1075_s9 = smov 0   ;;  %s1077_s10 = smov 0   ;;  %s1232_s0 = inlined_call_operand.vmem [shape: bf16[16,32], index: 0, kind: input, shape index: {}]   ;;  %s1233_s1 = inlined_call_operand.vmem [shape: bf16[16,32], index: 1, kind: input, shape index: {}]   ;;  %s1234_s2 = inlined_call_operand.vmem [shape: bf16[16,32], index: 2, kind: output, shape index: {}]  }
   0x1   :  { %s1079_s11 = smov 0  }
   0x2 LB: > { %s31_s12 = sadd.s32 1, %s1044_s10  ;;  %p885_p0 = scmp.ge.s32.totalorder %s1048_s11, 1  ;;  %s1048_s11 = sphi %s1079_s11, %s12_s11   ;;  %s1044_s10 = sphi %s1077_s10, %s1236_s10   ;;  %s1040_s9 = sphi %s1075_s9, %s1235_s9  }
   0x3   : > { %p33_p1 = scmp.ge.s32.totalorder %s31_s12, 2  ;;  %p149_p2 = scmp.lt.s32.totalorder %s1048_s11, 3 }
   0x5   : > { %s1238_s12 = smov (%p33_p1, %s31_s12), 0  ;;  %p150_p3 = pnand %p885_p0, %p149_p2 }
   0x6   : > { %p177_p4 = scmp.lt.s32.totalorder (!%p150_p3), %s1040_s9, 1  ;;  %v1050_v0 = vmov (!%p150_p3), 0.0   ;;  %vm1051_vm0 = vmmov (!%p150_p3), 0   ;;  %vm212_vm1 = vcmask (!%p150_p3), 64512   ;;  %vm199_vm2 = vcmask (!%p150_p3), 7168   ;;  %s1054_s20 = smov (!%p150_p3), 112  }
   0x7   : > { %153 = sbr.rel (%p150_p3) target bundleno = 1449 (0x5a9), region = 28  ;;  %917 = vmatprep.subr.bf16.mxu0 (!%p150_p3), %v1050_v0  ;;  %919 = vmatprep.mubr.msk.bf16.mxu0 (!%p150_p3), %vm1051_vm0, %v1050_v0  ;;  %v1052_v4 = vmov (!%p150_p3), -inf   ;;  %204 = vst.msk [vmem:[#allocation3] sm:$0xff] (!%p150_p3), %vm199_vm2, %v1050_v0  ;;  %205 = vst.msk [vmem:[#allocation3 + $0x8] sm:$0xff] (!%p150_p3), %vm199_vm2, %v1050_v0  ;;  %v1053_v11 = vmov (!%p150_p3), 0   ;;  %s1055_s21 = smov (!%p150_p3), 120  }
   0x8   : > { %923 = vmatprep.subr.bf16.mxu1 (!%p150_p3), %v1050_v0  ;;  %925 = vmatprep.mubr.msk.bf16.mxu1 (!%p150_p3), %vm1051_vm0, %v1050_v0  ;;  %200 = vst.msk [vmem:[#allocation2] sm:$0xff] (!%p150_p3), %vm199_vm2, %v1052_v4  ;;  %201 = vst.msk [vmem:[#allocation2 + $0x8] sm:$0xff] (!%p150_p3), %vm199_vm2, %v1052_v4  ;;  %s1056_s22 = smov (!%p150_p3), 104   ;;  %vm293_vm3 = vcmask (!%p150_p3), 1043456   ;;  %vm208_vm4 = vcmask (!%p150_p3), 261120   ;;  %s1057_s23 = smov (!%p150_p3), 8  }
   0x9   : > { %202 = vst.msk [vmem:[#allocation2 + $0x10] sm:$0xff] (!%p150_p3), %vm199_vm2, %v1052_v4  ;;  %203 = vst.msk [vmem:[#allocation2 + $0x18] sm:$0xff] (!%p150_p3), %vm199_vm2, %v1052_v4  ;;  %999 = vset.pattern.permute.xlu0 (!%p150_p3), %v1053_v11  ;;  %1000 = vset.pattern.permute.xlu1 (!%p150_p3), %v1053_v11  ;;  %s1058_s24 = smov (!%p150_p3), 16   ;;  %s1059_s25 = smov (!%p150_p3), 24   ;;  %vm477_vm5 = vcmask (!%p150_p3), 130112   ;;  %vm617_vm6 = vcmask (!%p150_p3), 195712  }
   0xa   : > { %206 = vst.msk [vmem:[#allocation3 + $0x10] sm:$0xff] (!%p150_p3), %vm199_vm2, %v1050_v0  ;;  %207 = vst.msk [vmem:[#allocation3 + $0x18] sm:$0xff] (!%p150_p3), %vm199_vm2, %v1050_v0  ;;  %vm747_vm7 = vcmask (!%p150_p3), 261312   ;;  %vm799_vm8 = vcmask (!%p150_p3), 257024  }
   0xb   : > { %209 = vst.msk [vmem:[#allocation4] sm:$0xff] (!%p150_p3), %vm208_vm4, %v1050_v0 }
   0xe   : > { %s1240_s9 = smov (!%p177_p4, %s1040_s9), 1 }
   0xf   : > { %s1099_s13 = sshll.u32 %s1240_s9, 2  ;;  %v1132_v14 = vld [vmem:[#allocation2] sm:$0xff]  ;;  %v1167_v52 = vld [vmem:[#allocation2 + $0x8] sm:$0xff] }
  0x10   : > { %s186_s16 = scalar_lea.vmem %s1233_s1, %s1099_s13  ;;  %s180_s19 = scalar_lea.vmem %s1232_s0, %s1099_s13  ;;  %v532_v56 = vld [vmem:[#allocation2 + $0x10] sm:$0xff]  ;;  %v1181_v61 = vld [vmem:[#allocation2 + $0x18] sm:$0xff] }
  0x11   : > { %v211_v1 = vld [vmem:[%s186_s16] sm:$0xf]  ;;  %s192_s28 = scalar_lea.vmem %s1234_s2, %s1099_s13 }
  0x12   : > { %v217_v2 = vsel %vm212_vm1, %v211_v1, 0  ;;  %v210_v3 = vld [vmem:[%s180_s19] sm:$0xf]  ;;  %v1127_v12 = vcombine.low %v211_v1, %v211_v1 }
  0x13   : > { %918 = vmatpush3.bf16.xpose.msra.mxu0 %v217_v2  ;;  %v892_v13 = vcombine.low %v210_v3, %v210_v3 }
  0x14   : > { %935 = vmatprep.subr.bf16.mxu0 %v1050_v0  ;;  %288 = vrot.lane.b32.xlu1 %v1127_v12, %s1054_s20 }
  0x18   : > { %350 = vrot.lane.b32.xlu1 %v892_v13, %s1055_s21 }
  0x1a   : > { %920 = vmatmul.mubr.msk.bf16.vlgmr.msra.gmra.mrb[0].mxu0 %vm212_vm1, %v210_v3 }
  0x1b   : > { %937 = vmatprep.mubr.msk.bf16.mxu0 %vm1051_vm0, %v1050_v0 }
  0x1c   : > { %482 = vrot.lane.b32.xlu1 %v1127_v12, %s1055_s21 }
  0x20   : > { %480 = vrot.lane.b32.xlu1 %v892_v13, %s1054_s20 }
  0x24   : > { %620 = vrot.lane.b32.xlu1 %v892_v13, %s1056_s22 }
  0x86   : > { %v289_v18 = vpop.permute.xlu1 %288 }
  0x87   : > { %v295_v19 = vsel %vm293_vm3, %v289_v18, 0 }
  0x88   : > { %924 = vmatpush3.bf16.msra.mxu1 %v295_v19  ;;  %936 = vmatpush3.bf16.msra.mxu0 %v295_v19 }
  0x89   : > { %929 = vmatprep.subr.bf16.mxu1 %v1050_v0  ;;  %947 = vmatprep.subr.bf16.mxu0 %v1050_v0 }
  0x8a   : > { %v351_v24 = vpop.permute.xlu1 %350 }
  0x8e   : > { %v483_v26 = vpop.permute.xlu1 %482 }
  0x8f   : > { %v488_v27 = vsel %vm212_vm1, %v483_v26, 0 }
  0x92   : > { %v481_v28 = vpop.permute.xlu1 %480 }
  0x96   : > { %v621_v29 = vpop.permute.xlu1 %620 }
  0xed   : > { %v253_v5 = vpop.f32.mrb[0].mxu0 }
  0xee   : > { %v259_v6 = vmul.f32 0.35355338, %v253_v5  ;;  %v921_v7 = vpop.f32.mrb[1].mxu0 }
  0xef   : > { %v256_v8 = vpop.f32.mrb[2].mxu0 }
  0xf0   : > { %v922_v9 = vpop.f32.mrb[3].mxu0  ;;  %v261_v10 = vsel %vm212_vm1, %v259_v6, -inf }
  0xf1   : > { %262 = vmax.xlane.f32.xlu0 %v261_v10 }
 0x17e   : > { %v263_v15 = vpop.xlane.xlu0 %262 }
 0x17f   : > { %v1135_v16 = vmax.f32 %v1132_v14, %v263_v15 }
 0x181   : > { %v265_v17 = vsub.f32 %v1132_v14, %v1135_v16  ;;  %346 = vst.msk [vmem:[#allocation2] sm:$0xff] %vm199_vm2, %v1135_v16  ;;  %270 = vperm.xlu0 %999, %v1135_v16  }
 0x183   : > { %v266_v57 = vmul.f32 1.442695, %v265_v17  ;;  %v337_v17 = vld [vmem:[#allocation4] sm:$0xff] }
 0x200   : > { %v271_v20 = vpop.permute.xlu0 %270 }
 0x201   : > { %v273_v21 = vsub.f32 %v259_v6, %v271_v20 }
 0x203   : > { %v274_v22 = vmul.f32 1.442695, %v273_v21 }
 0x205   : > { %1002 = vpow2.f32 %v274_v22 }
 0x206   : > { %1004 = vpow2.f32 %v266_v57 }
 0x20f   : > { %v1145_v23 = vpop.eup %1002 }
 0x210   : > { %v284_v25 = vpack.c.bf16 %v1145_v23, %v1145_v23  ;;  %v278_v3 = vsel %vm212_vm1, %v1145_v23, 0.0 }
 0x212   : > { %926 = vmatmul.mubr.msk.bf16.vlgmr.msra.gmra.mrb[0].mxu1 %vm212_vm1, %v284_v25 }
 0x213   : > { %930 = vmatpush3.bf16.xpose.msra.mxu1 %v217_v2  ;;  %931 = vmatprep.mubr.msk.bf16.mxu1 %vm1051_vm0, %v1050_v0  ;;  %v1005_v2 = vpop.eup %1004 }
 0x214   : > { %941 = vmatprep.subr.bf16.mxu1 %v1050_v0 }
 0x21a   : > { %932 = vmatmul.mubr.msk.bf16.vlgmr.msra.gmra.mrb[4].mxu1 %vm212_vm1, %v351_v24 }
 0x21b   : > { %942 = vmatpush3.bf16.xpose.msra.mxu1 %v488_v27  ;;  %943 = vmatprep.mubr.msk.bf16.mxu1 %vm1051_vm0, %v1050_v0 }
 0x21c   : > { %953 = vmatprep.subr.bf16.mxu1 %v1050_v0 }
 0x222   : > { %944 = vmatmul.mubr.msk.bf16.vlgmr.msra.gmra.mrb[8].mxu1 %vm212_vm1, %v481_v28 }
 0x223   : > { %954 = vmatpush3.bf16.xpose.msra.mxu1 %v488_v27  ;;  %955 = vmatprep.mubr.msk.bf16.mxu1 %vm1051_vm0, %v1050_v0 }
 0x22a   : > { %956 = vmatmul.mubr.msk.bf16.vlgmr.msra.gmra.mrb[12].mxu1 %vm212_vm1, %v621_v29 }
 0x2e5   : > { %v1162_v30 = vpop.f32.mrb[0].mxu1 }
 0x2e6   : > { %v927_v31 = vpop.f32.mrb[1].mxu1 }
 0x2e7   : > { %v334_v32 = vpop.f32.mrb[2].mxu1 }
 0x2e8   : > { %v928_v33 = vpop.f32.mrb[3].mxu1  ;;  %v276_v32 = vld [vmem:[#allocation3] sm:$0xff] }
 0x2ed   : > { %v389_v34 = vpop.f32.mrb[4].mxu1 }
 0x2ee   : > { %v395_v35 = vmul.f32 0.35355338, %v389_v34  ;;  %v933_v36 = vpop.f32.mrb[5].mxu1 }
 0x2ef   : > { %v392_v37 = vpop.f32.mrb[6].mxu1 }
 0x2f0   : > { %v934_v38 = vpop.f32.mrb[7].mxu1  ;;  %v398_v39 = vsel %vm212_vm1, %v395_v35, -inf }
 0x2f1   : > { %399 = vmax.xlane.f32.xlu1 %v398_v39 }
 0x2f5   : > { %v524_v40 = vpop.f32.mrb[8].mxu1 }
 0x2f6   : > { %v530_v41 = vmul.f32 0.35355338, %v524_v40  ;;  %v945_v42 = vpop.f32.mrb[9].mxu1  ;;  %v549_v40 = vld [vmem:[#allocation3 + $0x10] sm:$0xff] }
 0x2f7   : > { %v527_v43 = vpop.f32.mrb[10].mxu1 }
 0x2f8   : > { %v946_v44 = vpop.f32.mrb[11].mxu1  ;;  %v533_v45 = vsel %vm212_vm1, %v530_v41, -inf }
 0x2f9   : > { %534 = vmax.xlane.f32.xlu0 %v533_v45  ;;  %v684_v45 = vld [vmem:[#allocation3 + $0x18] sm:$0xff] }
 0x2fd   : > { %v659_v46 = vpop.f32.mrb[12].mxu1 }
 0x2fe   : > { %v665_v47 = vmul.f32 0.35355338, %v659_v46  ;;  %v957_v48 = vpop.f32.mrb[13].mxu1 }
 0x2ff   : > { %v662_v49 = vpop.f32.mrb[14].mxu1 }
 0x300   : > { %v668_v50 = vsel %vm212_vm1, %v665_v47, -inf  ;;  %v958_v51 = vpop.f32.mrb[15].mxu1 }
 0x301   : > { %669 = vmax.xlane.f32.xlu1 %v668_v50 }
 0x37e   : > { %v400_v53 = vpop.xlane.xlu1 %399 }
 0x37f   : > { %v1170_v54 = vmax.f32 %v1167_v52, %v400_v53 }
 0x381   : > { %v402_v55 = vsub.f32 %v1167_v52, %v1170_v54  ;;  %479 = vst.msk [vmem:[#allocation2 + $0x8] sm:$0xff] %vm199_vm2, %v1170_v54  ;;  %407 = vperm.xlu1 %1000, %v1170_v54  }
 0x383   : > { %v403_v28 = vmul.f32 1.442695, %v402_v55 }
 0x386   : > { %v535_v58 = vpop.xlane.xlu0 %534 }
 0x387   : > { %v536_v59 = vmax.f32 %v532_v56, %v535_v58 }
 0x389   : > { %v537_v60 = vsub.f32 %v532_v56, %v536_v59  ;;  %619 = vst.msk [vmem:[#allocation2 + $0x10] sm:$0xff] %vm199_vm2, %v536_v59  ;;  %542 = vperm.xlu1 %1000, %v536_v59  }
 0x38b   : > { %v538_v29 = vmul.f32 1.442695, %v537_v60 }
 0x38d   : > { %557 = vrot.lane.b32.xlu1 %v1127_v12, %s1056_s22 }
 0x38e   : > { %v670_v62 = vpop.xlane.xlu1 %669 }
 0x38f   : > { %v671_v63 = vmax.f32 %v1181_v61, %v670_v62 }
 0x391   : > { %v672_v1 = vsub.f32 %v1181_v61, %v671_v63  ;;  %749 = vst.msk [vmem:[#allocation2 + $0x18] sm:$0xff] %vm199_vm2, %v671_v63  ;;  %677 = vperm.xlu0 %999, %v671_v63  }
 0x393   : > { %v673_v36 = vmul.f32 1.442695, %v672_v1 }
 0x395   : > { %340 = vperm.xlu0 %999, %v1005_v2  }
 0x3b1   : > { %279 = vadd.xlane.f32.xlu1 %v278_v3 }
 0x400   : > { %v408_v4 = vpop.permute.xlu1 %407 }
 0x401   : > { %v410_v5 = vsub.f32 %v395_v35, %v408_v4  ;;  %v414_v35 = vld [vmem:[#allocation3 + $0x8] sm:$0xff] }
 0x403   : > { %v411_v6 = vmul.f32 1.442695, %v410_v5 }
 0x405   : > { %1006 = vpow2.f32 %v411_v6 }
 0x408   : > { %v543_v7 = vpop.permute.xlu1 %542 }
 0x409   : > { %v545_v8 = vsub.f32 %v530_v41, %v543_v7 }
 0x40b   : > { %v546_v9 = vmul.f32 1.442695, %v545_v8 }
 0x40c   : > { %v558_v10 = vpop.permute.xlu1 %557 }
 0x40d   : > { %1008 = vpow2.f32 %v546_v9  ;;  %v563_v13 = vsel %vm293_vm3, %v558_v10, 0 }
 0x40f   : > { %v1007_v11 = vpop.eup %1006 }
 0x410   : > { %v678_v12 = vpop.permute.xlu0 %677  ;;  %v416_v14 = vsel %vm212_vm1, %v1007_v11, 0.0  ;;  %v421_v15 = vpack.c.bf16 %v1007_v11, %v1007_v11 }
 0x411   : > { %v680_v16 = vsub.f32 %v665_v47, %v678_v12  ;;  %417 = vadd.xlane.f32.xlu0 %v416_v14 }
 0x412   : > { %938 = vmatmul.mubr.msk.bf16.vlgmr.msra.gmra.mrb[4].mxu0 %vm212_vm1, %v421_v15 }
 0x413   : > { %v681_v18 = vmul.f32 1.442695, %v680_v16  ;;  %948 = vmatpush3.bf16.msra.mxu0 %v563_v13  ;;  %949 = vmatprep.mubr.msk.bf16.mxu0 %vm1051_vm0, %v1050_v0 }
 0x414   : > { %v341_v19 = vpop.permute.xlu0 %340  ;;  %959 = vmatprep.subr.bf16.mxu0 %v1050_v0 }
 0x415   : > { %1010 = vpow2.f32 %v681_v18  ;;  %v343_v20 = vmul.f32 %v341_v19, %v337_v17 }
 0x416   : > { %1012 = vpow2.f32 %v403_v28 }
 0x417   : > { %v1009_v21 = vpop.eup %1008  ;;  %v344_v22 = vadd.f32 %v343_v20, %v1162_v30  ;;  %1014 = vpow2.f32 %v538_v29 }
 0x418   : > { %v551_v23 = vsel %vm212_vm1, %v1009_v21, 0.0  ;;  %v556_v24 = vpack.c.bf16 %v1009_v21, %v1009_v21  ;;  %1016 = vpow2.f32 %v673_v36 }
 0x419   : > { %345 = vst.msk [vmem:[#allocation4] sm:$0xff] %vm212_vm1, %v344_v22  ;;  %552 = vadd.xlane.f32.xlu1 %v551_v23 }
 0x41a   : > { %950 = vmatmul.mubr.msk.bf16.vlgmr.msra.gmra.mrb[8].mxu0 %vm212_vm1, %v556_v24 }
 0x41b   : > { %960 = vmatpush3.bf16.msra.mxu0 %v563_v13  ;;  %961 = vmatprep.mubr.msk.bf16.mxu0 %vm1051_vm0, %v1050_v0  ;;  %v277_v0 = vmul.f32 %v1005_v2, %v276_v32 }
 0x41f   : > { %v1011_v25 = vpop.eup %1010 }
 0x420   : > { %v686_v26 = vsel %vm212_vm1, %v1011_v25, 0.0  ;;  %v691_v27 = vpack.c.bf16 %v1011_v25, %v1011_v25  ;;  %v1013_v30 = vpop.eup %1012  ;;  %v465_v7 = vld [vmem:[#allocation4] sm:$0xff] }
 0x421   : > { %687 = vadd.xlane.f32.xlu1 %v686_v26  ;;  %v1015_v31 = vpop.eup %1014  ;;  %v415_v37 = vmul.f32 %v1013_v30, %v414_v35 }
 0x422   : > { %962 = vmatmul.mubr.msk.bf16.vlgmr.msra.gmra.mrb[12].mxu0 %vm212_vm1, %v691_v27  ;;  %v550_v41 = vmul.f32 %v1015_v31, %v549_v40  ;;  %v1017_v44 = vpop.eup %1016 }
 0x423   : > { %v685_v46 = vmul.f32 %v1017_v44, %v684_v45 }
 0x432   : > { %468 = vperm.xlu1 %1000, %v1013_v30  }
 0x436   : > { %608 = vperm.xlu1 %1000, %v1015_v31  }
 0x43e   : > { %v280_v33 = vpop.xlane.xlu1 %279 }
 0x43f   : > { %v281_v34 = vadd.f32 %v280_v33, %v277_v0 }
 0x441   : > { %283 = vst.msk [vmem:[#allocation3] sm:$0xff] %vm199_vm2, %v281_v34 }
 0x448   : > { %v754_v53 = vld [vmem:[#allocation3] sm:$0xff] }
 0x449   : > { %1018 = vrcp.f32 %v754_v53 }
 0x453   : > { %v1019_v61 = vpop.eup %1018 }
 0x49e   : > { %v418_v38 = vpop.xlane.xlu0 %417 }
 0x49f   : > { %v419_v39 = vadd.f32 %v418_v38, %v415_v37 }
 0x4a1   : > { %420 = vst.msk [vmem:[#allocation3 + $0x8] sm:$0xff] %vm199_vm2, %v419_v39 }
 0x4a6   : > { %v553_v42 = vpop.xlane.xlu1 %552 }
 0x4a7   : > { %v554_v43 = vadd.f32 %v553_v42, %v550_v41 }
 0x4a8   : > { %v765_v54 = vld [vmem:[#allocation3 + $0x8] sm:$0xff] }
 0x4a9   : > { %555 = vst.msk [vmem:[#allocation3 + $0x10] sm:$0xff] %vm199_vm2, %v554_v43  ;;  %1020 = vrcp.f32 %v765_v54 }
 0x4ae   : > { %v688_v47 = vpop.xlane.xlu1 %687 }
 0x4af   : > { %v689_v48 = vadd.f32 %v688_v47, %v685_v46 }
 0x4b0   : > { %v776_v55 = vld [vmem:[#allocation3 + $0x10] sm:$0xff] }
 0x4b1   : > { %690 = vst.msk [vmem:[#allocation3 + $0x18] sm:$0xff] %vm199_vm2, %v689_v48  ;;  %1022 = vrcp.f32 %v776_v55 }
 0x4b2   : > { %v469_v6 = vpop.permute.xlu1 %468 }
 0x4b3   : > { %v1021_v2 = vpop.eup %1020  ;;  %v471_v8 = vmul.f32 %v469_v6, %v465_v7 }
 0x4b6   : > { %v609_v11 = vpop.permute.xlu1 %608 }
 0x4b8   : > { %v787_v60 = vld [vmem:[#allocation3 + $0x18] sm:$0xff] }
 0x4b9   : > { %1024 = vrcp.f32 %v787_v60 }
 0x4bb   : > { %v1023_v4 = vpop.eup %1022 }
 0x4c3   : > { %v1025_v5 = vpop.eup %1024 }
 0x4e5   : > { %v459_v49 = vpop.f32.mrb[4].mxu0 }
 0x4e6   : > { %473 = vrot.lane.b32.xlu0 %v459_v49, %s1057_s23  ;;  %v939_v50 = vpop.f32.mrb[5].mxu0 }
 0x4e7   : > { %v462_v51 = vpop.f32.mrb[6].mxu0 }
 0x4e8   : > { %v940_v52 = vpop.f32.mrb[7].mxu0 }
 0x4ed   : > { %v599_v56 = vpop.f32.mrb[8].mxu0 }
 0x4ee   : > { %613 = vrot.lane.b32.xlu1 %v599_v56, %s1058_s24  ;;  %v951_v57 = vpop.f32.mrb[9].mxu0 }
 0x4ef   : > { %v602_v58 = vpop.f32.mrb[10].mxu0 }
 0x4f0   : > { %v952_v59 = vpop.f32.mrb[11].mxu0 }
 0x4f2   : > { %738 = vperm.xlu1 %1000, %v1017_v44  }
 0x4f5   : > { %v729_v62 = vpop.f32.mrb[12].mxu0 }
 0x4f6   : > { %759 = vperm.xlu1 %1000, %v1019_v61   ;;  %743 = vrot.lane.b32.xlu0 %v729_v62, %s1059_s25  ;;  %v963_v63 = vpop.f32.mrb[13].mxu0 }
 0x4f7   : > { %v732_v1 = vpop.f32.mrb[14].mxu0 }
 0x4f8   : > { %v964_v3 = vpop.f32.mrb[15].mxu0 }
 0x4fa   : > { %781 = vperm.xlu1 %1000, %v1023_v4   ;;  %770 = vperm.xlu0 %999, %v1021_v2  }
 0x4fe   : > { %792 = vperm.xlu0 %999, %v1025_v5  }
 0x558   : > { %v474_v9 = vpop.permute.xlu0 %473 }
 0x559   : > { %v476_v10 = vadd.f32 %v474_v9, %v471_v8 }
 0x55b   : > { %478 = vst.msk [vmem:[#allocation4] sm:$0xff] %vm477_vm5, %v476_v10 }
 0x560   : > { %v614_v14 = vpop.permute.xlu1 %613 }
 0x562   : > { %v605_v12 = vld [vmem:[#allocation4] sm:$0xff] }
 0x563   : > { %v611_v13 = vmul.f32 %v609_v11, %v605_v12 }
 0x565   : > { %v616_v15 = vadd.f32 %v614_v14, %v611_v13 }
 0x567   : > { %618 = vst.msk [vmem:[#allocation4] sm:$0xff] %vm617_vm6, %v616_v15 }
 0x568   : > { %v744_v19 = vpop.permute.xlu0 %743 }
 0x56e   : > { %v735_v16 = vld [vmem:[#allocation4] sm:$0xff] }
 0x571   : > { %v739_v17 = vpop.permute.xlu1 %738 }
 0x572   : > { %v741_v18 = vmul.f32 %v739_v17, %v735_v16 }
 0x574   : > { %v746_v20 = vadd.f32 %v744_v19, %v741_v18 }
 0x575   : > { %v760_v21 = vpop.permute.xlu1 %759 }
 0x576   : > { %748 = vst.msk [vmem:[#allocation4] sm:$0xff] %vm747_vm7, %v746_v20 }
 0x579   : > { %v771_v25 = vpop.permute.xlu0 %770  ;;  %v782_v27 = vpop.permute.xlu1 %781 }
 0x57d   : > { %v753_v22 = vld [vmem:[#allocation4] sm:$0xff]  ;;  %v793_v31 = vpop.permute.xlu0 %792 }
 0x57e   : > { %v762_v23 = vmul.f32 %v760_v21, %v753_v22 }
 0x580   : > { %763 = vst.msk [vmem:[#allocation4] sm:$0xff] %vm212_vm1, %v762_v23 }
 0x587   : > { %v764_v24 = vld [vmem:[#allocation4] sm:$0xff] }
 0x588   : > { %v773_v26 = vmul.f32 %v771_v25, %v764_v24 }
 0x58a   : > { %774 = vst.msk [vmem:[#allocation4] sm:$0xff] %vm477_vm5, %v773_v26 }
 0x591   : > { %v775_v28 = vld [vmem:[#allocation4] sm:$0xff] }
 0x592   : > { %v784_v29 = vmul.f32 %v782_v27, %v775_v28 }
 0x594   : > { %785 = vst.msk [vmem:[#allocation4] sm:$0xff] %vm617_vm6, %v784_v29 }
 0x59b   : > { %v786_v30 = vld [vmem:[#allocation4] sm:$0xff] }
 0x59c   : > { %v795_v32 = vmul.f32 %v793_v31, %v786_v30 }
 0x59e   : > { %796 = vst.msk [vmem:[#allocation4] sm:$0xff] %vm747_vm7, %v795_v32 }
 0x5a5   : > { %v797_v0 = vld [vmem:[#allocation4] sm:$0xff] }
 0x5a6   : > { %v798_v33 = vpack.c.bf16 %v797_v0, %v797_v0 }
 0x5a8   : > { %800 = vst.msk [vmem:[%s192_s28] sm:$0xf] %vm799_vm8, %v798_v33 }
 0x5a9 PF: > { %s12_s11 = sadd.s32 1, %s1048_s11   ;;  %s1235_s9 = smov %s1044_s10 }
 0x5aa   : > { %p9_p5 = scmp.ge.s32.totalorder %s12_s11, 4   ;;  %s1236_s10 = smov %s1238_s12 }
 0x5ac   :  { %11 = sbr.rel (!%p9_p5) target bundleno = 2 (0x2), region = 75 }

// kernel: decoder_layer.17
= control target key start
LH: loop header
LB: loop body
LE: loop exit
PB: predicated region body
PF: predicated region fallthrough
CT: control target
= control target key end

     0   :  { %vm29_vm0 = vcmask 523264   ;;  %s335_s0 = inlined_call_operand.vmem [shape: bf16[16,64], index: 0, kind: input, shape index: {}]   ;;  %s336_s1 = inlined_call_operand.vmem [shape: f32[1,64], index: 1, kind: input, shape index: {}]   ;;  %s337_s2 = inlined_call_operand.vmem [shape: f32[1,64], index: 2, kind: input, shape index: {}]   ;;  %s338_s3 = inlined_call_operand.vmem [shape: bf16[64,32], index: 3, kind: input, shape index: {}]   ;;  %s339_s4 = inlined_call_operand.vmem [shape: f32[1,32], index: 4, kind: input, shape index: {}]   ;;  %s340_s5 = inlined_call_operand.vmem [shape: f32[16,32], index: 5, kind: input, shape index: {}]   ;;  %s341_s6 = inlined_call_operand.hbm [shape: f32[16,32], index: 6, kind: output, shape index: {}]  }
   0x1   :  { %v191_v0 = vld [vmem:[%s335_s0] sm:$0xff]  }
   0x2   :  { %v192_v1 = vunpack.c.l.bf16 %v191_v0  ;;  %v193_v2 = vunpack.c.h.bf16 %v191_v0 }
   0x4   :  { %v30_v3 = vsel %vm29_vm0, %v192_v1, 0.0 }
   0x5   :  { %11 = vsyncpa [#allocation3], 0  ;;  %31 = vadd.xlane.f32.xlu0 %v30_v3  ;;  %v33_v4 = vsel %vm29_vm0, %v193_v2, 0.0  ;;  %v216_v15 = vld [vmem:[%s338_s3] sm:$0xff]   ;;  %v248_v16 = vmov 0.0   ;;  %v217_v17 = vld [vmem:[%s338_s3 + $0x8] sm:$0xff]  }
   0x6   :  { %199 = vmatprep.subr.bf16.mxu0 %v248_v16  ;;  %v218_v18 = vld [vmem:[%s338_s3 + $0x10] sm:$0xff]   ;;  %v219_v19 = vld [vmem:[%s338_s3 + $0x18] sm:$0xff]   ;;  %vm249_vm1 = vmmov 0   ;;  %v182_v28 = vld [vmem:[%s336_s1] ss:$0 sm:$0xff]  ;;  %s250_s12 = smov [#allocation2]  }
   0x7   :  { %200 = vmatpush3.bf16.msra.mxu0 %v216_v15  ;;  %207 = vmatprep.mubr.msk.bf16.mxu0 %vm249_vm1, %v248_v16  ;;  %v183_v32 = vld [vmem:[%s337_s2] ss:$0 sm:$0xff]  ;;  %s171_s13 = sshll.u32 %s250_s12, 4  ;;  %vm163_vm2 = vcmask 261120   ;;  %v160_v43 = vld [vmem:[%s340_s5 + $0x8] sm:$0xff]  ;;  %s172_s13 = int_to_ptr.vmem [resolvable:$true] %s171_s13 }
   0x8   :  { %201 = vmatprep.subr.bf16.mxu0 %v248_v16  ;;  %v184_v37 = vld [vmem:[%s339_s4] ss:$0 sm:$0xff]  ;;  %s224_s4 = scalar_lea.vmem %s172_s13, 256  ;;  %p229_p1 = scmp.lt.s32.totalorder %s172_s13, %s172_s13 }
   0x9   :  { %34 = vadd.xlane.f32.xlu0 %v33_v4  ;;  %v159_v39 = vld [vmem:[%s340_s5] sm:$0xff]  ;;  %p225_p0 = scmp.ne.s32.totalorder %s172_s13, %s224_s4  ;;  %p230_p2 = scmp.lt.s32.totalorder %s224_s4, %s224_s4 }
   0xb   :  { %202 = vmatpush3.bf16.msra.mxu0 %v217_v17  ;;  %p231_p3 = por %p230_p2, %p229_p1 }
   0xc   :  { %203 = vmatprep.subr.bf16.mxu0 %v248_v16 }
   0xd   :  { %p232_p4 = pnand %p231_p3, %p225_p0 }
   0xf   :  { %204 = vmatpush3.bf16.msra.mxu0 %v218_v18 }
  0x10   :  { %205 = vmatprep.subr.bf16.mxu0 %v248_v16 }
  0x13   :  { %206 = vmatpush3.bf16.msra.mxu0 %v219_v19 }
  0x92   :  { %v32_v5 = vpop.xlane.xlu0 %31 }
  0x93   :  { %v37_v6 = vmul.f32 0.015625, %v32_v5 }
  0x95   :  { %v39_v7 = vsub.f32 %v192_v1, %v37_v6 }
  0x96   :  { %v35_v8 = vpop.xlane.xlu0 %34 }
  0x97   :  { %v38_v9 = vmul.f32 0.015625, %v35_v8  ;;  %v41_v10 = vmul.f32 %v39_v7, %v39_v7 }
  0x99   :  { %v40_v11 = vsub.f32 %v193_v2, %v38_v9  ;;  %v43_v12 = vsel %vm29_vm0, %v41_v10, 0.0 }
  0x9a   :  { %44 = vadd.xlane.f32.xlu1 %v43_v12 }
  0x9b   :  { %v42_v13 = vmul.f32 %v40_v11, %v40_v11 }
  0x9d   :  { %v46_v14 = vsel %vm29_vm0, %v42_v13, 0.0 }
  0x9e   :  { %47 = vadd.xlane.f32.xlu1 %v46_v14 }
 0x127   :  { %v45_v20 = vpop.xlane.xlu1 %44 }
 0x128   :  { %v49_v21 = vmul.f32 0.015625, %v45_v20 }
 0x12a   :  { %v51_v22 = vadd.f32 1e-05, %v49_v21 }
 0x12b   :  { %v48_v23 = vpop.xlane.xlu1 %47 }
 0x12c   :  { %220 = vrsqrt.f32 %v51_v22  ;;  %v50_v24 = vmul.f32 0.015625, %v48_v23 }
 0x12e   :  { %v52_v25 = vadd.f32 1e-05, %v50_v24 }
 0x130   :  { %222 = vrsqrt.f32 %v52_v25 }
 0x136   :  { %v221_v26 = vpop.eup %220 }
 0x137   :  { %v55_v27 = vmul.f32 %v221_v26, %v39_v7 }
 0x139   :  { %v64_v31 = vmul.f32 %v182_v28, %v55_v27 }
 0x13a   :  { %v223_v29 = vpop.eup %222 }
 0x13b   :  { %v56_v30 = vmul.f32 %v223_v29, %v40_v11  ;;  %v73_v34 = vadd.f32 %v183_v32, %v64_v31 }
 0x13d   :  { %v65_v33 = vmul.f32 %v182_v28, %v56_v30 }
 0x13f   :  { %v74_v35 = vadd.f32 %v183_v32, %v65_v33 }
 0x141   :  { %v75_v36 = vpack.c.bf16 %v74_v35, %v73_v34 }
 0x143   :  { %208 = vmatmul.mubr.msk.bf16.vlgmr.msra.gmra.mrb[0].mxu0 %vm29_vm0, %v75_v36 }
 0x216   :  { %v152_v38 = vpop.f32.mrb[0].mxu0 }
 0x217   :  { %v153_v40 = vadd.f32 %v184_v37, %v152_v38  ;;  %v209_v41 = vpop.f32.mrb[1].mxu0 }
 0x218   :  { %v155_v42 = vpop.f32.mrb[2].mxu0 }
 0x219   :  { %v161_v44 = vadd.f32 %v159_v39, %v153_v40  ;;  %v156_v45 = vadd.f32 %v184_v37, %v155_v42  ;;  %v210_v46 = vpop.f32.mrb[3].mxu0 }
 0x21b   :  { %164 = vst.msk [vmem:[#allocation2] sm:$0xff] %vm163_vm2, %v161_v44  ;;  %v162_v47 = vadd.f32 %v160_v43, %v156_v45 }
 0x21d   :  { %165 = vst.msk [vmem:[#allocation2 + $0x8] sm:$0xff] %vm163_vm2, %v162_v47 }
 0x21e   :  { %235 = shalt.err (!%p232_p4)
}
 0x21f   :  { %s236_s17 = scalar_lea.hbm %s341_s6, 256 }
 0x220   :  { %p237_p5 = scmp.ne.s32.totalorder %s341_s6, %s236_s17  ;;  %p240_p6 = scmp.lt.u32.totalorder %s236_s17, %s341_s6 }
 0x222   :  { %p242_p7 = pnand %p240_p6, %p237_p5 }
 0x224   :  { %245 = shalt.err (!%p242_p7)
}
 0x225   :  { %s251_s21 = smov 128   ;;  %s252_s22 = smov 8  }
 0x226   :  { %177 = dma.vmem_to_hbm [thread:$0]  %s172_s13, 256, %s341_s6, [#allocation3], %s251_s21, %s251_s21, %s252_s22  }
 0x227   :  { %246 = dma.done.wait [#allocation3], 256  }
 0x228   :  { %247 = vsyncadd [#allocation3], 4294967040 }
 0x229   :  { %181 = vsyncpa [#allocation3], 1 }

</bundles_post_ra>
